<compile_context>
chip_gen: v7x
topology: tpu7x:2x2x1
jax: 0.10.0
libtpu: 0.0.40
codegen_flags: <defaults>
</compile_context>

<pallas_src>
import functools
import math

import jax
import jax.numpy as jnp
from jax import lax
from jax.experimental import pallas as pl
from jax.experimental.pallas import tpu as pltpu

_HALO = 8  # conv halo rows carried across chunks (>= d_conv - 1, 8-row aligned)


def mamba_layer_kernel(
    x_ref,        # (1, Lc, C)   input tokens for this (batch, chunk)
    gamma_ref,    # (1, C)       LayerNorm weight
    beta_ref,     # (1, C)       LayerNorm bias
    w_inx_ref,    # (C, Di)      in_proj weight, x half (bf16)
    w_inz_ref,    # (C, Di)      in_proj weight, z half (bf16)
    conv_w_ref,   # (K, Di)      depthwise causal conv weights
    conv_b_ref,   # (1, Di)      conv bias
    w_dt_ref,     # (Di, Di)     fused x_proj[:, :R] @ dt_proj weight (bf16)
    w_b_ref,      # (Di, N)      x_proj B columns (bf16)
    w_c_ref,      # (Di, N)      x_proj C columns (bf16)
    b_dt_ref,     # (1, Di)      dt_proj bias (applied inside softplus)
    a_flat_ref,   # (1, Di*N)    A = -exp(A_log), flattened lane-dense
    d_ref,        # (1, Di)      D skip parameter
    w_out_ref,    # (Di, C)      out_proj weight (bf16)
    rep_ref,      # (Di, Di*N)   0/1 "repeat each Di value N times" matrix
    tile_ref,     # (N, Di*N)    0/1 "tile N values across Di groups" matrix
    grp_ref,      # (Di*N, Di)   0/1 "sum over N within each Di group" matrix
    o_ref,        # (1, Lc, C)   output tokens
    da_s,         # VMEM (Lc, Di*N)     exp(dt * A)
    dbu_s,        # VMEM (Lc, Di*N)     dt * B * u
    cb_s,         # VMEM (Lc, Di*N)     C_t broadcast over Di
    y_s,          # VMEM (Lc, Di)       scan outputs
    hblk_s,       # VMEM (t_unroll, Di*N) per-block hidden states
    h_s,          # VMEM (1, Di*N)      running hidden state (carried)
    halo_s,       # VMEM (_HALO, Di)    last tokens of previous chunk (carried)
    *,
    eps,
    t_unroll,
):
    Lc = x_ref.shape[1]
    d_inner = d_ref.shape[1]
    K = conv_w_ref.shape[0]

    # Reset carried state at the start of every sequence (chunk 0 of a batch).
    @pl.when(pl.program_id(1) == 0)
    def _():
        h_s[...] = jnp.zeros_like(h_s)
        halo_s[...] = jnp.zeros_like(halo_s)

    x = x_ref[0].astype(jnp.float32)                                   # (Lc, C)

    # ---- LayerNorm over channels (float32 statistics) ----
    mean = jnp.mean(x, axis=-1, keepdims=True)
    var = jnp.mean((x - mean) ** 2, axis=-1, keepdims=True)
    xn = (x - mean) * lax.rsqrt(var + eps)
    xn = xn * gamma_ref[...] + beta_ref[...]
    xn16 = xn.astype(jnp.bfloat16)

    # ---- in_proj split into x / z halves (bf16 MXU, f32 accumulation) ----
    x_in = jnp.dot(xn16, w_inx_ref[...], preferred_element_type=jnp.float32)
    z = jnp.dot(xn16, w_inz_ref[...], preferred_element_type=jnp.float32)

    # ---- causal depthwise conv1d (padding K-1, truncated) + SiLU ----
    # halo_s holds the last _HALO tokens of the previous chunk (zeros at chunk
    # 0), reproducing PyTorch's left zero-padding across chunk boundaries.
    m_ext = _HALO + Lc
    x_ext = jnp.concatenate([halo_s[...], x_in], axis=0)               # (m_ext, Di)
    conv_w = conv_w_ref[...]
    base = _HALO - (K - 1)
    acc = jnp.zeros((Lc, d_inner), jnp.float32)
    for k in range(K):
        # shifted[t] = x_ext[base + k + t]  (pure sublane rotation on the XLU)
        shifted = pltpu.roll(x_ext, m_ext - (base + k), axis=0)[:Lc, :]
        acc = acc + shifted * conv_w[k:k + 1, :]
    halo_s[...] = x_in[Lc - _HALO:, :]                                 # aligned store
    u = acc + conv_b_ref[...]
    u = u * jax.nn.sigmoid(u)                                          # SiLU
    u16 = u.astype(jnp.bfloat16)

    # ---- x_proj (split) ; fused dt projection ; softplus ----
    b_mat = jnp.dot(u16, w_b_ref[...], preferred_element_type=jnp.float32)  # (Lc, N)
    c_mat = jnp.dot(u16, w_c_ref[...], preferred_element_type=jnp.float32)  # (Lc, N)
    dt = jnp.dot(u16, w_dt_ref[...], preferred_element_type=jnp.float32)    # (Lc, Di)
    dt = jax.nn.softplus(dt + b_dt_ref[...])

    # ---- lane-dense discretization in the flattened (Di*N) layout ----
    # The 0/1 matrices implement the Di<->N broadcasts on the MXU so every
    # scan buffer keeps a 128-multiple last dim (unmasked full-width stores).
    dt_b = jnp.dot(dt, rep_ref[...], preferred_element_type=jnp.float32)       # (Lc, DN)
    dtu_b = jnp.dot(dt * u, rep_ref[...], preferred_element_type=jnp.float32)  # (Lc, DN)
    b_b = jnp.dot(b_mat, tile_ref[...], preferred_element_type=jnp.float32)    # (Lc, DN)
    da_s[...] = jnp.exp(dt_b * a_flat_ref[...])
    dbu_s[...] = dtu_b * b_b
    cb_s[...] = jnp.dot(c_mat, tile_ref[...], preferred_element_type=jnp.float32)

    # ---- sequential selective scan: t_unroll tokens per iteration, with the
    #      C_t readout fused in (no (L, Di, N) hidden-state buffer). ----
    @pl.loop(0, Lc // t_unroll)
    def _(blk):
        off = pl.multiple_of(blk * t_unroll, t_unroll)
        da_blk = da_s[pl.ds(off, t_unroll), :]
        dbu_blk = dbu_s[pl.ds(off, t_unroll), :]
        c_blk = cb_s[pl.ds(off, t_unroll), :]
        h = h_s[...]                                                   # (1, DN), f32
        for r in range(t_unroll):                                      # unrolled
            h = da_blk[r:r + 1, :] * h + dbu_blk[r:r + 1, :]
            hblk_s[r:r + 1, :] = h
        h_s[...] = h
        # y[t, d] = sum_n h[t, d, n] * C[t, n]  via the group-sum matrix (MXU)
        y_s[pl.ds(off, t_unroll), :] = jnp.dot(
            hblk_s[...] * c_blk, grp_ref[...],
            preferred_element_type=jnp.float32)

    # ---- D skip connection, SiLU(z) gate, out_proj ----
    y = y_s[...] + u * d_ref[...]
    y = y * (z * jax.nn.sigmoid(z))
    out = jnp.dot(y.astype(jnp.bfloat16), w_out_ref[...],
                  preferred_element_type=jnp.float32)
    o_ref[0] = out.astype(o_ref.dtype)


def init_params(key, dim, d_state=16, d_conv=4, expand=2):
    """Deterministic synthetic parameters matching the Mamba(dim, ...) shapes."""
    d_inner = expand * dim
    dt_rank = math.ceil(dim / 16)
    ks = jax.random.split(key, 8)
    s = 0.1
    return dict(
        gamma=jnp.ones((1, dim), jnp.float32),
        beta=jnp.zeros((1, dim), jnp.float32),
        w_in=s * jax.random.normal(ks[0], (dim, 2 * d_inner), jnp.float32),
        conv_w=s * jax.random.normal(ks[1], (d_conv, d_inner), jnp.float32),
        conv_b=s * jax.random.normal(ks[2], (1, d_inner), jnp.float32),
        w_xp=s * jax.random.normal(ks[3], (d_inner, dt_rank + 2 * d_state), jnp.float32),
        w_dt=s * jax.random.normal(ks[4], (dt_rank, d_inner), jnp.float32),
        b_dt=s * jax.random.normal(ks[5], (1, d_inner), jnp.float32),
        # S4D-real init, as in mamba_ssm
        a_log=jnp.log(jnp.broadcast_to(
            jnp.arange(1, d_state + 1, dtype=jnp.float32), (d_inner, d_state))),
        d=jnp.ones((1, d_inner), jnp.float32),
        w_out=s * jax.random.normal(ks[6], (d_inner, dim), jnp.float32),
    )


def mamba_layer(x, params, *, chunk=128, t_unroll=8, eps=1e-5):
    B, C, H, W = x.shape
    L = H * W
    d_inner = params["d"].shape[1]
    n_state = params["a_log"].shape[1]
    dt_rank = params["w_dt"].shape[0]
    K = params["conv_w"].shape[0]
    dn = d_inner * n_state

    Lc = chunk if (L % chunk == 0) else L
    assert L % Lc == 0
    assert Lc % t_unroll == 0, "chunk length must be a multiple of the scan unroll"
    assert Lc >= _HALO >= K - 1, "chunk too small for the conv halo"
    num_chunks = L // Lc

    # NCHW -> (B, L, C) token-major (== x.reshape(B, C, L).transpose(-1, -2))
    x_flat = jnp.transpose(x.reshape(B, C, L), (0, 2, 1)).astype(jnp.float32)

    # ---- parameter pre-processing (host side, once) ----
    w_in = params["w_in"]
    w_inx = w_in[:, :d_inner].astype(jnp.bfloat16)
    w_inz = w_in[:, d_inner:].astype(jnp.bfloat16)
    w_xp = params["w_xp"]
    # Fuse the low-rank dt path: (u @ W_dt_low) @ W_dt == u @ (W_dt_low @ W_dt)
    w_dtf = jnp.dot(w_xp[:, :dt_rank], params["w_dt"]).astype(jnp.bfloat16)   # (Di, Di)
    w_b = w_xp[:, dt_rank:dt_rank + n_state].astype(jnp.bfloat16)             # (Di, N)
    w_c = w_xp[:, dt_rank + n_state:].astype(jnp.bfloat16)                    # (Di, N)
    w_out = params["w_out"].astype(jnp.bfloat16)
    a_flat = (-jnp.exp(params["a_log"])).reshape(1, dn)                       # (1, DN)

    # Constant 0/1 matrices for lane-dense (Di*N) broadcasts / group reduction.
    di_ids = jnp.arange(d_inner, dtype=jnp.int32)
    n_ids = jnp.arange(n_state, dtype=jnp.int32)
    group_of_flat = jnp.repeat(di_ids, n_state)        # flat index k -> k // N
    state_of_flat = jnp.tile(n_ids, d_inner)           # flat index k -> k %  N
    rep = (di_ids[:, None] == group_of_flat[None, :]).astype(jnp.float32)     # (Di, DN)
    tile_m = (n_ids[:, None] == state_of_flat[None, :]).astype(jnp.float32)   # (N, DN)
    grp = jnp.transpose(rep)                                                  # (DN, Di)

    inputs = (
        x_flat, params["gamma"], params["beta"], w_inx, w_inz,
        params["conv_w"], params["conv_b"], w_dtf, w_b, w_c,
        params["b_dt"], a_flat, params["d"], w_out, rep, tile_m, grp,
    )

    def fullspec(p):
        return pl.BlockSpec(p.shape, lambda b, l: (0,) * p.ndim)

    grid_spec = pltpu.PrefetchScalarGridSpec(
        num_scalar_prefetch=0,
        grid=(B, num_chunks),
        in_specs=[pl.BlockSpec((1, Lc, C), lambda b, l: (b, l, 0))]
                 + [fullspec(p) for p in inputs[1:]],
        out_specs=pl.BlockSpec((1, Lc, C), lambda b, l: (b, l, 0)),
        scratch_shapes=[
            pltpu.VMEM((Lc, dn), jnp.float32),          # exp(dt * A)
            pltpu.VMEM((Lc, dn), jnp.float32),          # dt * B * u
            pltpu.VMEM((Lc, dn), jnp.float32),          # C_t broadcast over Di
            pltpu.VMEM((Lc, d_inner), jnp.float32),     # scan outputs y
            pltpu.VMEM((t_unroll, dn), jnp.float32),    # per-block hidden states
            pltpu.VMEM((1, dn), jnp.float32),           # running hidden state
            pltpu.VMEM((_HALO, d_inner), jnp.float32),  # conv halo
        ],
    )

    out_flat = pl.pallas_call(
        functools.partial(mamba_layer_kernel, eps=eps, t_unroll=t_unroll),
        out_shape=jax.ShapeDtypeStruct((B, L, C), jnp.float32),
        grid_spec=grid_spec,
        compiler_params=pltpu.CompilerParams(
            # batch elements are independent -> megacore-parallel; token chunks
            # carry the SSM state / conv halo in scratch -> sequential.
            dimension_semantics=("parallel", "arbitrary"),
        ),
    )(*inputs)

    # (B, L, C) -> (B, C, H, W), mirroring .transpose(-1, -2).reshape(B, C, *img_dims)
    return jnp.transpose(out_flat, (0, 2, 1)).reshape(B, C, H, W)


if __name__ == "__main__":
    dim = 4            # channels
    B, H, W = 2, 16, 16
    d_state, d_conv, expand = 16, 4, 2

    key = jax.random.PRNGKey(0)
    kx, kp = jax.random.split(key)
    x = jax.random.normal(kx, (B, dim, H, W), jnp.float32)
    params = init_params(kp, dim, d_state=d_state, d_conv=d_conv, expand=expand)

    out = mamba_layer(x, params)           # L = 256 -> 2 chunks of 128 tokens
    out = jax.block_until_ready(out)
    assert out.shape == (B, dim, H, W)
    assert bool(jnp.all(jnp.isfinite(out)))
    print("KERNEL_OK")
</pallas_src>

<mosaic_0001>
module attributes {stable_mosaic.version = 11 : i64} {
  func.func @mamba_layer_kernel(%arg0: i32, %arg1: i32, %arg2: memref<1x128x4xf32, #tpu.memory_space<vmem>>, %arg3: memref<1x4xf32, #tpu.memory_space<vmem>>, %arg4: memref<1x4xf32, #tpu.memory_space<vmem>>, %arg5: memref<4x8xbf16, #tpu.memory_space<vmem>>, %arg6: memref<4x8xbf16, #tpu.memory_space<vmem>>, %arg7: memref<4x8xf32, #tpu.memory_space<vmem>>, %arg8: memref<1x8xf32, #tpu.memory_space<vmem>>, %arg9: memref<8x8xbf16, #tpu.memory_space<vmem>>, %arg10: memref<8x16xbf16, #tpu.memory_space<vmem>>, %arg11: memref<8x16xbf16, #tpu.memory_space<vmem>>, %arg12: memref<1x8xf32, #tpu.memory_space<vmem>>, %arg13: memref<1x128xf32, #tpu.memory_space<vmem>>, %arg14: memref<1x8xf32, #tpu.memory_space<vmem>>, %arg15: memref<8x4xbf16, #tpu.memory_space<vmem>>, %arg16: memref<8x128xf32, #tpu.memory_space<vmem>>, %arg17: memref<16x128xf32, #tpu.memory_space<vmem>>, %arg18: memref<128x8xf32, #tpu.memory_space<vmem>>, %arg19: memref<1x128x4xf32, #tpu.memory_space<vmem>>, %arg20: memref<128x128xf32, #tpu.memory_space<vmem>>, %arg21: memref<128x128xf32, #tpu.memory_space<vmem>>, %arg22: memref<128x128xf32, #tpu.memory_space<vmem>>, %arg23: memref<128x8xf32, #tpu.memory_space<vmem>>, %arg24: memref<8x128xf32, #tpu.memory_space<vmem>>, %arg25: memref<1x128xf32, #tpu.memory_space<vmem>>, %arg26: memref<8x8xf32, #tpu.memory_space<vmem>>) attributes {dimension_semantics = [#tpu.dimension_semantics<parallel>, #tpu.dimension_semantics<arbitrary>], iteration_bounds = array<i64: 2, 2>, scalar_prefetch = 0 : i64, scratch_operands = 7 : i64, tpu.core_type = #tpu.core_type<tc>, window_params = [{transform_indices = @transform_0, window_bounds = array<i64: 1, 128, 4>}, {pipeline_mode = #tpu.pipeline_mode<synchronous>, transform_indices = @transform_1, window_bounds = array<i64: 1, 4>}, {pipeline_mode = #tpu.pipeline_mode<synchronous>, transform_indices = @transform_2, window_bounds = array<i64: 1, 4>}, {pipeline_mode = #tpu.pipeline_mode<synchronous>, transform_indices = @transform_3, window_bounds = array<i64: 4, 8>}, {pipeline_mode = #tpu.pipeline_mode<synchronous>, transform_indices = @transform_4, window_bounds = array<i64: 4, 8>}, {pipeline_mode = #tpu.pipeline_mode<synchronous>, transform_indices = @transform_5, window_bounds = array<i64: 4, 8>}, {pipeline_mode = #tpu.pipeline_mode<synchronous>, transform_indices = @transform_6, window_bounds = array<i64: 1, 8>}, {pipeline_mode = #tpu.pipeline_mode<synchronous>, transform_indices = @transform_7, window_bounds = array<i64: 8, 8>}, {pipeline_mode = #tpu.pipeline_mode<synchronous>, transform_indices = @transform_8, window_bounds = array<i64: 8, 16>}, {pipeline_mode = #tpu.pipeline_mode<synchronous>, transform_indices = @transform_9, window_bounds = array<i64: 8, 16>}, {pipeline_mode = #tpu.pipeline_mode<synchronous>, transform_indices = @transform_10, window_bounds = array<i64: 1, 8>}, {pipeline_mode = #tpu.pipeline_mode<synchronous>, transform_indices = @transform_11, window_bounds = array<i64: 1, 128>}, {pipeline_mode = #tpu.pipeline_mode<synchronous>, transform_indices = @transform_12, window_bounds = array<i64: 1, 8>}, {pipeline_mode = #tpu.pipeline_mode<synchronous>, transform_indices = @transform_13, window_bounds = array<i64: 8, 4>}, {pipeline_mode = #tpu.pipeline_mode<synchronous>, transform_indices = @transform_14, window_bounds = array<i64: 8, 128>}, {pipeline_mode = #tpu.pipeline_mode<synchronous>, transform_indices = @transform_15, window_bounds = array<i64: 16, 128>}, {pipeline_mode = #tpu.pipeline_mode<synchronous>, transform_indices = @transform_16, window_bounds = array<i64: 128, 8>}, {transform_indices = @transform_17, window_bounds = array<i64: 1, 128, 4>}]} {
    %c0_i32 = arith.constant 0 : i32
    %0 = arith.cmpi eq, %arg1, %c0_i32 : i32
    %1 = arith.extui %0 : i1 to i32
    %c0_i32_0 = arith.constant 0 : i32
    %2 = arith.cmpi ne, %1, %c0_i32_0 : i32
    scf.if %2 {
      %cst_73 = arith.constant 0.000000e+00 : f32
      %133 = vector.broadcast %cst_73 : f32 to vector<1x128xf32>
      %c0_74 = arith.constant 0 : index
      %c0_75 = arith.constant 0 : index
      %134 = vector.load %arg25[%c0_74, %c0_75] : memref<1x128xf32, #tpu.memory_space<vmem>>, vector<1x128xf32>
      tpu.vector_store %arg25[%c0_74, %c0_75], %133 {strides = array<i32>} : memref<1x128xf32, #tpu.memory_space<vmem>>, vector<1x128xf32>,
      %cst_76 = arith.constant 0.000000e+00 : f32
      %135 = vector.broadcast %cst_76 : f32 to vector<8x8xf32>
      %c0_77 = arith.constant 0 : index
      %c0_78 = arith.constant 0 : index
      %136 = vector.load %arg26[%c0_77, %c0_78] : memref<8x8xf32, #tpu.memory_space<vmem>>, vector<8x8xf32>
      tpu.vector_store %arg26[%c0_77, %c0_78], %135 {strides = array<i32>} : memref<8x8xf32, #tpu.memory_space<vmem>>, vector<8x8xf32>,
    } else {
    }
    %c0 = arith.constant 0 : index
    %c0_1 = arith.constant 0 : index
    %c0_2 = arith.constant 0 : index
    %3 = vector.load %arg2[%c0, %c0_1, %c0_2] : memref<1x128x4xf32, #tpu.memory_space<vmem>>, vector<1x128x4xf32>
    %4 = vector.shape_cast %3 : vector<1x128x4xf32> to vector<128x4xf32>
    %cst = arith.constant dense<0.000000e+00> : vector<128xf32>
    %5 = vector.multi_reduction <add>, %4, %cst [1] : vector<128x4xf32> to vector<128xf32>
    %6 = vector.shape_cast %5 : vector<128xf32> to vector<128x1xf32>
    %cst_3 = arith.constant 4.000000e+00 : f32
    %7 = vector.broadcast %cst_3 : f32 to vector<128x1xf32>
    %8 = arith.divf %6, %7 : vector<128x1xf32>
    %9 = vector.broadcast %8 : vector<128x1xf32> to vector<128x4xf32>
    %10 = arith.subf %4, %9 : vector<128x4xf32>
    %11 = arith.mulf %10, %10 : vector<128x4xf32>
    %cst_4 = arith.constant dense<0.000000e+00> : vector<128xf32>
    %12 = vector.multi_reduction <add>, %11, %cst_4 [1] : vector<128x4xf32> to vector<128xf32>
    %13 = vector.shape_cast %12 : vector<128xf32> to vector<128x1xf32>
    %cst_5 = arith.constant 4.000000e+00 : f32
    %14 = vector.broadcast %cst_5 : f32 to vector<128x1xf32>
    %15 = arith.divf %13, %14 : vector<128x1xf32>
    %16 = vector.broadcast %8 : vector<128x1xf32> to vector<128x4xf32>
    %17 = arith.subf %4, %16 : vector<128x4xf32>
    %cst_6 = arith.constant 9.99999974E-6 : f32
    %18 = vector.broadcast %cst_6 : f32 to vector<128x1xf32>
    %19 = arith.addf %15, %18 : vector<128x1xf32>
    %20 = math.rsqrt %19 : vector<128x1xf32>
    %21 = vector.broadcast %20 : vector<128x1xf32> to vector<128x4xf32>
    %22 = arith.mulf %17, %21 : vector<128x4xf32>
    %c0_7 = arith.constant 0 : index
    %c0_8 = arith.constant 0 : index
    %23 = vector.load %arg3[%c0_7, %c0_8] : memref<1x4xf32, #tpu.memory_space<vmem>>, vector<1x4xf32>
    %24 = vector.broadcast %23 : vector<1x4xf32> to vector<128x4xf32>
    %25 = arith.mulf %22, %24 : vector<128x4xf32>
    %c0_9 = arith.constant 0 : index
    %c0_10 = arith.constant 0 : index
    %26 = vector.load %arg4[%c0_9, %c0_10] : memref<1x4xf32, #tpu.memory_space<vmem>>, vector<1x4xf32>
    %27 = vector.broadcast %26 : vector<1x4xf32> to vector<128x4xf32>
    %28 = arith.addf %25, %27 : vector<128x4xf32>
    %29 = arith.truncf %28 : vector<128x4xf32> to vector<128x4xbf16>
    %c0_11 = arith.constant 0 : index
    %c0_12 = arith.constant 0 : index
    %30 = vector.load %arg5[%c0_11, %c0_12] : memref<4x8xbf16, #tpu.memory_space<vmem>>, vector<4x8xbf16>
    %cst_13 = arith.constant dense<0.000000e+00> : vector<128x8xf32>
    %31 = tpu.matmul %29, %30, %cst_13 {dimension_numbers = #tpu.dot_dimension_numbers<[1], [0], [0], [1], [0, 0, 1, 1], [], []>} : vector<128x4xbf16>, vector<4x8xbf16>, vector<128x8xf32> -> vector<128x8xf32>
    %c0_14 = arith.constant 0 : index
    %c0_15 = arith.constant 0 : index
    %32 = vector.load %arg6[%c0_14, %c0_15] : memref<4x8xbf16, #tpu.memory_space<vmem>>, vector<4x8xbf16>
    %cst_16 = arith.constant dense<0.000000e+00> : vector<128x8xf32>
    %33 = tpu.matmul %29, %32, %cst_16 {dimension_numbers = #tpu.dot_dimension_numbers<[1], [0], [0], [1], [0, 0, 1, 1], [], []>} : vector<128x4xbf16>, vector<4x8xbf16>, vector<128x8xf32> -> vector<128x8xf32>
    %c0_17 = arith.constant 0 : index
    %c0_18 = arith.constant 0 : index
    %34 = vector.load %arg26[%c0_17, %c0_18] : memref<8x8xf32, #tpu.memory_space<vmem>>, vector<8x8xf32>
    %35 = tpu.concatenate %34, %31 in 0 : vector<8x8xf32>, vector<128x8xf32> -> vector<136x8xf32>
    %c0_19 = arith.constant 0 : index
    %c0_20 = arith.constant 0 : index
    %36 = vector.load %arg7[%c0_19, %c0_20] : memref<4x8xf32, #tpu.memory_space<vmem>>, vector<4x8xf32>
    %cst_21 = arith.constant 0.000000e+00 : f32
    %37 = vector.broadcast %cst_21 : f32 to vector<128x8xf32>
    %c131_i32 = arith.constant 131 : i32
    %38 = tpu.dynamic_rotate %35 by %c131_i32 dim 0 : vector<136x8xf32>, i32 -> vector<136x8xf32>
    %39 = vector.extract_strided_slice %38 {offsets = [0, 0], sizes = [128, 8], strides = [1, 1]} : vector<136x8xf32> to vector<128x8xf32>
    %40 = vector.extract_strided_slice %36 {offsets = [0, 0], sizes = [1, 8], strides = [1, 1]} : vector<4x8xf32> to vector<1x8xf32>
    %41 = vector.broadcast %40 : vector<1x8xf32> to vector<128x8xf32>
    %42 = arith.mulf %39, %41 : vector<128x8xf32>
    %43 = arith.addf %37, %42 : vector<128x8xf32>
    %c130_i32 = arith.constant 130 : i32
    %44 = tpu.dynamic_rotate %35 by %c130_i32 dim 0 : vector<136x8xf32>, i32 -> vector<136x8xf32>
    %45 = vector.extract_strided_slice %44 {offsets = [0, 0], sizes = [128, 8], strides = [1, 1]} : vector<136x8xf32> to vector<128x8xf32>
    %46 = vector.extract_strided_slice %36 {offsets = [1, 0], sizes = [1, 8], strides = [1, 1]} : vector<4x8xf32> to vector<1x8xf32>
    %47 = vector.broadcast %46 : vector<1x8xf32> to vector<128x8xf32>
    %48 = arith.mulf %45, %47 : vector<128x8xf32>
    %49 = arith.addf %43, %48 : vector<128x8xf32>
    %c129_i32 = arith.constant 129 : i32
    %50 = tpu.dynamic_rotate %35 by %c129_i32 dim 0 : vector<136x8xf32>, i32 -> vector<136x8xf32>
    %51 = vector.extract_strided_slice %50 {offsets = [0, 0], sizes = [128, 8], strides = [1, 1]} : vector<136x8xf32> to vector<128x8xf32>
    %52 = vector.extract_strided_slice %36 {offsets = [2, 0], sizes = [1, 8], strides = [1, 1]} : vector<4x8xf32> to vector<1x8xf32>
    %53 = vector.broadcast %52 : vector<1x8xf32> to vector<128x8xf32>
    %54 = arith.mulf %51, %53 : vector<128x8xf32>
    %55 = arith.addf %49, %54 : vector<128x8xf32>
    %c128_i32 = arith.constant 128 : i32
    %56 = tpu.dynamic_rotate %35 by %c128_i32 dim 0 : vector<136x8xf32>, i32 -> vector<136x8xf32>
    %57 = vector.extract_strided_slice %56 {offsets = [0, 0], sizes = [128, 8], strides = [1, 1]} : vector<136x8xf32> to vector<128x8xf32>
    %58 = vector.extract_strided_slice %36 {offsets = [3, 0], sizes = [1, 8], strides = [1, 1]} : vector<4x8xf32> to vector<1x8xf32>
    %59 = vector.broadcast %58 : vector<1x8xf32> to vector<128x8xf32>
    %60 = arith.mulf %57, %59 : vector<128x8xf32>
    %61 = arith.addf %55, %60 : vector<128x8xf32>
    %62 = vector.extract_strided_slice %31 {offsets = [120, 0], sizes = [8, 8], strides = [1, 1]} : vector<128x8xf32> to vector<8x8xf32>
    %c0_22 = arith.constant 0 : index
    %c0_23 = arith.constant 0 : index
    %63 = vector.load %arg26[%c0_22, %c0_23] : memref<8x8xf32, #tpu.memory_space<vmem>>, vector<8x8xf32>
    tpu.vector_store %arg26[%c0_22, %c0_23], %62 {strides = array<i32>} : memref<8x8xf32, #tpu.memory_space<vmem>>, vector<8x8xf32>,
    %c0_24 = arith.constant 0 : index
    %c0_25 = arith.constant 0 : index
    %64 = vector.load %arg8[%c0_24, %c0_25] : memref<1x8xf32, #tpu.memory_space<vmem>>, vector<1x8xf32>
    %65 = vector.broadcast %64 : vector<1x8xf32> to vector<128x8xf32>
    %66 = arith.addf %61, %65 : vector<128x8xf32>
    %67 = arith.negf %66 : vector<128x8xf32>
    %68 = math.exp %67 : vector<128x8xf32>
    %cst_26 = arith.constant 1.000000e+00 : f32
    %69 = vector.broadcast %cst_26 : f32 to vector<128x8xf32>
    %70 = arith.addf %69, %68 : vector<128x8xf32>
    %71 = arith.divf %69, %70 : vector<128x8xf32>
    %72 = arith.mulf %66, %71 : vector<128x8xf32>
    %73 = arith.truncf %72 : vector<128x8xf32> to vector<128x8xbf16>
    %c0_27 = arith.constant 0 : index
    %c0_28 = arith.constant 0 : index
    %74 = vector.load %arg10[%c0_27, %c0_28] : memref<8x16xbf16, #tpu.memory_space<vmem>>, vector<8x16xbf16>
    %cst_29 = arith.constant dense<0.000000e+00> : vector<128x16xf32>
    %75 = tpu.matmul %73, %74, %cst_29 {dimension_numbers = #tpu.dot_dimension_numbers<[1], [0], [0], [1], [0, 0, 1, 1], [], []>} : vector<128x8xbf16>, vector<8x16xbf16>, vector<128x16xf32> -> vector<128x16xf32>
    %c0_30 = arith.constant 0 : index
    %c0_31 = arith.constant 0 : index
    %76 = vector.load %arg11[%c0_30, %c0_31] : memref<8x16xbf16, #tpu.memory_space<vmem>>, vector<8x16xbf16>
    %cst_32 = arith.constant dense<0.000000e+00> : vector<128x16xf32>
    %77 = tpu.matmul %73, %76, %cst_32 {dimension_numbers = #tpu.dot_dimension_numbers<[1], [0], [0], [1], [0, 0, 1, 1], [], []>} : vector<128x8xbf16>, vector<8x16xbf16>, vector<128x16xf32> -> vector<128x16xf32>
    %c0_33 = arith.constant 0 : index
    %c0_34 = arith.constant 0 : index
    %78 = vector.load %arg9[%c0_33, %c0_34] : memref<8x8xbf16, #tpu.memory_space<vmem>>, vector<8x8xbf16>
    %cst_35 = arith.constant dense<0.000000e+00> : vector<128x8xf32>
    %79 = tpu.matmul %73, %78, %cst_35 {dimension_numbers = #tpu.dot_dimension_numbers<[1], [0], [0], [1], [0, 0, 1, 1], [], []>} : vector<128x8xbf16>, vector<8x8xbf16>, vector<128x8xf32> -> vector<128x8xf32>
    %c0_36 = arith.constant 0 : index
    %c0_37 = arith.constant 0 : index
    %80 = vector.load %arg12[%c0_36, %c0_37] : memref<1x8xf32, #tpu.memory_space<vmem>>, vector<1x8xf32>
    %81 = vector.broadcast %80 : vector<1x8xf32> to vector<128x8xf32>
    %82 = arith.addf %79, %81 : vector<128x8xf32>
    %cst_38 = arith.constant 0.000000e+00 : f32
    %83 = vector.broadcast %cst_38 : f32 to vector<128x8xf32>
    %84 = arith.maximumf %82, %83 : vector<128x8xf32>
    %85 = vector.broadcast %cst_38 : f32 to vector<128x8xf32>
    %86 = arith.subf %82, %85 : vector<128x8xf32>
    %87 = arith.cmpf one, %86, %86 : vector<128x8xf32>
    %88 = vector.broadcast %cst_38 : f32 to vector<128x8xf32>
    %89 = arith.addf %82, %88 : vector<128x8xf32>
    %90 = math.absf %86 : vector<128x8xf32>
    %cst_39 = arith.constant 0.000000e+00 : f32
    %91 = vector.broadcast %cst_39 : f32 to vector<128x8xf32>
    %92 = arith.subf %91, %90 : vector<128x8xf32>
    %93 = math.exp %92 : vector<128x8xf32>
    %94 = math.log1p %93 : vector<128x8xf32>
    %95 = arith.addf %84, %94 : vector<128x8xf32>
    %96 = arith.select %87, %89, %95 : vector<128x8xi1>, vector<128x8xf32>
    %c0_40 = arith.constant 0 : index
    %c0_41 = arith.constant 0 : index
    %97 = vector.load %arg16[%c0_40, %c0_41] : memref<8x128xf32, #tpu.memory_space<vmem>>, vector<8x128xf32>
    %cst_42 = arith.constant dense<0.000000e+00> : vector<128x128xf32>
    %98 = tpu.matmul %96, %97, %cst_42 {dimension_numbers = #tpu.dot_dimension_numbers<[1], [0], [0], [1], [0, 0, 1, 1], [], []>} : vector<128x8xf32>, vector<8x128xf32>, vector<128x128xf32> -> vector<128x128xf32>
    %99 = arith.mulf %96, %72 : vector<128x8xf32>
    %c0_43 = arith.constant 0 : index
    %c0_44 = arith.constant 0 : index
    %100 = vector.load %arg16[%c0_43, %c0_44] : memref<8x128xf32, #tpu.memory_space<vmem>>, vector<8x128xf32>
    %cst_45 = arith.constant dense<0.000000e+00> : vector<128x128xf32>
    %101 = tpu.matmul %99, %100, %cst_45 {dimension_numbers = #tpu.dot_dimension_numbers<[1], [0], [0], [1], [0, 0, 1, 1], [], []>} : vector<128x8xf32>, vector<8x128xf32>, vector<128x128xf32> -> vector<128x128xf32>
    %c0_46 = arith.constant 0 : index
    %c0_47 = arith.constant 0 : index
    %102 = vector.load %arg17[%c0_46, %c0_47] : memref<16x128xf32, #tpu.memory_space<vmem>>, vector<16x128xf32>
    %cst_48 = arith.constant dense<0.000000e+00> : vector<128x128xf32>
    %103 = tpu.matmul %75, %102, %cst_48 {dimension_numbers = #tpu.dot_dimension_numbers<[1], [0], [0], [1], [0, 0, 1, 1], [], []>} : vector<128x16xf32>, vector<16x128xf32>, vector<128x128xf32> -> vector<128x128xf32>
    %c0_49 = arith.constant 0 : index
    %c0_50 = arith.constant 0 : index
    %104 = vector.load %arg13[%c0_49, %c0_50] : memref<1x128xf32, #tpu.memory_space<vmem>>, vector<1x128xf32>
    %105 = vector.broadcast %104 : vector<1x128xf32> to vector<128x128xf32>
    %106 = arith.mulf %98, %105 : vector<128x128xf32>
    %107 = math.exp %106 : vector<128x128xf32>
    %c0_51 = arith.constant 0 : index
    %c0_52 = arith.constant 0 : index
    %108 = vector.load %arg20[%c0_51, %c0_52] : memref<128x128xf32, #tpu.memory_space<vmem>>, vector<128x128xf32>
    tpu.vector_store %arg20[%c0_51, %c0_52], %107 {strides = array<i32>} : memref<128x128xf32, #tpu.memory_space<vmem>>, vector<128x128xf32>,
    %109 = arith.mulf %101, %103 : vector<128x128xf32>
    %c0_53 = arith.constant 0 : index
    %c0_54 = arith.constant 0 : index
    %110 = vector.load %arg21[%c0_53, %c0_54] : memref<128x128xf32, #tpu.memory_space<vmem>>, vector<128x128xf32>
    tpu.vector_store %arg21[%c0_53, %c0_54], %109 {strides = array<i32>} : memref<128x128xf32, #tpu.memory_space<vmem>>, vector<128x128xf32>,
    %c0_55 = arith.constant 0 : index
    %c0_56 = arith.constant 0 : index
    %111 = vector.load %arg17[%c0_55, %c0_56] : memref<16x128xf32, #tpu.memory_space<vmem>>, vector<16x128xf32>
    %cst_57 = arith.constant dense<0.000000e+00> : vector<128x128xf32>
    %112 = tpu.matmul %77, %111, %cst_57 {dimension_numbers = #tpu.dot_dimension_numbers<[1], [0], [0], [1], [0, 0, 1, 1], [], []>} : vector<128x16xf32>, vector<16x128xf32>, vector<128x128xf32> -> vector<128x128xf32>
    %c0_58 = arith.constant 0 : index
    %c0_59 = arith.constant 0 : index
    %113 = vector.load %arg22[%c0_58, %c0_59] : memref<128x128xf32, #tpu.memory_space<vmem>>, vector<128x128xf32>
    tpu.vector_store %arg22[%c0_58, %c0_59], %112 {strides = array<i32>} : memref<128x128xf32, #tpu.memory_space<vmem>>, vector<128x128xf32>,
    %c0_i32_60 = arith.constant 0 : i32
    %c16_i32 = arith.constant 16 : i32
    %114 = arith.addi %c0_i32_60, %c16_i32 : i32
    %c1_i32 = arith.constant 1 : i32
    scf.for %arg27 = %c0_i32_60 to %114 step %c1_i32  : i32 {
      %c1_i32_73 = arith.constant 1 : i32
      %133 = arith.muli %arg27, %c1_i32_73 : i32
      %c0_i32_74 = arith.constant 0 : i32
      %134 = arith.addi %c0_i32_74, %133 : i32
      %c8_i32 = arith.constant 8 : i32
      %135 = arith.muli %134, %c8_i32 : i32
      %136 = tpu.assume_multiple %135, 8 : i32
      %137 = arith.index_cast %136 : i32 to index
      %c0_75 = arith.constant 0 : index
      %138 = vector.load %arg20[%137, %c0_75] : memref<128x128xf32, #tpu.memory_space<vmem>>, vector<8x128xf32>
      %139 = arith.index_cast %136 : i32 to index
      %c0_76 = arith.constant 0 : index
      %140 = vector.load %arg21[%139, %c0_76] : memref<128x128xf32, #tpu.memory_space<vmem>>, vector<8x128xf32>
      %141 = arith.index_cast %136 : i32 to index
      %c0_77 = arith.constant 0 : index
      %142 = vector.load %arg22[%141, %c0_77] : memref<128x128xf32, #tpu.memory_space<vmem>>, vector<8x128xf32>
      %c0_78 = arith.constant 0 : index
      %c0_79 = arith.constant 0 : index
      %143 = vector.load %arg25[%c0_78, %c0_79] : memref<1x128xf32, #tpu.memory_space<vmem>>, vector<1x128xf32>
      %144 = vector.extract_strided_slice %138 {offsets = [0, 0], sizes = [1, 128], strides = [1, 1]} : vector<8x128xf32> to vector<1x128xf32>
      %145 = arith.mulf %144, %143 : vector<1x128xf32>
      %146 = vector.extract_strided_slice %140 {offsets = [0, 0], sizes = [1, 128], strides = [1, 1]} : vector<8x128xf32> to vector<1x128xf32>
      %147 = arith.addf %145, %146 : vector<1x128xf32>
      %c0_80 = arith.constant 0 : index
      %c0_81 = arith.constant 0 : index
      %148 = vector.load %arg24[%c0_80, %c0_81] : memref<8x128xf32, #tpu.memory_space<vmem>>, vector<1x128xf32>
      tpu.vector_store %arg24[%c0_80, %c0_81], %147 {strides = array<i32>} : memref<8x128xf32, #tpu.memory_space<vmem>>, vector<1x128xf32>,
      %149 = vector.extract_strided_slice %138 {offsets = [1, 0], sizes = [1, 128], strides = [1, 1]} : vector<8x128xf32> to vector<1x128xf32>
      %150 = arith.mulf %149, %147 : vector<1x128xf32>
      %151 = vector.extract_strided_slice %140 {offsets = [1, 0], sizes = [1, 128], strides = [1, 1]} : vector<8x128xf32> to vector<1x128xf32>
      %152 = arith.addf %150, %151 : vector<1x128xf32>
      %c1 = arith.constant 1 : index
      %c0_82 = arith.constant 0 : index
      %153 = vector.load %arg24[%c1, %c0_82] : memref<8x128xf32, #tpu.memory_space<vmem>>, vector<1x128xf32>
      tpu.vector_store %arg24[%c1, %c0_82], %152 {strides = array<i32>} : memref<8x128xf32, #tpu.memory_space<vmem>>, vector<1x128xf32>,
      %154 = vector.extract_strided_slice %138 {offsets = [2, 0], sizes = [1, 128], strides = [1, 1]} : vector<8x128xf32> to vector<1x128xf32>
      %155 = arith.mulf %154, %152 : vector<1x128xf32>
      %156 = vector.extract_strided_slice %140 {offsets = [2, 0], sizes = [1, 128], strides = [1, 1]} : vector<8x128xf32> to vector<1x128xf32>
      %157 = arith.addf %155, %156 : vector<1x128xf32>
      %c2 = arith.constant 2 : index
      %c0_83 = arith.constant 0 : index
      %158 = vector.load %arg24[%c2, %c0_83] : memref<8x128xf32, #tpu.memory_space<vmem>>, vector<1x128xf32>
      tpu.vector_store %arg24[%c2, %c0_83], %157 {strides = array<i32>} : memref<8x128xf32, #tpu.memory_space<vmem>>, vector<1x128xf32>,
      %159 = vector.extract_strided_slice %138 {offsets = [3, 0], sizes = [1, 128], strides = [1, 1]} : vector<8x128xf32> to vector<1x128xf32>
      %160 = arith.mulf %159, %157 : vector<1x128xf32>
      %161 = vector.extract_strided_slice %140 {offsets = [3, 0], sizes = [1, 128], strides = [1, 1]} : vector<8x128xf32> to vector<1x128xf32>
      %162 = arith.addf %160, %161 : vector<1x128xf32>
      %c3 = arith.constant 3 : index
      %c0_84 = arith.constant 0 : index
      %163 = vector.load %arg24[%c3, %c0_84] : memref<8x128xf32, #tpu.memory_space<vmem>>, vector<1x128xf32>
      tpu.vector_store %arg24[%c3, %c0_84], %162 {strides = array<i32>} : memref<8x128xf32, #tpu.memory_space<vmem>>, vector<1x128xf32>,
      %164 = vector.extract_strided_slice %138 {offsets = [4, 0], sizes = [1, 128], strides = [1, 1]} : vector<8x128xf32> to vector<1x128xf32>
      %165 = arith.mulf %164, %162 : vector<1x128xf32>
      %166 = vector.extract_strided_slice %140 {offsets = [4, 0], sizes = [1, 128], strides = [1, 1]} : vector<8x128xf32> to vector<1x128xf32>
      %167 = arith.addf %165, %166 : vector<1x128xf32>
      %c4 = arith.constant 4 : index
      %c0_85 = arith.constant 0 : index
      %168 = vector.load %arg24[%c4, %c0_85] : memref<8x128xf32, #tpu.memory_space<vmem>>, vector<1x128xf32>
      tpu.vector_store %arg24[%c4, %c0_85], %167 {strides = array<i32>} : memref<8x128xf32, #tpu.memory_space<vmem>>, vector<1x128xf32>,
      %169 = vector.extract_strided_slice %138 {offsets = [5, 0], sizes = [1, 128], strides = [1, 1]} : vector<8x128xf32> to vector<1x128xf32>
      %170 = arith.mulf %169, %167 : vector<1x128xf32>
      %171 = vector.extract_strided_slice %140 {offsets = [5, 0], sizes = [1, 128], strides = [1, 1]} : vector<8x128xf32> to vector<1x128xf32>
      %172 = arith.addf %170, %171 : vector<1x128xf32>
      %c5 = arith.constant 5 : index
      %c0_86 = arith.constant 0 : index
      %173 = vector.load %arg24[%c5, %c0_86] : memref<8x128xf32, #tpu.memory_space<vmem>>, vector<1x128xf32>
      tpu.vector_store %arg24[%c5, %c0_86], %172 {strides = array<i32>} : memref<8x128xf32, #tpu.memory_space<vmem>>, vector<1x128xf32>,
      %174 = vector.extract_strided_slice %138 {offsets = [6, 0], sizes = [1, 128], strides = [1, 1]} : vector<8x128xf32> to vector<1x128xf32>
      %175 = arith.mulf %174, %172 : vector<1x128xf32>
      %176 = vector.extract_strided_slice %140 {offsets = [6, 0], sizes = [1, 128], strides = [1, 1]} : vector<8x128xf32> to vector<1x128xf32>
      %177 = arith.addf %175, %176 : vector<1x128xf32>
      %c6 = arith.constant 6 : index
      %c0_87 = arith.constant 0 : index
      %178 = vector.load %arg24[%c6, %c0_87] : memref<8x128xf32, #tpu.memory_space<vmem>>, vector<1x128xf32>
      tpu.vector_store %arg24[%c6, %c0_87], %177 {strides = array<i32>} : memref<8x128xf32, #tpu.memory_space<vmem>>, vector<1x128xf32>,
      %179 = vector.extract_strided_slice %138 {offsets = [7, 0], sizes = [1, 128], strides = [1, 1]} : vector<8x128xf32> to vector<1x128xf32>
      %180 = arith.mulf %179, %177 : vector<1x128xf32>
      %181 = vector.extract_strided_slice %140 {offsets = [7, 0], sizes = [1, 128], strides = [1, 1]} : vector<8x128xf32> to vector<1x128xf32>
      %182 = arith.addf %180, %181 : vector<1x128xf32>
      %c7 = arith.constant 7 : index
      %c0_88 = arith.constant 0 : index
      %183 = vector.load %arg24[%c7, %c0_88] : memref<8x128xf32, #tpu.memory_space<vmem>>, vector<1x128xf32>
      tpu.vector_store %arg24[%c7, %c0_88], %182 {strides = array<i32>} : memref<8x128xf32, #tpu.memory_space<vmem>>, vector<1x128xf32>,
      %c0_89 = arith.constant 0 : index
      %c0_90 = arith.constant 0 : index
      %184 = vector.load %arg25[%c0_89, %c0_90] : memref<1x128xf32, #tpu.memory_space<vmem>>, vector<1x128xf32>
      tpu.vector_store %arg25[%c0_89, %c0_90], %182 {strides = array<i32>} : memref<1x128xf32, #tpu.memory_space<vmem>>, vector<1x128xf32>,
      %c0_91 = arith.constant 0 : index
      %c0_92 = arith.constant 0 : index
      %185 = vector.load %arg24[%c0_91, %c0_92] : memref<8x128xf32, #tpu.memory_space<vmem>>, vector<8x128xf32>
      %186 = arith.mulf %185, %142 : vector<8x128xf32>
      %c0_93 = arith.constant 0 : index
      %c0_94 = arith.constant 0 : index
      %187 = vector.load %arg18[%c0_93, %c0_94] : memref<128x8xf32, #tpu.memory_space<vmem>>, vector<128x8xf32>
      %cst_95 = arith.constant dense<0.000000e+00> : vector<8x8xf32>
      %188 = tpu.matmul %186, %187, %cst_95 {dimension_numbers = #tpu.dot_dimension_numbers<[1], [0], [0], [1], [0, 0, 1, 1], [], []>} : vector<8x128xf32>, vector<128x8xf32>, vector<8x8xf32> -> vector<8x8xf32>
      %189 = arith.index_cast %136 : i32 to index
      %c0_96 = arith.constant 0 : index
      %190 = vector.load %arg23[%189, %c0_96] : memref<128x8xf32, #tpu.memory_space<vmem>>, vector<8x8xf32>
      tpu.vector_store %arg23[%189, %c0_96], %188 {strides = array<i32>} : memref<128x8xf32, #tpu.memory_space<vmem>>, vector<8x8xf32>,
    }
    %c16_i32_61 = arith.constant 16 : i32
    %c0_62 = arith.constant 0 : index
    %c0_63 = arith.constant 0 : index
    %115 = vector.load %arg23[%c0_62, %c0_63] : memref<128x8xf32, #tpu.memory_space<vmem>>, vector<128x8xf32>
    %c0_64 = arith.constant 0 : index
    %c0_65 = arith.constant 0 : index
    %116 = vector.load %arg14[%c0_64, %c0_65] : memref<1x8xf32, #tpu.memory_space<vmem>>, vector<1x8xf32>
    %117 = vector.broadcast %116 : vector<1x8xf32> to vector<128x8xf32>
    %118 = arith.mulf %72, %117 : vector<128x8xf32>
    %119 = arith.addf %115, %118 : vector<128x8xf32>
    %120 = arith.negf %33 : vector<128x8xf32>
    %121 = math.exp %120 : vector<128x8xf32>
    %cst_66 = arith.constant 1.000000e+00 : f32
    %122 = vector.broadcast %cst_66 : f32 to vector<128x8xf32>
    %123 = arith.addf %122, %121 : vector<128x8xf32>
    %124 = arith.divf %122, %123 : vector<128x8xf32>
    %125 = arith.mulf %33, %124 : vector<128x8xf32>
    %126 = arith.mulf %119, %125 : vector<128x8xf32>
    %127 = arith.truncf %126 : vector<128x8xf32> to vector<128x8xbf16>
    %c0_67 = arith.constant 0 : index
    %c0_68 = arith.constant 0 : index
    %128 = vector.load %arg15[%c0_67, %c0_68] : memref<8x4xbf16, #tpu.memory_space<vmem>>, vector<8x4xbf16>
    %cst_69 = arith.constant dense<0.000000e+00> : vector<128x4xf32>
    %129 = tpu.matmul %127, %128, %cst_69 {dimension_numbers = #tpu.dot_dimension_numbers<[1], [0], [0], [1], [0, 0, 1, 1], [], []>} : vector<128x8xbf16>, vector<8x4xbf16>, vector<128x4xf32> -> vector<128x4xf32>
    %c0_70 = arith.constant 0 : index
    %c0_71 = arith.constant 0 : index
    %c0_72 = arith.constant 0 : index
    %130 = vector.load %arg19[%c0_70, %c0_71, %c0_72] : memref<1x128x4xf32, #tpu.memory_space<vmem>>, vector<1x128x4xf32>
    %131 = vector.shape_cast %130 : vector<1x128x4xf32> to vector<128x4xf32>
    %132 = vector.shape_cast %129 : vector<128x4xf32> to vector<1x128x4xf32>
    tpu.vector_store %arg19[%c0_70, %c0_71, %c0_72], %132 {strides = array<i32>} : memref<1x128x4xf32, #tpu.memory_space<vmem>>, vector<1x128x4xf32>,
    return
  }
  func.func @transform_0(%arg0: i32, %arg1: i32) -> (i32, i32, i32) {
    %c0_i32 = arith.constant 0 : i32
    %c0_i32_0 = arith.constant 0 : i32
    return %arg0, %arg1, %c0_i32 : i32, i32, i32
  }
  func.func @transform_1(%arg0: i32, %arg1: i32) -> (i32, i32) {
    %c0_i32 = arith.constant 0 : i32
    %c0_i32_0 = arith.constant 0 : i32
    %c0_i32_1 = arith.constant 0 : i32
    return %c0_i32, %c0_i32_0 : i32, i32
  }
  func.func @transform_2(%arg0: i32, %arg1: i32) -> (i32, i32) {
    %c0_i32 = arith.constant 0 : i32
    %c0_i32_0 = arith.constant 0 : i32
    %c0_i32_1 = arith.constant 0 : i32
    return %c0_i32, %c0_i32_0 : i32, i32
  }
  func.func @transform_3(%arg0: i32, %arg1: i32) -> (i32, i32) {
    %c0_i32 = arith.constant 0 : i32
    %c0_i32_0 = arith.constant 0 : i32
    %c0_i32_1 = arith.constant 0 : i32
    return %c0_i32, %c0_i32_0 : i32, i32
  }
  func.func @transform_4(%arg0: i32, %arg1: i32) -> (i32, i32) {
    %c0_i32 = arith.constant 0 : i32
    %c0_i32_0 = arith.constant 0 : i32
    %c0_i32_1 = arith.constant 0 : i32
    return %c0_i32, %c0_i32_0 : i32, i32
  }
  func.func @transform_5(%arg0: i32, %arg1: i32) -> (i32, i32) {
    %c0_i32 = arith.constant 0 : i32
    %c0_i32_0 = arith.constant 0 : i32
    %c0_i32_1 = arith.constant 0 : i32
    return %c0_i32, %c0_i32_0 : i32, i32
  }
  func.func @transform_6(%arg0: i32, %arg1: i32) -> (i32, i32) {
    %c0_i32 = arith.constant 0 : i32
    %c0_i32_0 = arith.constant 0 : i32
    %c0_i32_1 = arith.constant 0 : i32
    return %c0_i32, %c0_i32_0 : i32, i32
  }
  func.func @transform_7(%arg0: i32, %arg1: i32) -> (i32, i32) {
    %c0_i32 = arith.constant 0 : i32
    %c0_i32_0 = arith.constant 0 : i32
    %c0_i32_1 = arith.constant 0 : i32
    return %c0_i32, %c0_i32_0 : i32, i32
  }
  func.func @transform_8(%arg0: i32, %arg1: i32) -> (i32, i32) {
    %c0_i32 = arith.constant 0 : i32
    %c0_i32_0 = arith.constant 0 : i32
    %c0_i32_1 = arith.constant 0 : i32
    return %c0_i32, %c0_i32_0 : i32, i32
  }
  func.func @transform_9(%arg0: i32, %arg1: i32) -> (i32, i32) {
    %c0_i32 = arith.constant 0 : i32
    %c0_i32_0 = arith.constant 0 : i32
    %c0_i32_1 = arith.constant 0 : i32
    return %c0_i32, %c0_i32_0 : i32, i32
  }
  func.func @transform_10(%arg0: i32, %arg1: i32) -> (i32, i32) {
    %c0_i32 = arith.constant 0 : i32
    %c0_i32_0 = arith.constant 0 : i32
    %c0_i32_1 = arith.constant 0 : i32
    return %c0_i32, %c0_i32_0 : i32, i32
  }
  func.func @transform_11(%arg0: i32, %arg1: i32) -> (i32, i32) {
    %c0_i32 = arith.constant 0 : i32
    %c0_i32_0 = arith.constant 0 : i32
    %c0_i32_1 = arith.constant 0 : i32
    return %c0_i32, %c0_i32_0 : i32, i32
  }
  func.func @transform_12(%arg0: i32, %arg1: i32) -> (i32, i32) {
    %c0_i32 = arith.constant 0 : i32
    %c0_i32_0 = arith.constant 0 : i32
    %c0_i32_1 = arith.constant 0 : i32
    return %c0_i32, %c0_i32_0 : i32, i32
  }
  func.func @transform_13(%arg0: i32, %arg1: i32) -> (i32, i32) {
    %c0_i32 = arith.constant 0 : i32
    %c0_i32_0 = arith.constant 0 : i32
    %c0_i32_1 = arith.constant 0 : i32
    return %c0_i32, %c0_i32_0 : i32, i32
  }
  func.func @transform_14(%arg0: i32, %arg1: i32) -> (i32, i32) {
    %c0_i32 = arith.constant 0 : i32
    %c0_i32_0 = arith.constant 0 : i32
    %c0_i32_1 = arith.constant 0 : i32
    return %c0_i32, %c0_i32_0 : i32, i32
  }
  func.func @transform_15(%arg0: i32, %arg1: i32) -> (i32, i32) {
    %c0_i32 = arith.constant 0 : i32
    %c0_i32_0 = arith.constant 0 : i32
    %c0_i32_1 = arith.constant 0 : i32
    return %c0_i32, %c0_i32_0 : i32, i32
  }
  func.func @transform_16(%arg0: i32, %arg1: i32) -> (i32, i32) {
    %c0_i32 = arith.constant 0 : i32
    %c0_i32_0 = arith.constant 0 : i32
    %c0_i32_1 = arith.constant 0 : i32
    return %c0_i32, %c0_i32_0 : i32, i32
  }
  func.func @transform_17(%arg0: i32, %arg1: i32) -> (i32, i32, i32) {
    %c0_i32 = arith.constant 0 : i32
    %c0_i32_0 = arith.constant 0 : i32
    return %arg0, %arg1, %c0_i32 : i32, i32, i32
  }
}

</mosaic_0001>

<bundles_post_ra>
// kernel: tpu_custom_call.1
= control target key start
LH: loop header
LB: loop body
LE: loop exit
PB: predicated region body
PF: predicated region fallthrough
CT: control target
= control target key end

     0   :  { %s4670_s24 = smov 0   ;;  %s4672_s25 = smov 0   ;;  %s6242_s0 = inlined_call_operand.vmem [shape: f32[2,256,4], index: 0, kind: input, shape index: {}]   ;;  %s6243_s1 = inlined_call_operand.vmem [shape: f32[1,4], index: 1, kind: input, shape index: {}]   ;;  %s6244_s2 = inlined_call_operand.vmem [shape: f32[1,4], index: 2, kind: input, shape index: {}]   ;;  %s6245_s3 = inlined_call_operand.vmem [shape: bf16[4,8], index: 3, kind: input, shape index: {}]   ;;  %s6246_s4 = inlined_call_operand.vmem [shape: bf16[4,8], index: 4, kind: input, shape index: {}]   ;;  %s6247_s5 = inlined_call_operand.vmem [shape: f32[4,8], index: 5, kind: input, shape index: {}]   ;;  %s6248_s6 = inlined_call_operand.vmem [shape: f32[1,8], index: 6, kind: input, shape index: {}]   ;;  %s6249_s7 = inlined_call_operand.vmem [shape: bf16[8,8], index: 7, kind: input, shape index: {}]   ;;  %s6250_s8 = inlined_call_operand.vmem [shape: bf16[8,16], index: 8, kind: input, shape index: {}]   ;;  %s6251_s9 = inlined_call_operand.vmem [shape: bf16[8,16], index: 9, kind: input, shape index: {}]   ;;  %s6252_s10 = inlined_call_operand.vmem [shape: f32[1,8], index: 10, kind: input, shape index: {}]   ;;  %s6253_s11 = inlined_call_operand.vmem [shape: f32[1,128], index: 11, kind: input, shape index: {}]   ;;  %s6254_s12 = inlined_call_operand.vmem [shape: f32[1,8], index: 12, kind: input, shape index: {}]   ;;  %s6255_s13 = inlined_call_operand.vmem [shape: bf16[8,4], index: 13, kind: input, shape index: {}]   ;;  %s6256_s14 = inlined_call_operand.vmem [shape: f32[8,128], index: 14, kind: input, shape index: {}]   ;;  %s6257_s15 = inlined_call_operand.vmem [shape: f32[16,128], index: 15, kind: input, shape index: {}]   ;;  %s6258_s16 = inlined_call_operand.vmem [shape: f32[128,8], index: 16, kind: input, shape index: {}]   ;;  %s6259_s17 = inlined_call_operand.vmem [shape: f32[2,256,4], index: 17, kind: output, shape index: {}]  }
   0x1   :  { %6279 = sst [smem:[#allocation57_spill]] %s6242_s0  ;;  %s4674_s26 = smov 0  }
   0x2   :  { %6280 = sst [smem:[#allocation58_spill]] %s6243_s1  ;;  %s4676_s27 = smov 0  }
   0x3   :  { %s4678_s28 = smov 0  }
   0x4 LB: > { %6281 = sst [smem:[#allocation9_spill]] %s4562_s26  ;;  %s36_s29 = sadd.s32 1, %s4562_s26  ;;  %s4570_s28 = sphi %s4678_s28, %s27_s28   ;;  %s4566_s27 = sphi %s4676_s27, %s6402_s27   ;;  %s4562_s26 = sphi %s4674_s26, %s6401_s26   ;;  %s4558_s25 = sphi %s4672_s25, %s6400_s25   ;;  %s4554_s24 = sphi %s4670_s24, %s6399_s24  }
   0x5   : > { %6282 = sst [smem:[#allocation10_spill]] %s4566_s27  ;;  %s39_s0 = sadd.s32 1, %s4566_s27 }
   0x6   : > { %p37_p0 = scmp.ge.s32.totalorder %s36_s29, 2  ;;  %p3623_p1 = scmp.ge.s32.totalorder %s4570_s28, 1 }
   0x7   : > { %p508_p2 = scmp.lt.s32.totalorder %s4570_s28, 5 }
   0x8   : > { %s6404_s29 = smov (%p37_p0, %s36_s29), 0  ;;  %s6406_s0 = smov (!%p37_p0, %s39_s0), %s4566_s27 }
   0x9   : > { %6283 = sst [smem:[#allocation11_spill]] %s6404_s29  ;;  %p509_p3 = pnand %p3623_p1, %p508_p2 }
   0xa   : > { %p41_p4 = scmp.ge.s32.totalorder %s6406_s0, 2 }
   0xb   : > { %512 = sbr.rel (%p509_p3) target bundleno = 1767 (0x6e7), region = 88 }
   0xc   : > { %s6408_s0 = smov (%p41_p4, %s6406_s0), 0 }
  0x12   : > { %s3624_s30 = sshll.u32 %s4554_s24, 4  ;;  %p569_p5 = scmp.lt.s32.totalorder %s4558_s25, 1 }
  0x13   : > { %p571_p6 = scmp.lt.s32.totalorder %s3624_s30, 31  ;;  %s6284_s22 = sld [smem:[#allocation57_spill]] }
  0x14   : > { %s6410_s25 = smov (!%p569_p5, %s4558_s25), 1  ;;  %p3630_p7 = scmp.ne.s32.totalorder %s4554_s24, 0 }
  0x15   : > { %s6412_s30 = smov (!%p571_p6, %s3624_s30), 31  ;;  %s3625_s18 = sshll.u32 %s6410_s25, 5  ;;  %vm594_vm0 = vcmask (!%p3630_p7), 64512   ;;  %v4576_v0 = vmov (!%p3630_p7), 0.0  }
  0x16   : > { %s574_s19 = sadd.s32 %s3625_s18, %s6412_s30  ;;  %592 = sbr.rel (%p3630_p7) target bundleno = 29 (0x1d), region = 92  ;;  %593 = vst [vmem:[#allocation7] sm:$0x1] (!%p3630_p7), %v4576_v0  ;;  %595 = vst.msk [vmem:[#allocation8] sm:$0xff] (!%p3630_p7), %vm594_vm0, %v4576_v0 }
  0x17   : > { %s3626_s1 = sshll.u32 %s574_s19, 3 }
  0x18   : > { %s4708_s26 = scalar_lea.vmem %s6259_s17, %s3626_s1 }
  0x19   : > { %s4703_s23 = scalar_lea.vmem %s6284_s22, %s3626_s1 }
  0x1d PF: > { %v596_v1 = vld [vmem:[%s4703_s23] sm:$0xff]  ;;  %vm612_vm1 = vcmask 31744   ;;  %v598_v2 = vld [vmem:[%s4703_s23 + $0x10] sm:$0xff]  ;;  %v597_v3 = vld [vmem:[%s4703_s23 + $0x8] sm:$0xff]  ;;  %vm901_vm2 = vcmask 1041408   ;;  %s6285_s19 = sld [smem:[#allocation58_spill]] }
  0x1e   : > { %v613_v4 = vsel %vm612_vm1, %v596_v1, 0.0  ;;  %v619_v5 = vsel %vm612_vm1, %v598_v2, 0.0  ;;  %v599_v6 = vld [vmem:[%s4703_s23 + $0x18] sm:$0xff]  ;;  %v616_v7 = vsel %vm612_vm1, %v597_v3, 0.0  ;;  %v600_v9 = vld [vmem:[%s4703_s23 + $0x20] sm:$0xff]  ;;  %v601_v10 = vld [vmem:[%s4703_s23 + $0x28] sm:$0xff] }
  0x1f   : > { %614 = vadd.xlane.f32.xlu0 %v613_v4  ;;  %620 = vadd.xlane.f32.xlu1 %v619_v5  ;;  %v622_v8 = vsel %vm612_vm1, %v599_v6, 0.0  ;;  %v625_v11 = vsel %vm612_vm1, %v600_v9, 0.0  ;;  %v628_v12 = vsel %vm612_vm1, %v601_v10, 0.0  ;;  %v4723_v13 = vld [vmem:[%s4703_s23 + $0x30] sm:$0xff]  ;;  %v4726_v14 = vld [vmem:[%s4703_s23 + $0x38] sm:$0xff]  ;;  %v4733_v17 = vld [vmem:[%s4703_s23 + $0x40] sm:$0xff] }
  0x20   : > { %v631_v15 = vsel %vm612_vm1, %v4723_v13, 0.0  ;;  %v634_v16 = vsel %vm612_vm1, %v4726_v14, 0.0  ;;  %v4736_v18 = vld [vmem:[%s4703_s23 + $0x48] sm:$0xff]  ;;  %v637_v19 = vsel %vm612_vm1, %v4733_v17, 0.0  ;;  %v4743_v21 = vld [vmem:[%s4703_s23 + $0x50] sm:$0xff]  ;;  %v4746_v22 = vld [vmem:[%s4703_s23 + $0x58] sm:$0xff] }
  0x21   : > { %v640_v20 = vsel %vm612_vm1, %v4736_v18, 0.0  ;;  %v643_v23 = vsel %vm612_vm1, %v4743_v21, 0.0  ;;  %v646_v24 = vsel %vm612_vm1, %v4746_v22, 0.0  ;;  %v4753_v25 = vld [vmem:[%s4703_s23 + $0x60] sm:$0xff]  ;;  %v4756_v26 = vld [vmem:[%s4703_s23 + $0x68] sm:$0xff]  ;;  %v4763_v29 = vld [vmem:[%s4703_s23 + $0x70] sm:$0xff] }
  0x22   : > { %v649_v27 = vsel %vm612_vm1, %v4753_v25, 0.0  ;;  %v652_v28 = vsel %vm612_vm1, %v4756_v26, 0.0  ;;  %v4766_v30 = vld [vmem:[%s4703_s23 + $0x78] sm:$0xff]  ;;  %v655_v31 = vsel %vm612_vm1, %v4763_v29, 0.0  ;;  %vm1523_vm3 = vcmask 1043456   ;;  %s6048_s18 = smov 0  }
  0x23   : > { %617 = vadd.xlane.f32.xlu0 %v616_v7  ;;  %623 = vadd.xlane.f32.xlu1 %v622_v8  ;;  %v658_v32 = vsel %vm612_vm1, %v4766_v30, 0.0  ;;  %vm1353_vm7 = vcmask 64512  }
  0x27   : > { %626 = vadd.xlane.f32.xlu0 %v625_v11  ;;  %629 = vadd.xlane.f32.xlu1 %v628_v12 }
  0x2b   : > { %632 = vadd.xlane.f32.xlu0 %v631_v15  ;;  %635 = vadd.xlane.f32.xlu1 %v634_v16 }
  0x2f   : > { %638 = vadd.xlane.f32.xlu0 %v637_v19  ;;  %641 = vadd.xlane.f32.xlu1 %v640_v20 }
  0x33   : > { %644 = vadd.xlane.f32.xlu0 %v643_v23  ;;  %647 = vadd.xlane.f32.xlu1 %v646_v24 }
  0x37   : > { %650 = vadd.xlane.f32.xlu0 %v649_v27  ;;  %653 = vadd.xlane.f32.xlu1 %v652_v28 }
  0x3b   : > { %656 = vadd.xlane.f32.xlu0 %v655_v31  ;;  %659 = vadd.xlane.f32.xlu1 %v658_v32 }
  0xac   : > { %v615_v33 = vpop.xlane.xlu0 %614  ;;  %v621_v34 = vpop.xlane.xlu1 %620 }
  0xad   : > { %v662_v35 = vmul.f32 0.25, %v615_v33  ;;  %v664_v36 = vmul.f32 0.25, %v621_v34 }
  0xaf   : > { %v4772_v37 = vsub.f32 %v596_v1, %v662_v35  ;;  %v4774_v38 = vsub.f32 %v598_v2, %v664_v36 }
  0xb0   : > { %v618_v39 = vpop.xlane.xlu0 %617  ;;  %v624_v40 = vpop.xlane.xlu1 %623 }
  0xb1   : > { %v663_v41 = vmul.f32 0.25, %v618_v39  ;;  %v665_v42 = vmul.f32 0.25, %v624_v40  ;;  %v694_v43 = vmul.f32 %v4772_v37, %v4772_v37  ;;  %v696_v44 = vmul.f32 %v4774_v38, %v4774_v38 }
  0xb3   : > { %v4780_v45 = vsub.f32 %v597_v3, %v663_v41  ;;  %v4782_v46 = vsub.f32 %v599_v6, %v665_v42  ;;  %v710_v47 = vsel %vm612_vm1, %v694_v43, 0.0  ;;  %v716_v50 = vsel %vm612_vm1, %v696_v44, 0.0 }
  0xb4   : > { %711 = vadd.xlane.f32.xlu0 %v710_v47  ;;  %v627_v48 = vpop.xlane.xlu0 %626  ;;  %v630_v49 = vpop.xlane.xlu1 %629 }
  0xb5   : > { %v666_v51 = vmul.f32 0.25, %v627_v48  ;;  %v667_v52 = vmul.f32 0.25, %v630_v49  ;;  %v695_v53 = vmul.f32 %v4780_v45, %v4780_v45  ;;  %v697_v54 = vmul.f32 %v4782_v46, %v4782_v46 }
  0xb7   : > { %v4790_v55 = vsub.f32 %v600_v9, %v666_v51  ;;  %v4792_v56 = vsub.f32 %v601_v10, %v667_v52  ;;  %v713_v57 = vsel %vm612_vm1, %v695_v53, 0.0  ;;  %v719_v60 = vsel %vm612_vm1, %v697_v54, 0.0 }
  0xb8   : > { %717 = vadd.xlane.f32.xlu0 %v716_v50  ;;  %714 = vadd.xlane.f32.xlu1 %v713_v57  ;;  %v633_v58 = vpop.xlane.xlu0 %632  ;;  %v636_v59 = vpop.xlane.xlu1 %635  ;;  %v1002_v57 = vld [vmem:[%s6246_s4] sm:$0x3] }
  0xb9   : > { %v668_v61 = vmul.f32 0.25, %v633_v58  ;;  %v669_v62 = vmul.f32 0.25, %v636_v59  ;;  %v698_v63 = vmul.f32 %v4790_v55, %v4790_v55  ;;  %v699_v0 = vmul.f32 %v4792_v56, %v4792_v56 }
  0xba   : > { %v4868_v58 = vsel %vm901_vm2, %v1002_v57, 0 }
  0xbb   : > { %v4801_v1 = vsub.f32 %v4723_v13, %v668_v61  ;;  %v4804_v2 = vsub.f32 %v4726_v14, %v669_v62  ;;  %v722_v3 = vsel %vm612_vm1, %v698_v63, 0.0  ;;  %v725_v6 = vsel %vm612_vm1, %v699_v0, 0.0 }
  0xbc   : > { %720 = vadd.xlane.f32.xlu1 %v719_v60  ;;  %723 = vadd.xlane.f32.xlu0 %v722_v3  ;;  %v639_v4 = vpop.xlane.xlu0 %638  ;;  %v642_v5 = vpop.xlane.xlu1 %641 }
  0xbd   : > { %v670_v7 = vmul.f32 0.25, %v639_v4  ;;  %v671_v8 = vmul.f32 0.25, %v642_v5  ;;  %v700_v9 = vmul.f32 %v4801_v1, %v4801_v1  ;;  %v701_v10 = vmul.f32 %v4804_v2, %v4804_v2 }
  0xbf   : > { %v4813_v11 = vsub.f32 %v4733_v17, %v670_v7  ;;  %v4816_v12 = vsub.f32 %v4736_v18, %v671_v8  ;;  %v728_v13 = vsel %vm612_vm1, %v700_v9, 0.0  ;;  %v731_v16 = vsel %vm612_vm1, %v701_v10, 0.0 }
  0xc0   : > { %726 = vadd.xlane.f32.xlu1 %v725_v6  ;;  %729 = vadd.xlane.f32.xlu0 %v728_v13  ;;  %v645_v14 = vpop.xlane.xlu0 %644  ;;  %v648_v15 = vpop.xlane.xlu1 %647 }
  0xc1   : > { %v672_v19 = vmul.f32 0.25, %v645_v14  ;;  %v673_v20 = vmul.f32 0.25, %v648_v15  ;;  %v702_v23 = vmul.f32 %v4813_v11, %v4813_v11  ;;  %v703_v17 = vmul.f32 %v4816_v12, %v4816_v12 }
  0xc3   : > { %v4825_v24 = vsub.f32 %v4743_v21, %v672_v19  ;;  %v4828_v18 = vsub.f32 %v4746_v22, %v673_v20  ;;  %v734_v27 = vsel %vm612_vm1, %v702_v23, 0.0  ;;  %v737_v32 = vsel %vm612_vm1, %v703_v17, 0.0 }
  0xc4   : > { %732 = vadd.xlane.f32.xlu1 %v731_v16  ;;  %735 = vadd.xlane.f32.xlu0 %v734_v27  ;;  %v651_v28 = vpop.xlane.xlu0 %650  ;;  %v654_v31 = vpop.xlane.xlu1 %653 }
  0xc5   : > { %v674_v33 = vmul.f32 0.25, %v651_v28  ;;  %v675_v34 = vmul.f32 0.25, %v654_v31  ;;  %v704_v35 = vmul.f32 %v4825_v24, %v4825_v24  ;;  %v705_v21 = vmul.f32 %v4828_v18, %v4828_v18 }
  0xc7   : > { %v4837_v36 = vsub.f32 %v4753_v25, %v674_v33  ;;  %v4840_v22 = vsub.f32 %v4756_v26, %v675_v34  ;;  %v740_v39 = vsel %vm612_vm1, %v704_v35, 0.0  ;;  %v743_v42 = vsel %vm612_vm1, %v705_v21, 0.0  ;;  %v4874_v34 = vld [vmem:[%s6285_s19] ss:$0 sm:$0xff] }
  0xc8   : > { %738 = vadd.xlane.f32.xlu1 %v737_v32  ;;  %741 = vadd.xlane.f32.xlu0 %v740_v39  ;;  %v657_v40 = vpop.xlane.xlu0 %656  ;;  %v660_v41 = vpop.xlane.xlu1 %659 }
  0xc9   : > { %v676_v43 = vmul.f32 0.25, %v657_v40  ;;  %v677_v44 = vmul.f32 0.25, %v660_v41  ;;  %v706_v47 = vmul.f32 %v4837_v36, %v4837_v36  ;;  %v707_v25 = vmul.f32 %v4840_v22, %v4840_v22 }
  0xcb   : > { %v4849_v48 = vsub.f32 %v4763_v29, %v676_v43  ;;  %v4852_v26 = vsub.f32 %v4766_v30, %v677_v44  ;;  %v746_v49 = vsel %vm612_vm1, %v706_v47, 0.0  ;;  %v749_v50 = vsel %vm612_vm1, %v707_v25, 0.0  ;;  %v876_v30 = vld [vmem:[%s6245_s3] sm:$0x3] }
  0xcc   : > { %744 = vadd.xlane.f32.xlu1 %v743_v42  ;;  %747 = vadd.xlane.f32.xlu0 %v746_v49  ;;  %v903_v54 = vsel %vm901_vm2, %v876_v30, 0  ;;  %v4882_v49 = vld [vmem:[%s6244_s2] ss:$0 sm:$0xff] }
  0xcd   : > { %v708_v51 = vmul.f32 %v4849_v48, %v4849_v48  ;;  %v709_v52 = vmul.f32 %v4852_v26, %v4852_v26  ;;  %4212 = vmatprep.subr.msk.bf16.mxu0 %vm901_vm2, %v876_v30  ;;  %4213 = vmatprep.subr.msk.bf16.mxu1 %vm901_vm2, %v876_v30 }
  0xce   : > { %3926 = vmatpush3.bf16.msra.mxu0 %v903_v54  ;;  %4209 = vmatpush3.bf16.msra.mxu1 %v903_v54 }
  0xcf   : > { %v752_v53 = vsel %vm612_vm1, %v708_v51, 0.0  ;;  %v755_v29 = vsel %vm612_vm1, %v709_v52, 0.0  ;;  %4214 = vmatprep.subr.msk.bf16.mxu1 %vm901_vm2, %v1002_v57 }
  0xd0   : > { %750 = vadd.xlane.f32.xlu1 %v749_v50  ;;  %753 = vadd.xlane.f32.xlu0 %v752_v53 }
  0xd4   : > { %756 = vadd.xlane.f32.xlu1 %v755_v29 }
 0x141   : > { %v712_v59 = vpop.xlane.xlu0 %711 }
 0x142   : > { %v758_v60 = vmul.f32 0.25, %v712_v59 }
 0x144   : > { %v774_v61 = vadd.f32 1e-05, %v758_v60 }
 0x145   : > { %v715_v62 = vpop.xlane.xlu1 %714  ;;  %v718_v63 = vpop.xlane.xlu0 %717 }
 0x146   : > { %4272 = vrsqrt.f32 %v774_v61  ;;  %v759_v0 = vmul.f32 0.25, %v715_v62  ;;  %v760_v3 = vmul.f32 0.25, %v718_v63 }
 0x148   : > { %v775_v4 = vadd.f32 1e-05, %v759_v0  ;;  %v776_v5 = vadd.f32 1e-05, %v760_v3 }
 0x149   : > { %v721_v6 = vpop.xlane.xlu1 %720  ;;  %v724_v7 = vpop.xlane.xlu0 %723 }
 0x14a   : > { %4274 = vrsqrt.f32 %v775_v4  ;;  %v761_v8 = vmul.f32 0.25, %v721_v6  ;;  %v762_v9 = vmul.f32 0.25, %v724_v7 }
 0x14b   : > { %4276 = vrsqrt.f32 %v776_v5 }
 0x14c   : > { %v777_v10 = vadd.f32 1e-05, %v761_v8  ;;  %v778_v13 = vadd.f32 1e-05, %v762_v9 }
 0x14d   : > { %v727_v14 = vpop.xlane.xlu1 %726  ;;  %v730_v15 = vpop.xlane.xlu0 %729 }
 0x14e   : > { %4278 = vrsqrt.f32 %v777_v10  ;;  %v763_v16 = vmul.f32 0.25, %v727_v14  ;;  %v764_v19 = vmul.f32 0.25, %v730_v15 }
 0x14f   : > { %4280 = vrsqrt.f32 %v778_v13 }
 0x150   : > { %v4273_v20 = vpop.eup %4272  ;;  %v779_v23 = vadd.f32 1e-05, %v763_v16  ;;  %v780_v17 = vadd.f32 1e-05, %v764_v19 }
 0x151   : > { %v733_v27 = vpop.xlane.xlu1 %732  ;;  %v736_v28 = vpop.xlane.xlu0 %735  ;;  %v806_v31 = vmul.f32 %v4273_v20, %v4772_v37 }
 0x152   : > { %4282 = vrsqrt.f32 %v779_v23  ;;  %v765_v32 = vmul.f32 0.25, %v733_v27  ;;  %v766_v33 = vmul.f32 0.25, %v736_v28 }
 0x153   : > { %4284 = vrsqrt.f32 %v780_v17  ;;  %v829_v44 = vmul.f32 %v4874_v34, %v806_v31 }
 0x154   : > { %v4275_v35 = vpop.eup %4274  ;;  %v781_v21 = vadd.f32 1e-05, %v765_v32  ;;  %v782_v39 = vadd.f32 1e-05, %v766_v33 }
 0x155   : > { %v4277_v40 = vpop.eup %4276  ;;  %v739_v41 = vpop.xlane.xlu1 %738  ;;  %v807_v43 = vmul.f32 %v4275_v35, %v4780_v45 }
 0x156   : > { %v742_v42 = vpop.xlane.xlu0 %741  ;;  %v808_v37 = vmul.f32 %v4277_v40, %v4774_v38  ;;  %4286 = vrsqrt.f32 %v781_v21  ;;  %v767_v47 = vmul.f32 0.25, %v739_v41  ;;  %v852_v38 = vadd.f32 %v4882_v49, %v829_v44 }
 0x157   : > { %v768_v25 = vmul.f32 0.25, %v742_v42  ;;  %4288 = vrsqrt.f32 %v782_v39  ;;  %v830_v50 = vmul.f32 %v4874_v34, %v807_v43 }
 0x158   : > { %v4279_v51 = vpop.eup %4278  ;;  %v783_v52 = vadd.f32 1e-05, %v767_v47  ;;  %v831_v59 = vmul.f32 %v4874_v34, %v808_v37 }
 0x159   : > { %v784_v53 = vadd.f32 1e-05, %v768_v25  ;;  %v4281_v29 = vpop.eup %4280  ;;  %v809_v45 = vmul.f32 %v4279_v51, %v4782_v46  ;;  %v745_v30 = vpop.xlane.xlu1 %744  ;;  %v853_v57 = vadd.f32 %v4882_v49, %v830_v50 }
 0x15a   : > { %v748_v54 = vpop.xlane.xlu0 %747  ;;  %v810_v60 = vmul.f32 %v4281_v29, %v4790_v55  ;;  %4290 = vrsqrt.f32 %v783_v52  ;;  %v769_v61 = vmul.f32 0.25, %v745_v30  ;;  %v854_v55 = vadd.f32 %v4882_v49, %v831_v59 }
 0x15b   : > { %v770_v62 = vmul.f32 0.25, %v748_v54  ;;  %4292 = vrsqrt.f32 %v784_v53  ;;  %v4890_v63 = vpack.c.bf16 %v853_v57, %v852_v38  ;;  %v832_v0 = vmul.f32 %v4874_v34, %v809_v45 }
 0x15c   : > { %v4283_v3 = vpop.eup %4282  ;;  %v785_v46 = vadd.f32 1e-05, %v769_v61  ;;  %v833_v10 = vmul.f32 %v4874_v34, %v810_v60 }
 0x15d   : > { %v786_v4 = vadd.f32 1e-05, %v770_v62  ;;  %v4285_v5 = vpop.eup %4284  ;;  %v811_v6 = vmul.f32 %v4283_v3, %v4792_v56  ;;  %v751_v7 = vpop.xlane.xlu1 %750  ;;  %3927 = vmatprep.mubr.msk.bf16.mxu0 %vm612_vm1, %v4890_v63  ;;  %v855_v9 = vadd.f32 %v4882_v49, %v832_v0 }
 0x15e   : > { %v754_v8 = vpop.xlane.xlu0 %753  ;;  %v812_v13 = vmul.f32 %v4285_v5, %v4801_v1  ;;  %4294 = vrsqrt.f32 %v785_v46  ;;  %v771_v14 = vmul.f32 0.25, %v751_v7  ;;  %v856_v1 = vadd.f32 %v4882_v49, %v833_v10 }
 0x15f   : > { %v772_v15 = vmul.f32 0.25, %v754_v8  ;;  %4296 = vrsqrt.f32 %v786_v4  ;;  %v4900_v16 = vpack.c.bf16 %v855_v9, %v854_v55  ;;  %v834_v56 = vmul.f32 %v4874_v34, %v811_v6  ;;  %v1725_v8 = vld [vmem:[%s6249_s7] sm:$0xf] }
 0x160   : > { %v4287_v19 = vpop.eup %4286  ;;  %v787_v20 = vadd.f32 1e-05, %v771_v14  ;;  %v835_v32 = vmul.f32 %v4874_v34, %v812_v13  ;;  %v4968_v55 = vsel %vm1523_vm3, %v1725_v8, 0  ;;  %v1122_v9 = vlaneseq  ;;  %v1104_v14 = vld [vmem:[%s6247_s5] sm:$0xf] }
 0x161   : > { %v788_v23 = vadd.f32 1e-05, %v772_v15  ;;  %v4289_v17 = vpop.eup %4288  ;;  %v813_v27 = vmul.f32 %v4287_v19, %v4804_v2  ;;  %v757_v28 = vpop.xlane.xlu1 %756  ;;  %3928 = vmatmul.mubr.msk.bf16.vlgmr.msra.gmra.mrb[0].mxu0 %vm612_vm1, %v4900_v16  ;;  %v857_v31 = vadd.f32 %v4882_v49, %v834_v56  ;;  %v1103_v15 = vld [vmem:[#allocation8] sm:$0xff] }
 0x162   : > { %4298 = vrsqrt.f32 %v787_v20  ;;  %v773_v33 = vmul.f32 0.25, %v757_v28  ;;  %v814_v35 = vmul.f32 %v4289_v17, %v4813_v11  ;;  %v858_v42 = vadd.f32 %v4882_v49, %v835_v32 }
 0x163   : > { %4300 = vrsqrt.f32 %v788_v23  ;;  %v870_v21 = vpack.c.bf16 %v857_v31, %v856_v1  ;;  %v836_v39 = vmul.f32 %v4874_v34, %v813_v27  ;;  %v4970_v10 = vshrl.u32 %v1122_v9, 7 }
 0x164   : > { %v4291_v40 = vpop.eup %4290  ;;  %v789_v2 = vadd.f32 1e-05, %v773_v33  ;;  %v837_v37 = vmul.f32 %v4874_v34, %v814_v35  ;;  %v1105_v23 = vrot.slane %v1103_v15, 5  ;;  %v1177_v17 = vrot.slane %v1103_v15, 6 }
 0x165   : > { %v4293_v41 = vpop.eup %4292  ;;  %3931 = vmatprep.mubr.msk.bf16.mxu0 %vm612_vm1, %v870_v21  ;;  %v859_v43 = vadd.f32 %v4882_v49, %v836_v39  ;;  %v815_v44 = vmul.f32 %v4291_v40, %v4816_v12  ;;  %v1319_v13 = vsub.s32 3, %v4970_v10  ;;  %v1213_v56 = vsub.s32 1, %v4970_v10 }
 0x166   : > { %v816_v47 = vmul.f32 %v4293_v41, %v4825_v24  ;;  %4302 = vrsqrt.f32 %v789_v2  ;;  %v860_v53 = vadd.f32 %v4882_v49, %v837_v37  ;;  %v1283_v19 = vsub.s32 2, %v4970_v10 }
 0x167   : > { %v871_v11 = vpack.c.bf16 %v859_v43, %v858_v42  ;;  %v838_v25 = vmul.f32 %v4874_v34, %v815_v44  ;;  %v4979_v20 = vrot.slane %v1104_v14, %v1319_v13  ;;  %vm1124_vm4 = vcmp.lt.s32.totalorder %v4970_v10, 3 }
 0x168   : > { %v4295_v50 = vpop.eup %4294  ;;  %v839_v12 = vmul.f32 %v4874_v34, %v816_v47  ;;  %vm1194_vm5 = vcmp.lt.s32.totalorder %v4970_v10, 2  ;;  %v4985_v1 = vrot.slane %v1104_v14, %v1213_v56  ;;  %v1247_v31 = vrot.slane %v1103_v15, 7 }
 0x169   : > { %v4297_v51 = vpop.eup %4296  ;;  %v817_v52 = vmul.f32 %v4295_v50, %v4828_v18  ;;  %3932 = vmatmul.mubr.msk.bf16.gmra.mrb[4].mxu0 %vm612_vm1, %v871_v11  ;;  %v861_v29 = vadd.f32 %v4882_v49, %v838_v25  ;;  %vm1264_vm6 = vcmp.lt.s32.totalorder %v4970_v10, 1 }
 0x16a   : > { %v818_v45 = vmul.f32 %v4297_v51, %v4837_v36  ;;  %v862_v18 = vadd.f32 %v4882_v49, %v839_v12 }
 0x16b   : > { %v872_v30 = vpack.c.bf16 %v861_v29, %v860_v53  ;;  %v840_v24 = vmul.f32 %v4874_v34, %v817_v52 }
 0x16c   : > { %v4299_v54 = vpop.eup %4298  ;;  %v841_v60 = vmul.f32 %v4874_v34, %v818_v45 }
 0x16d   : > { %v4301_v38 = vpop.eup %4300  ;;  %v819_v57 = vmul.f32 %v4299_v54, %v4840_v22  ;;  %3935 = vmatprep.mubr.msk.bf16.mxu1 %vm612_vm1, %v872_v30  ;;  %v863_v59 = vadd.f32 %v4882_v49, %v840_v24 }
 0x16e   : > { %v820_v61 = vmul.f32 %v4301_v38, %v4849_v48  ;;  %v864_v22 = vadd.f32 %v4882_v49, %v841_v60 }
 0x16f   : > { %v873_v62 = vpack.c.bf16 %v863_v59, %v862_v18  ;;  %v842_v36 = vmul.f32 %v4874_v34, %v819_v57 }
 0x170   : > { %v4303_v0 = vpop.eup %4302  ;;  %v843_v4 = vmul.f32 %v4874_v34, %v820_v61 }
 0x171   : > { %v821_v3 = vmul.f32 %v4303_v0, %v4852_v26  ;;  %3936 = vmatmul.mubr.msk.bf16.vlgmr.msra.gmra.mrb[0].mxu1 %vm612_vm1, %v873_v62  ;;  %v865_v46 = vadd.f32 %v4882_v49, %v842_v36 }
 0x172   : > { %3944 = vmatpush3.bf16.msra.mxu1 %v4868_v58  ;;  %v866_v48 = vadd.f32 %v4882_v49, %v843_v4  ;;  %v1498_v58 = vld [vmem:[%s6250_s8] sm:$0xf] }
 0x173   : > { %v874_v5 = vpack.c.bf16 %v865_v46, %v864_v22  ;;  %v844_v6 = vmul.f32 %v4874_v34, %v821_v3  ;;  %v1624_v34 = vld [vmem:[%s6251_s9] sm:$0xf]  ;;  %4215 = vmatprep.subr.msk.bf16.mxu0 %vm1523_vm3, %v1498_v58 }
 0x174   : > { %4216 = vmatprep.subr.msk.bf16.mxu1 %vm1523_vm3, %v1624_v34 }
 0x175   : > { %3939 = vmatprep.mubr.msk.bf16.mxu1 %vm612_vm1, %v874_v5  ;;  %v867_v7 = vadd.f32 %v4882_v49, %v844_v6  ;;  %v1525_v49 = vsel %vm1523_vm3, %v1498_v58, 0 }
 0x176   : > { %3962 = vmatpush3.bf16.msra.mxu0 %v1525_v49 }
 0x177   : > { %v875_v26 = vpack.c.bf16 %v867_v7, %v866_v48  ;;  %4217 = vmatprep.subr.msk.bf16.mxu0 %vm1523_vm3, %v1725_v8  ;;  %v5032_v48 = vld [vmem:[%s6248_s6] ss:$0 sm:$0xff] }
 0x179   : > { %3940 = vmatmul.mubr.msk.bf16.gmra.mrb[4].mxu1 %vm612_vm1, %v875_v26 }
 0x17a   : > { %3945 = vmatprep.mubr.msk.bf16.mxu1 %vm612_vm1, %v4890_v63  ;;  %v1626_v63 = vsel %vm1523_vm3, %v1624_v34, 0 }
 0x181   : > { %3946 = vmatmul.mubr.msk.bf16.vlgmr.msra.gmra.mrb[8].mxu1 %vm612_vm1, %v4900_v16  ;;  %v1143_v16 = vsub.s32 0, %v4970_v10 }
 0x182   : > { %3949 = vmatprep.mubr.msk.bf16.mxu1 %vm612_vm1, %v870_v21  ;;  %3980 = vmatpush3.bf16.msra.mxu1 %v1626_v63  ;;  %v4988_v21 = vrot.slane %v1104_v14, %v1283_v19 }
 0x183   : > { %v4982_v28 = vrot.slane %v1104_v14, %v1143_v16 }
 0x189   : > { %3950 = vmatmul.mubr.msk.bf16.gmra.mrb[12].mxu1 %vm612_vm1, %v871_v11 }
 0x18a   : > { %3953 = vmatprep.mubr.msk.bf16.mxu1 %vm612_vm1, %v872_v30 }
 0x191   : > { %3954 = vmatmul.mubr.msk.bf16.gmra.mrb[16].mxu1 %vm612_vm1, %v873_v62 }
 0x192   : > { %3957 = vmatprep.mubr.msk.bf16.mxu1 %vm612_vm1, %v874_v5 }
 0x199   : > { %3958 = vmatmul.mubr.msk.bf16.gmra.mrb[20].mxu1 %vm612_vm1, %v875_v26 }
 0x234   : > { %v3929_v27 = vpop.f32.mrb[0].mxu0 }
 0x235   : > { %v1108_v32 = vrot.slane %v3929_v27, 5  ;;  %v1180_v33 = vrot.slane %v3929_v27, 6  ;;  %v939_v35 = vpop.f32.mrb[1].mxu0  ;;  %v1250_v39 = vrot.slane %v3929_v27, 7  ;;  %v4993_v43 = vmul.f32 %v3929_v27, %v4979_v20 }
 0x236   : > { %v1106_v40 = vrot.slane %v939_v35, 5  ;;  %v1178_v2 = vrot.slane %v939_v35, 6  ;;  %v1248_v41 = vrot.slane %v939_v35, 7  ;;  %v4990_v42 = vpop.f32.mrb[2].mxu0  ;;  %v1321_v12 = vmul.f32 %v4979_v20, %v939_v35 }
 0x237   : > { %v1109_v44 = vrot.slane %v4990_v42, 5  ;;  %v1181_v37 = vrot.slane %v4990_v42, 6  ;;  %v1251_v47 = vrot.slane %v4990_v42, 7  ;;  %v942_v11 = vpop.f32.mrb[3].mxu0  ;;  %v1324_v62 = vmul.f32 %v4990_v42, %v4979_v20 }
 0x238   : > { %v1140_v25 = vsel %vm1124_vm4, %v1105_v23, %v1106_v40  ;;  %v1210_v50 = vsel %vm1194_vm5, %v1177_v17, %v1178_v2  ;;  %v1280_v51 = vsel %vm1264_vm6, %v1247_v31, %v1248_v41  ;;  %v1107_v52 = vrot.slane %v942_v11, 5 }
 0x239   : > { %v1145_v53 = vmul.f32 %v4982_v28, %v1140_v25  ;;  %v1215_v29 = vmul.f32 %v4985_v1, %v1210_v50  ;;  %v1137_v45 = vsel %vm1124_vm4, %v1108_v32, %v1109_v44  ;;  %v1207_v24 = vsel %vm1194_vm5, %v1180_v33, %v1181_v37 }
 0x23a   : > { %v1148_v30 = vmul.f32 %v4982_v28, %v1137_v45  ;;  %v1277_v54 = vsel %vm1264_vm6, %v1250_v39, %v1251_v47  ;;  %v1138_v38 = vsel %vm1124_vm4, %v1107_v52, %v1108_v32  ;;  %v1285_v18 = vmul.f32 %v4988_v21, %v1280_v51 }
 0x23b   : > { %v1231_v57 = vadd.f32 %v1215_v29, %v1145_v53  ;;  %v1218_v59 = vmul.f32 %v4985_v1, %v1207_v24  ;;  %v1139_v60 = vsel %vm1124_vm4, %v1106_v40, %v1107_v52  ;;  %v1288_v61 = vmul.f32 %v4988_v21, %v1277_v54 }
 0x23c   : > { %v1179_v36 = vrot.slane %v942_v11, 6  ;;  %v1249_v0 = vrot.slane %v942_v11, 7  ;;  %v5023_v3 = vpop.f32.mrb[4].mxu0  ;;  %v1146_v4 = vmul.f32 %v4982_v28, %v1139_v60  ;;  %v1147_v5 = vmul.f32 %v4982_v28, %v1138_v38 }
 0x23d   : > { %v1301_v22 = vadd.f32 %v1285_v18, %v1231_v57  ;;  %v1234_v46 = vadd.f32 %v1218_v59, %v1148_v30  ;;  %v5027_v6 = vpop.f32.mrb[5].mxu0  ;;  %v1322_v56 = vmul.f32 %v4979_v20, %v942_v11  ;;  %v1112_v19 = vrot.slane %v5023_v3, 5 }
 0x23e   : > { %v1208_v7 = vsel %vm1194_vm5, %v1179_v36, %v1180_v33  ;;  %v1209_v26 = vsel %vm1194_vm5, %v1178_v2, %v1179_v36  ;;  %v1278_v58 = vsel %vm1264_vm6, %v1249_v0, %v1250_v39  ;;  %v1279_v34 = vsel %vm1264_vm6, %v1248_v41, %v1249_v0  ;;  %v5042_v49 = vpop.f32.mrb[6].mxu0 }
 0x23f   : > { %v1337_v63 = vadd.f32 %v1321_v12, %v1301_v22  ;;  %v1304_v8 = vadd.f32 %v1288_v61, %v1234_v46  ;;  %v1216_v9 = vmul.f32 %v4985_v1, %v1209_v26  ;;  %v1217_v13 = vmul.f32 %v4985_v1, %v1208_v7  ;;  %v5046_v14 = vpop.f32.mrb[7].mxu0 }
 0x240   : > { %v1286_v15 = vmul.f32 %v4988_v21, %v1279_v34  ;;  %v1287_v16 = vmul.f32 %v4988_v21, %v1278_v58  ;;  %v1184_v32 = vrot.slane %v5023_v3, 6  ;;  %v1110_v33 = vrot.slane %v5027_v6, 5 }
 0x241   : > { %v5053_v23 = vadd.f32 %v5032_v48, %v1337_v63  ;;  %v1340_v17 = vadd.f32 %v1324_v62, %v1304_v8  ;;  %v1232_v27 = vadd.f32 %v1216_v9, %v1146_v4  ;;  %v1233_v31 = vadd.f32 %v1217_v13, %v1147_v5 }
 0x242   : > { %v1182_v35 = vrot.slane %v5027_v6, 6  ;;  %v1252_v39 = vrot.slane %v5027_v6, 7  ;;  %v1254_v11 = vrot.slane %v5023_v3, 7  ;;  %v1136_v25 = vsel %vm1124_vm4, %v1109_v44, %v1110_v33 }
 0x243   : > { %v3650_v40 = vmul.f32 -1.442695, %v5053_v23  ;;  %v5061_v2 = vadd.f32 %v5032_v48, %v1340_v17  ;;  %v1302_v41 = vadd.f32 %v1286_v15, %v1232_v27  ;;  %v1303_v42 = vadd.f32 %v1287_v16, %v1233_v31 }
 0x244   : > { %v1206_v50 = vsel %vm1194_vm5, %v1181_v37, %v1182_v35  ;;  %v1276_v51 = vsel %vm1264_vm6, %v1251_v47, %v1252_v39  ;;  %v5070_v52 = vpop.f32.mrb[0].mxu1  ;;  %v1325_v45 = vmul.f32 %v4979_v20, %v5027_v6  ;;  %v1149_v44 = vmul.f32 %v4982_v28, %v1136_v25 }
 0x245   : > { %v3653_v53 = vmul.f32 -1.442695, %v5061_v2  ;;  %v1338_v29 = vadd.f32 %v1322_v56, %v1302_v41  ;;  %v1339_v12 = vadd.f32 %v4993_v43, %v1303_v42  ;;  %v5076_v30 = vpop.f32.mrb[1].mxu1  ;;  %4304 = vpow2.f32 %v3650_v40 }
 0x246   : > { %v1219_v37 = vmul.f32 %v4985_v1, %v1206_v50  ;;  %v1113_v47 = vrot.slane %v5042_v49, 5  ;;  %v5081_v24 = vpop.f32.mrb[2].mxu1  ;;  %v1185_v38 = vrot.slane %v5042_v49, 6  ;;  %v1289_v59 = vmul.f32 %v4988_v21, %v1276_v51 }
 0x247   : > { %4306 = vpow2.f32 %v3653_v53  ;;  %v5084_v54 = vadd.f32 %v5032_v48, %v1338_v29  ;;  %v5087_v43 = vadd.f32 %v5032_v48, %v1339_v12  ;;  %v5090_v57 = vpop.f32.mrb[3].mxu1  ;;  %v1255_v61 = vrot.slane %v5042_v49, 7 }
 0x248   : > { %v1235_v18 = vadd.f32 %v1219_v37, %v1149_v44  ;;  %v1133_v60 = vsel %vm1124_vm4, %v1112_v19, %v1113_v47  ;;  %v1203_v0 = vsel %vm1194_vm5, %v1184_v32, %v1185_v38  ;;  %v1328_v22 = vmul.f32 %v5042_v49, %v4979_v20 }
 0x249   : > { %v3652_v62 = vmul.f32 -1.442695, %v5087_v43  ;;  %v1152_v36 = vmul.f32 %v4982_v28, %v1133_v60  ;;  %v1222_v4 = vmul.f32 %v4985_v1, %v1203_v0  ;;  %v1273_v5 = vsel %vm1264_vm6, %v1254_v11, %v1255_v61 }
 0x24a   : > { %v1305_v46 = vadd.f32 %v1289_v59, %v1235_v18  ;;  %v1111_v6 = vrot.slane %v5046_v14, 5  ;;  %v3651_v7 = vmul.f32 -1.442695, %v5084_v54  ;;  %v1292_v26 = vmul.f32 %v4988_v21, %v1273_v5 }
 0x24b   : > { %v1183_v58 = vrot.slane %v5046_v14, 6  ;;  %v1253_v34 = vrot.slane %v5046_v14, 7  ;;  %4308 = vpow2.f32 %v3652_v62  ;;  %v1238_v8 = vadd.f32 %v1222_v4, %v1152_v36 }
 0x24c   : > { %v1341_v63 = vadd.f32 %v1325_v45, %v1305_v46  ;;  %v1134_v9 = vsel %vm1124_vm4, %v1111_v6, %v1112_v19  ;;  %v5118_v13 = vpop.f32.mrb[4].mxu1  ;;  %v1135_v15 = vsel %vm1124_vm4, %v1110_v33, %v1111_v6  ;;  %4310 = vpow2.f32 %v3651_v7 }
 0x24d   : > { %v1151_v16 = vmul.f32 %v4982_v28, %v1134_v9  ;;  %v1204_v56 = vsel %vm1194_vm5, %v1183_v58, %v1184_v32  ;;  %v1205_v17 = vsel %vm1194_vm5, %v1182_v35, %v1183_v58  ;;  %v5127_v27 = vpop.f32.mrb[5].mxu1  ;;  %v1308_v40 = vadd.f32 %v1292_v26, %v1238_v8 }
 0x24e   : > { %v5130_v31 = vadd.f32 %v5032_v48, %v1341_v63  ;;  %v1150_v19 = vmul.f32 %v4982_v28, %v1135_v15  ;;  %v1220_v41 = vmul.f32 %v4985_v1, %v1205_v17  ;;  %v5134_v42 = vpop.f32.mrb[6].mxu1  ;;  %v1221_v33 = vmul.f32 %v4985_v1, %v1204_v56 }
 0x24f   : > { %v1274_v32 = vsel %vm1264_vm6, %v1253_v34, %v1254_v11  ;;  %v1275_v35 = vsel %vm1264_vm6, %v1252_v39, %v1253_v34  ;;  %1354 = vst.msk [vmem:[#allocation8] sm:$0xff] %vm1353_vm7, %v5134_v42  ;;  %v5143_v25 = vpop.f32.mrb[7].mxu1  ;;  %v4305_v50 = vpop.eup %4304  ;;  %v1344_v53 = vadd.f32 %v1328_v22, %v1308_v40  ;;  %v1326_v39 = vmul.f32 %v4979_v20, %v5046_v14 }
 0x250   : > { %v3654_v51 = vmul.f32 -1.442695, %v5130_v31  ;;  %v1236_v29 = vadd.f32 %v1220_v41, %v1150_v19  ;;  %v1237_v45 = vadd.f32 %v1221_v33, %v1151_v16  ;;  %v1290_v44 = vmul.f32 %v4988_v21, %v1275_v35 }
 0x251   : > { %v4307_v12 = vpop.eup %4306  ;;  %v1291_v11 = vmul.f32 %v4988_v21, %v1274_v32  ;;  %v5152_v59 = vadd.f32 1.0, %v4305_v50  ;;  %v1114_v62 = vrot.slane %v5076_v30, 5  ;;  %v5158_v0 = vadd.f32 %v5032_v48, %v1344_v53 }
 0x252   : > { %v1306_v37 = vadd.f32 %v1290_v44, %v1236_v29  ;;  %v1429_v60 = vadd.f32 1.0, %v4307_v12  ;;  %4312 = vpow2.f32 %v3654_v51  ;;  %v1186_v46 = vrot.slane %v5076_v30, 6 }
 0x253   : > { %v5148_v18 = vadd.f32 %v1291_v11, %v1237_v45  ;;  %v1256_v4 = vrot.slane %v5076_v30, 7  ;;  %v1116_v14 = vrot.slane %v5070_v52, 5  ;;  %v1188_v7 = vrot.slane %v5070_v52, 6 }
 0x254   : > { %v5155_v36 = vpop.f32.mrb[8].mxu1  ;;  %v1342_v22 = vadd.f32 %v1326_v39, %v1306_v37  ;;  %v1132_v26 = vsel %vm1124_vm4, %v1113_v47, %v1114_v62  ;;  %v1117_v58 = vrot.slane %v5081_v24, 5  ;;  %v1202_v15 = vsel %vm1194_vm5, %v1185_v38, %v1186_v46 }
 0x255   : > { %6286 = vst [vmem:[#allocation12_spill] sm:$0xff] %v5155_v36  ;;  %v5162_v5 = vpop.f32.mrb[9].mxu1  ;;  %v4309_v6 = vpop.eup %4308  ;;  %v1153_v9 = vmul.f32 %v4982_v28, %v1132_v26  ;;  %4314 = vrcp.f32 %v1429_v60  ;;  %v1223_v47 = vmul.f32 %v4985_v1, %v1202_v15  ;;  %v1272_v56 = vsel %vm1264_vm6, %v1255_v61, %v1256_v4 }
 0x256   : > { %6287 = vst [vmem:[#allocation13_spill] sm:$0xff] %v5162_v5  ;;  %v5171_v34 = vpop.f32.mrb[10].mxu1  ;;  %v1428_v63 = vadd.f32 1.0, %v4309_v6  ;;  %v5174_v8 = vadd.f32 %v5032_v48, %v1342_v22  ;;  %v1129_v17 = vsel %vm1124_vm4, %v1116_v14, %v1117_v58  ;;  %v3657_v40 = vmul.f32 -1.442695, %v5158_v0  ;;  %v4311_v61 = vpop.eup %4310 }
 0x257   : > { %6288 = vst [vmem:[#allocation14_spill] sm:$0xff] %v5171_v34  ;;  %v5181_v16 = vpop.f32.mrb[11].mxu1  ;;  %v1258_v19 = vrot.slane %v5070_v52, 7  ;;  %v1239_v41 = vadd.f32 %v1223_v47, %v1153_v9  ;;  %v1293_v33 = vmul.f32 %v4988_v21, %v1272_v56  ;;  %v1189_v49 = vrot.slane %v5081_v24, 6 }
 0x258   : > { %6289 = vst [vmem:[#allocation15_spill] sm:$0xff] %v5181_v16  ;;  %4316 = vrcp.f32 %v1428_v63  ;;  %v3655_v38 = vmul.f32 -1.442695, %v5174_v8  ;;  %v1259_v32 = vrot.slane %v5081_v24, 7  ;;  %v1156_v35 = vmul.f32 %v4982_v28, %v1129_v17 }
 0x259   : > { %v1115_v50 = vrot.slane %v5090_v57, 5  ;;  %v1187_v51 = vrot.slane %v5090_v57, 6  ;;  %v1309_v53 = vadd.f32 %v1293_v33, %v1239_v41  ;;  %v1329_v29 = vmul.f32 %v4979_v20, %v5076_v30 }
 0x25a   : > { %4318 = vpow2.f32 %v3655_v38  ;;  %v1199_v12 = vsel %vm1194_vm5, %v1188_v7, %v1189_v49  ;;  %v1269_v45 = vsel %vm1264_vm6, %v1258_v19, %v1259_v32  ;;  %v1257_v39 = vrot.slane %v5090_v57, 7 }
 0x25b   : > { %v1226_v11 = vmul.f32 %v4985_v1, %v1199_v12  ;;  %v1130_v37 = vsel %vm1124_vm4, %v1115_v50, %v1116_v14  ;;  %v1131_v30 = vsel %vm1124_vm4, %v1114_v62, %v1115_v50  ;;  %v1427_v6 = vadd.f32 1.0, %v4311_v61 }
 0x25c   : > { %v5211_v44 = vpop.f32.mrb[12].mxu1  ;;  %v4313_v22 = vpop.eup %4312  ;;  %v1345_v26 = vadd.f32 %v1329_v29, %v1309_v53  ;;  %v1154_v63 = vmul.f32 %v4982_v28, %v1131_v30  ;;  %v1155_v9 = vmul.f32 %v4982_v28, %v1130_v37  ;;  %v1296_v56 = vmul.f32 %v4988_v21, %v1269_v45 }
 0x25d   : > { %6290 = vst [vmem:[#allocation16_spill] sm:$0xff] %v5211_v44  ;;  %v5219_v60 = vpop.f32.mrb[13].mxu1  ;;  %v1242_v47 = vadd.f32 %v1226_v11, %v1156_v35  ;;  %v1200_v14 = vsel %vm1194_vm5, %v1187_v51, %v1188_v7  ;;  %v1201_v62 = vsel %vm1194_vm5, %v1186_v46, %v1187_v51  ;;  %v1332_v41 = vmul.f32 %v5081_v24, %v4979_v20 }
 0x25e   : > { %6291 = vst [vmem:[#allocation17_spill] sm:$0xff] %v5219_v60  ;;  %v5223_v15 = vpop.f32.mrb[14].mxu1  ;;  %v5233_v38 = vadd.f32 %v5032_v48, %v1345_v26  ;;  %v1224_v33 = vmul.f32 %v4985_v1, %v1201_v62  ;;  %v1225_v61 = vmul.f32 %v4985_v1, %v1200_v14  ;;  %v1430_v35 = vadd.f32 1.0, %v4313_v22 }
 0x25f   : > { %6292 = vst [vmem:[#allocation18_spill] sm:$0xff] %v5223_v15  ;;  %v5230_v17 = vpop.f32.mrb[15].mxu1  ;;  %v1312_v50 = vadd.f32 %v1296_v56, %v1242_v47  ;;  %v1270_v7 = vsel %vm1264_vm6, %v1257_v39, %v1258_v19  ;;  %v1271_v46 = vsel %vm1264_vm6, %v1256_v4, %v1257_v39  ;;  %v4315_v51 = vpop.eup %4314  ;;  %4320 = vrcp.f32 %v5152_v59 }
 0x260   : > { %6293 = vst [vmem:[#allocation19_spill] sm:$0xff] %v5230_v17  ;;  %v1240_v53 = vadd.f32 %v1224_v33, %v1154_v63  ;;  %v1241_v29 = vadd.f32 %v1225_v61, %v1155_v9  ;;  %v1294_v12 = vmul.f32 %v4988_v21, %v1271_v46  ;;  %v5247_v11 = vmul.f32 %v5023_v3, %v4979_v20 }
 0x261   : > { %4322 = vpow2.f32 %v3657_v40  ;;  %v5249_v37 = vadd.f32 %v1332_v41, %v1312_v50  ;;  %v1295_v19 = vmul.f32 %v4988_v21, %v1270_v7  ;;  %v3658_v4 = vmul.f32 -1.442695, %v5233_v38 }
 0x262   : > { %v4317_v45 = vpop.eup %4316  ;;  %4324 = vrcp.f32 %v1427_v6  ;;  %v1310_v30 = vadd.f32 %v1294_v12, %v1240_v53  ;;  %v1330_v59 = vmul.f32 %v4979_v20, %v5090_v57  ;;  %v5258_v26 = vmul.f32 %v4315_v51, %v5061_v2 }
 0x263   : > { %4326 = vrcp.f32 %v1430_v35  ;;  %v5262_v3 = vmul.f32 %v5070_v52, %v4979_v20  ;;  %v5264_v40 = vadd.f32 %v1295_v19, %v1241_v29  ;;  %v1118_v47 = vrot.slane %v5127_v27, 5 }
 0x264   : > { %v5255_v39 = vpop.f32.mrb[16].mxu1  ;;  %v4319_v22 = vpop.eup %4318  ;;  %v1346_v9 = vadd.f32 %v1330_v59, %v1310_v30  ;;  %v1190_v57 = vrot.slane %v5127_v27, 6  ;;  %v5273_v2 = vmul.f32 %v4317_v45, %v5087_v43  ;;  %v1120_v14 = vrot.slane %v5118_v13, 5 }
 0x265   : > { %6294 = vst [vmem:[#allocation20_spill] sm:$0xff] %v5255_v39  ;;  %v5266_v6 = vpop.f32.mrb[17].mxu1  ;;  %v1431_v63 = vadd.f32 1.0, %v4319_v22  ;;  %v1260_v52 = vrot.slane %v5127_v27, 7  ;;  %v1121_v62 = vrot.slane %v5134_v42, 5  ;;  %4328 = vpow2.f32 %v3658_v4 }
 0x266   : > { %6295 = vst [vmem:[#allocation21_spill] sm:$0xff] %v5266_v6  ;;  %v5270_v56 = vpop.f32.mrb[18].mxu1  ;;  %v1192_v33 = vrot.slane %v5118_v13, 6  ;;  %v1128_v61 = vsel %vm1124_vm4, %v1117_v58, %v1118_v47  ;;  %v1198_v43 = vsel %vm1194_vm5, %v1189_v49, %v1190_v57  ;;  %v5296_v46 = vadd.f32 %v5032_v48, %v1346_v9 }
 0x267   : > { %6296 = vst [vmem:[#allocation22_spill] sm:$0xff] %v5270_v56  ;;  %v5278_v41 = vpop.f32.mrb[19].mxu1  ;;  %4330 = vrcp.f32 %v1431_v63  ;;  %v1157_v35 = vmul.f32 %v4982_v28, %v1128_v61  ;;  %v1227_v50 = vmul.f32 %v4985_v1, %v1198_v43  ;;  %v1268_v7 = vsel %vm1264_vm6, %v1259_v32, %v1260_v52 }
 0x268   : > { %6297 = vst [vmem:[#allocation23_spill] sm:$0xff] %v5278_v41  ;;  %v1262_v58 = vrot.slane %v5118_v13, 7  ;;  %v1125_v51 = vsel %vm1124_vm4, %v1120_v14, %v1121_v62  ;;  %v1193_v49 = vrot.slane %v5134_v42, 6  ;;  %v1297_v29 = vmul.f32 %v4988_v21, %v1268_v7 }
 0x269   : > { %v1243_v53 = vadd.f32 %v1227_v50, %v1157_v35  ;;  %v1160_v12 = vmul.f32 %v4982_v28, %v1125_v51  ;;  %v1263_v24 = vrot.slane %v5134_v42, 7  ;;  %v4321_v45 = vpop.eup %4320  ;;  %v1333_v32 = vmul.f32 %v4979_v20, %v5127_v27 }
 0x26a   : > { %v1195_v19 = vsel %vm1194_vm5, %v1192_v33, %v1193_v49  ;;  %v1119_v4 = vrot.slane %v5143_v25, 5  ;;  %v1191_v30 = vrot.slane %v5143_v25, 6  ;;  %v1261_v61 = vrot.slane %v5143_v25, 7 }
 0x26b   : > { %v5313_v22 = vpop.eup %4322  ;;  %v1313_v63 = vadd.f32 %v1297_v29, %v1243_v53  ;;  %v1230_v9 = vmul.f32 %v4985_v1, %v1195_v19  ;;  %v1265_v62 = vsel %vm1264_vm6, %v1262_v58, %v1263_v24  ;;  %v3659_v35 = vmul.f32 -1.442695, %v5296_v46 }
 0x26c   : > { %v5311_v59 = vpop.f32.mrb[20].mxu1  ;;  %v4325_v43 = vpop.eup %4324  ;;  %v1126_v50 = vsel %vm1124_vm4, %v1119_v4, %v1120_v14  ;;  %v1127_v7 = vsel %vm1124_vm4, %v1118_v47, %v1119_v4  ;;  %v1196_v51 = vsel %vm1194_vm5, %v1191_v30, %v1192_v33  ;;  %v1300_v19 = vmul.f32 %v4988_v21, %v1265_v62 }
 0x26d   : > { %6298 = vst [vmem:[#allocation24_spill] sm:$0xff] %v5311_v59  ;;  %v5319_v27 = vpop.f32.mrb[21].mxu1  ;;  %v4327_v53 = vpop.eup %4326  ;;  %v1349_v29 = vadd.f32 %v1333_v32, %v1313_v63  ;;  %v1246_v24 = vadd.f32 %v1230_v9, %v1160_v12  ;;  %v1158_v59 = vmul.f32 %v4982_v28, %v1127_v7  ;;  %v1159_v44 = vmul.f32 %v4982_v28, %v1126_v50 }
 0x26e   : > { %6299 = vst [vmem:[#allocation25_spill] sm:$0xff] %v5319_v27  ;;  %v5328_v49 = vpop.f32.mrb[22].mxu1  ;;  %v1197_v14 = vsel %vm1194_vm5, %v1190_v57, %v1191_v30  ;;  %v1229_v47 = vmul.f32 %v4985_v1, %v1196_v51  ;;  %v1266_v33 = vsel %vm1264_vm6, %v1261_v61, %v1262_v58  ;;  %v5342_v32 = vadd.f32 %v5032_v48, %v5249_v37 }
 0x26f   : > { %6300 = vst [vmem:[#allocation26_spill] sm:$0xff] %v5328_v49  ;;  %v5332_v15 = vpop.f32.mrb[23].mxu1  ;;  %v1316_v12 = vadd.f32 %v1300_v19, %v1246_v24  ;;  %v1336_v4 = vmul.f32 %v5134_v42, %v4979_v20  ;;  %v1228_v63 = vmul.f32 %v4985_v1, %v1197_v14  ;;  %v4329_v9 = vpop.eup %4328  ;;  %4332 = vpow2.f32 %v3659_v35 }
 0x270   : > { %6301 = vst [vmem:[#allocation27_spill] sm:$0xff] %v5332_v15  ;;  %v1245_v28 = vadd.f32 %v1229_v47, %v1159_v44  ;;  %v1267_v57 = vsel %vm1264_vm6, %v1260_v52, %v1261_v61  ;;  %v1299_v30 = vmul.f32 %v4988_v21, %v1266_v33  ;;  %v5351_v58 = vadd.f32 %v5032_v48, %v1349_v29 }
 0x271   : > { %v4331_v62 = vpop.eup %4330  ;;  %v1352_v37 = vadd.f32 %v1336_v4, %v1316_v12  ;;  %v1244_v50 = vadd.f32 %v1228_v63, %v1158_v59  ;;  %v1298_v7 = vmul.f32 %v4988_v21, %v1267_v57  ;;  %v1335_v42 = vmul.f32 %v5118_v13, %v4979_v20 }
 0x272   : > { %v1315_v1 = vadd.f32 %v1299_v30, %v1245_v28  ;;  %v5357_v35 = vmul.f32 %v4321_v45, %v5053_v23  ;;  %v5360_v10 = vmul.f32 %v4325_v43, %v5084_v54  ;;  %v3661_v44 = vmul.f32 -1.442695, %v5342_v32 }
 0x273   : > { %v1314_v52 = vadd.f32 %v1298_v7, %v1244_v50  ;;  %v1334_v61 = vmul.f32 %v4979_v20, %v5143_v25  ;;  %v5367_v59 = vpack.c.bf16 %v5258_v26, %v5273_v2  ;;  %v5374_v23 = vmul.f32 %v4327_v53, %v5130_v31 }
 0x274   : > { %6302 = vst [vmem:[#allocation28_spill] sm:$0xff] %v5360_v10  ;;  %v5371_v21 = vpack.c.bf16 %v5360_v10, %v5357_v35  ;;  %v5377_v54 = vmul.f32 %v4331_v62, %v5174_v8  ;;  %v1343_v13 = vadd.f32 %v5247_v11, %v5148_v18  ;;  %v3662_v45 = vmul.f32 -1.442695, %v5351_v58 }
 0x275   : > { %v1350_v20 = vadd.f32 %v1334_v61, %v1314_v52  ;;  %v1347_v25 = vadd.f32 %v5262_v3, %v5264_v40  ;;  %v1351_v43 = vadd.f32 %v1335_v42, %v1315_v1  ;;  %4334 = vpow2.f32 %v3661_v44 }
 0x276   : > { %3963 = vmatprep.mubr.msk.bf16.mxu0 %vm1353_vm7, %v5371_v21  ;;  %3981 = vmatprep.mubr.msk.bf16.mxu1 %vm1353_vm7, %v5371_v21  ;;  %v5390_v31 = vpack.c.bf16 %v5377_v54, %v5374_v23  ;;  %v1368_v8 = vadd.f32 %v5032_v48, %v1343_v13  ;;  %v5408_v51 = vadd.f32 %v5032_v48, %v1352_v37  ;;  %4336 = vpow2.f32 %v3662_v45 }
 0x277   : > { %v5394_v18 = vadd.f32 %v5032_v48, %v1350_v20  ;;  %3964 = vmatmul.mubr.msk.bf16.vlgmr.msra.gmra.mrb[8].mxu0 %vm1353_vm7, %v5367_v59  ;;  %3982 = vmatmul.mubr.msk.bf16.vlgmr.msra.gmra.mrb[24].mxu1 %vm1353_vm7, %v5367_v59  ;;  %v1372_v11 = vadd.f32 %v5032_v48, %v1347_v25  ;;  %v5405_v40 = vadd.f32 %v5032_v48, %v1351_v43  ;;  %v1433_v47 = vadd.f32 1.0, %v5313_v22 }
 0x278   : > { %3998 = vmatpush3.bf16.msra.mxu0 %v4968_v55  ;;  %3967 = vmatprep.mubr.msk.bf16.mxu0 %vm1353_vm7, %v5390_v31  ;;  %v3656_v3 = vmul.f32 -1.442695, %v1368_v8  ;;  %v3665_v19 = vmul.f32 -1.442695, %v5408_v51  ;;  %v1434_v48 = vadd.f32 1.0, %v4329_v9 }
 0x279   : > { %v3663_v53 = vmul.f32 -1.442695, %v5394_v18  ;;  %3985 = vmatprep.mubr.msk.bf16.mxu1 %vm1353_vm7, %v5390_v31  ;;  %v3660_v29 = vmul.f32 -1.442695, %v1372_v11  ;;  %v4333_v24 = vpop.eup %4332  ;;  %v3664_v55 = vmul.f32 -1.442695, %v5405_v40 }
 0x27a   : > { %4338 = vpow2.f32 %v3656_v3  ;;  %v1435_v14 = vadd.f32 1.0, %v4333_v24 }
 0x27b   : > { %4340 = vpow2.f32 %v3663_v53 }
 0x27c   : > { %4342 = vpow2.f32 %v3660_v29 }
 0x27d   : > { %4344 = vpow2.f32 %v3664_v55 }
 0x27e   : > { %4346 = vpow2.f32 %v3665_v19 }
 0x27f   : > { %v4335_v33 = vpop.eup %4334  ;;  %4348 = vrcp.f32 %v1435_v14 }
 0x280   : > { %v4337_v12 = vpop.eup %4336  ;;  %4350 = vrcp.f32 %v1433_v47  ;;  %v1437_v63 = vadd.f32 1.0, %v4335_v33 }
 0x281   : > { %4352 = vrcp.f32 %v1434_v48  ;;  %v1438_v50 = vadd.f32 1.0, %v4337_v12 }
 0x284   : > { %v4339_v4 = vpop.eup %4338 }
 0x285   : > { %v4341_v28 = vpop.eup %4340  ;;  %v1432_v57 = vadd.f32 1.0, %v4339_v4 }
 0x286   : > { %v4343_v30 = vpop.eup %4342  ;;  %v1439_v62 = vadd.f32 1.0, %v4341_v28 }
 0x287   : > { %4354 = vrcp.f32 %v1432_v57  ;;  %v1436_v37 = vadd.f32 1.0, %v4343_v30  ;;  %v4345_v7 = vpop.eup %4344 }
 0x288   : > { %4356 = vrcp.f32 %v1437_v63  ;;  %v4347_v22 = vpop.eup %4346  ;;  %v1440_v42 = vadd.f32 1.0, %v4345_v7 }
 0x289   : > { %4358 = vrcp.f32 %v1436_v37  ;;  %v4349_v9 = vpop.eup %4348  ;;  %v1441_v44 = vadd.f32 1.0, %v4347_v22 }
 0x28a   : > { %4360 = vrcp.f32 %v1439_v62  ;;  %v4351_v1 = vpop.eup %4350  ;;  %v5417_v61 = vmul.f32 %v4349_v9, %v5296_v46 }
 0x28b   : > { %4362 = vrcp.f32 %v1438_v50  ;;  %v4353_v52 = vpop.eup %4352  ;;  %v5420_v13 = vmul.f32 %v4351_v1, %v5158_v0 }
 0x28c   : > { %4364 = vrcp.f32 %v1440_v42  ;;  %v5423_v20 = vmul.f32 %v4353_v52, %v5233_v38 }
 0x28d   : > { %4366 = vrcp.f32 %v1441_v44 }
 0x28e   : > { %v1494_v53 = vpack.c.bf16 %v5417_v61, %v5423_v20 }
 0x291   : > { %v4355_v45 = vpop.eup %4354 }
 0x292   : > { %v4357_v25 = vpop.eup %4356  ;;  %v5425_v43 = vmul.f32 %v4355_v45, %v1368_v8 }
 0x293   : > { %v4359_v3 = vpop.eup %4358  ;;  %v5436_v38 = vmul.f32 %v4357_v25, %v5342_v32 }
 0x294   : > { %v4361_v29 = vpop.eup %4360  ;;  %v1493_v46 = vpack.c.bf16 %v5420_v13, %v5425_v43  ;;  %v5433_v0 = vmul.f32 %v4359_v3, %v1372_v11 }
 0x295   : > { %v4363_v24 = vpop.eup %4362  ;;  %v5441_v8 = vmul.f32 %v4361_v29, %v5394_v18 }
 0x296   : > { %3968 = vmatmul.mubr.msk.bf16.gmra.mrb[12].mxu0 %vm1353_vm7, %v1493_v46  ;;  %3986 = vmatmul.mubr.msk.bf16.gmra.mrb[28].mxu1 %vm1353_vm7, %v1493_v46  ;;  %v5444_v55 = vmul.f32 %v4363_v24, %v5351_v58  ;;  %v4365_v19 = vpop.eup %4364  ;;  %v1495_v14 = vpack.c.bf16 %v5436_v38, %v5433_v0 }
 0x297   : > { %3971 = vmatprep.mubr.msk.bf16.mxu0 %vm1353_vm7, %v1494_v53  ;;  %3989 = vmatprep.mubr.msk.bf16.mxu1 %vm1353_vm7, %v1494_v53  ;;  %v4367_v47 = vpop.eup %4366  ;;  %v5453_v32 = vmul.f32 %v4365_v19, %v5405_v40 }
 0x298   : > { %v1496_v11 = vpack.c.bf16 %v5441_v8, %v5444_v55  ;;  %v5456_v18 = vmul.f32 %v4367_v47, %v5408_v51 }
 0x29a   : > { %v1497_v58 = vpack.c.bf16 %v5456_v18, %v5453_v32 }
 0x29e   : > { %3972 = vmatmul.mubr.msk.bf16.gmra.mrb[16].mxu0 %vm1353_vm7, %v1495_v14  ;;  %3990 = vmatmul.mubr.msk.bf16.gmra.mrb[32].mxu1 %vm1353_vm7, %v1495_v14 }
 0x29f   : > { %3975 = vmatprep.mubr.msk.bf16.mxu0 %vm1353_vm7, %v1496_v11  ;;  %3993 = vmatprep.mubr.msk.bf16.mxu1 %vm1353_vm7, %v1496_v11 }
 0x2a6   : > { %3976 = vmatmul.mubr.msk.bf16.gmra.mrb[20].mxu0 %vm1353_vm7, %v1497_v58  ;;  %3994 = vmatmul.mubr.msk.bf16.gmra.mrb[36].mxu1 %vm1353_vm7, %v1497_v58 }
 0x2a7   : > { %3999 = vmatprep.mubr.msk.bf16.mxu0 %vm1353_vm7, %v5371_v21  ;;  %v2121_v21 = vld [vmem:[%s6256_s14] sm:$0xff] }
 0x2a8   : > { %4015 = vmatprep.subr.mxu1 %v2121_v21  ;;  %4041 = vmatprep.subr.mxu0 %v2121_v21 }
 0x2a9   : > { %4016 = vmatpush3.msra.mxu1 %v2121_v21 }
 0x2ae   : > { %4000 = vmatmul.mubr.msk.bf16.vlgmr.msra.gmra.mrb[24].mxu0 %vm1353_vm7, %v5367_v59  ;;  %v2524_v59 = vld [vmem:[%s6257_s15] sm:$0xff] }
 0x2af   : > { %4003 = vmatprep.mubr.msk.bf16.mxu0 %vm1353_vm7, %v5390_v31  ;;  %4042 = vmatpush3.msra.mxu0 %v2121_v21  ;;  %v2525_v31 = vld [vmem:[%s6257_s15 + $0x8] sm:$0xff] }
 0x2b0   : > { %v5484_v40 = vpack.c.bf16 %v2525_v31, %v2524_v59  ;;  %v5555_v59 = vld [vmem:[%s6252_s10] ss:$0 sm:$0xff] }
 0x2b2   : > { %4177 = vmatprep.subr.bf16.mxu1 %v5484_v40  ;;  %4181 = vmatprep.subr.bf16.mxu0 %v5484_v40 }
 0x2b6   : > { %4004 = vmatmul.mubr.msk.bf16.gmra.mrb[28].mxu0 %vm1353_vm7, %v1493_v46 }
 0x2b7   : > { %4007 = vmatprep.mubr.msk.bf16.mxu0 %vm1353_vm7, %v1494_v53 }
 0x2be   : > { %4008 = vmatmul.mubr.msk.bf16.gmra.mrb[32].mxu0 %vm1353_vm7, %v1495_v14 }
 0x2bf   : > { %4011 = vmatprep.mubr.msk.bf16.mxu0 %vm1353_vm7, %v1496_v11 }
 0x2c6   : > { %4012 = vmatmul.mubr.msk.bf16.gmra.mrb[36].mxu0 %vm1353_vm7, %v1497_v58 }
 0x34a   : > { %v5488_v51 = vpop.f32.mrb[8].mxu0  ;;  %v5490_v48 = vpop.f32.mrb[24].mxu1 }
 0x34b   : > { %6303 = vst [vmem:[#allocation29_spill] sm:$0xff] %v5490_v48  ;;  %v5492_v33 = vpop.f32.mrb[9].mxu0  ;;  %v5494_v12 = vpop.f32.mrb[25].mxu1 }
 0x34c   : > { %v5496_v4 = vpop.f32.mrb[10].mxu0  ;;  %v5498_v63 = vpop.f32.mrb[26].mxu1 }
 0x34d   : > { %6304 = vst [vmem:[#allocation30_spill] sm:$0xff] %v5496_v4  ;;  %6305 = vst [vmem:[#allocation31_spill] sm:$0xff] %v5498_v63  ;;  %v5500_v28 = vpop.f32.mrb[11].mxu0  ;;  %v5502_v57 = vpop.f32.mrb[27].mxu1 }
 0x34e   : > { %6306 = vst [vmem:[#allocation32_spill] sm:$0xff] %v5502_v57 }
 0x369   : > { %v5504_v30 = vpop.f32.mrb[12].mxu0  ;;  %v5506_v62 = vpop.f32.mrb[28].mxu1 }
 0x36a   : > { %6307 = vst [vmem:[#allocation33_spill] sm:$0xff] %v5504_v30  ;;  %6308 = vst [vmem:[#allocation34_spill] sm:$0xff] %v5506_v62  ;;  %v5508_v37 = vpop.f32.mrb[13].mxu0  ;;  %v5510_v50 = vpop.f32.mrb[29].mxu1 }
 0x36b   : > { %6309 = vst [vmem:[#allocation35_spill] sm:$0xff] %v5508_v37  ;;  %6310 = vst [vmem:[#allocation36_spill] sm:$0xff] %v5510_v50  ;;  %v5512_v7 = vpop.f32.mrb[14].mxu0  ;;  %v5514_v22 = vpop.f32.mrb[30].mxu1 }
 0x36c   : > { %6311 = vst [vmem:[#allocation37_spill] sm:$0xff] %v5512_v7  ;;  %6312 = vst [vmem:[#allocation38_spill] sm:$0xff] %v5514_v22  ;;  %v5516_v9 = vpop.f32.mrb[15].mxu0  ;;  %v5518_v42 = vpop.f32.mrb[31].mxu1 }
 0x36d   : > { %6313 = vst [vmem:[#allocation39_spill] sm:$0xff] %v5516_v9  ;;  %6314 = vst [vmem:[#allocation40_spill] sm:$0xff] %v5518_v42 }
 0x371   : > { %v5520_v1 = vpop.f32.mrb[16].mxu0  ;;  %v5522_v44 = vpop.f32.mrb[32].mxu1 }
 0x372   : > { %6315 = vst [vmem:[#allocation41_spill] sm:$0xff] %v5520_v1  ;;  %6316 = vst [vmem:[#allocation42_spill] sm:$0xff] %v5522_v44  ;;  %v5524_v52 = vpop.f32.mrb[17].mxu0  ;;  %v5526_v45 = vpop.f32.mrb[33].mxu1 }
 0x373   : > { %6317 = vst [vmem:[#allocation43_spill] sm:$0xff] %v5524_v52  ;;  %6318 = vst [vmem:[#allocation44_spill] sm:$0xff] %v5526_v45  ;;  %v5528_v25 = vpop.f32.mrb[18].mxu0  ;;  %v5530_v3 = vpop.f32.mrb[34].mxu1 }
 0x374   : > { %6319 = vst [vmem:[#allocation45_spill] sm:$0xff] %v5528_v25  ;;  %6320 = vst [vmem:[#allocation46_spill] sm:$0xff] %v5530_v3  ;;  %v5532_v53 = vpop.f32.mrb[19].mxu0  ;;  %v5534_v29 = vpop.f32.mrb[35].mxu1 }
 0x375   : > { %6321 = vst [vmem:[#allocation47_spill] sm:$0xff] %v5532_v53  ;;  %6322 = vst [vmem:[#allocation48_spill] sm:$0xff] %v5534_v29 }
 0x379   : > { %v5536_v46 = vpop.f32.mrb[20].mxu0  ;;  %v5538_v24 = vpop.f32.mrb[36].mxu1 }
 0x37a   : > { %6323 = vst [vmem:[#allocation49_spill] sm:$0xff] %v5536_v46  ;;  %6324 = vst [vmem:[#allocation50_spill] sm:$0xff] %v5538_v24  ;;  %v5540_v19 = vpop.f32.mrb[21].mxu0  ;;  %v5542_v14 = vpop.f32.mrb[37].mxu1 }
 0x37b   : > { %6325 = vst [vmem:[#allocation51_spill] sm:$0xff] %v5540_v19  ;;  %6326 = vst [vmem:[#allocation52_spill] sm:$0xff] %v5542_v14  ;;  %v5544_v47 = vpop.f32.mrb[22].mxu0  ;;  %v5546_v11 = vpop.f32.mrb[38].mxu1 }
 0x37c   : > { %6327 = vst [vmem:[#allocation53_spill] sm:$0xff] %v5544_v47  ;;  %6328 = vst [vmem:[#allocation54_spill] sm:$0xff] %v5546_v11  ;;  %v5548_v58 = vpop.f32.mrb[23].mxu0  ;;  %v5550_v21 = vpop.f32.mrb[39].mxu1 }
 0x37d   : > { %6329 = vst [vmem:[#allocation55_spill] sm:$0xff] %v5548_v58  ;;  %6330 = vst [vmem:[#allocation56_spill] sm:$0xff] %v5550_v21 }
 0x381   : > { %v4001_v31 = vpop.f32.mrb[24].mxu0 }
 0x382   : > { %v1770_v49 = vpop.f32.mrb[25].mxu0  ;;  %v5558_v15 = vadd.f32 %v4001_v31, %v5555_v59 }
 0x383   : > { %v5561_v27 = vadd.f32 %v5555_v59, %v1770_v49  ;;  %v4002_v17 = vpop.f32.mrb[26].mxu0 }
 0x384   : > { %v1773_v60 = vpop.f32.mrb[27].mxu0  ;;  %v5568_v34 = vadd.f32 %v4002_v17, %v5555_v59  ;;  %v1883_v36 = vand.u32 2147483647, %v5558_v15  ;;  %vm1851_vm12 = vcmp.ne.f32.partialorder %v5558_v15, %v5558_v15 }
 0x385   : > { %v1881_v56 = vand.u32 2147483647, %v5561_v27  ;;  %v5565_v39 = vadd.f32 %v5555_v59, %v1773_v60  ;;  %vm1849_vm8 = vcmp.ne.f32.partialorder %v5561_v27, %v5561_v27 }
 0x386   : > { %v1884_v49 = vand.u32 2147483647, %v5568_v34  ;;  %v1899_v47 = vsub.f32 0.0, %v1883_v36  ;;  %vm1852_vm14 = vcmp.ne.f32.partialorder %v5568_v34, %v5568_v34 }
 0x387   : > { %v1897_v41 = vsub.f32 0.0, %v1881_v56  ;;  %v1882_v6 = vand.u32 2147483647, %v5565_v39  ;;  %vm1850_vm9 = vcmp.ne.f32.partialorder %v5565_v39, %v5565_v39 }
 0x388   : > { %v1917_v36 = vmul.f32 1.442695, %v1899_v47 }
 0x389   : > { %v1913_v31 = vmul.f32 1.442695, %v1897_v41  ;;  %v1898_v16 = vsub.f32 0.0, %v1882_v6  ;;  %v4005_v5 = vpop.f32.mrb[28].mxu0  ;;  %v1900_v41 = vsub.f32 0.0, %v1884_v49 }
 0x38a   : > { %v1786_v11 = vpop.f32.mrb[29].mxu0  ;;  %v5577_v46 = vadd.f32 %v4005_v5, %v5555_v59 }
 0x38b   : > { %4368 = vpow2.f32 %v1913_v31  ;;  %v1915_v24 = vmul.f32 1.442695, %v1898_v16  ;;  %v5574_v60 = vadd.f32 %v5555_v59, %v1786_v11  ;;  %v4006_v21 = vpop.f32.mrb[30].mxu0 }
 0x38c   : > { %v1789_v17 = vpop.f32.mrb[31].mxu0  ;;  %v5584_v58 = vadd.f32 %v4006_v21, %v5555_v59  ;;  %v1887_v31 = vand.u32 2147483647, %v5577_v46 }
 0x38d   : > { %4370 = vpow2.f32 %v1915_v24  ;;  %v1885_v56 = vand.u32 2147483647, %v5574_v60  ;;  %v5581_v6 = vadd.f32 %v5555_v59, %v1789_v17  ;;  %v1919_v24 = vmul.f32 1.442695, %v1900_v41 }
 0x38e   : > { %v1888_v5 = vand.u32 2147483647, %v5584_v58  ;;  %4372 = vpow2.f32 %v1917_v36  ;;  %v1903_v29 = vsub.f32 0.0, %v1887_v31  ;;  %vm1853_vm0 = vcmp.ne.f32.partialorder %v5574_v60, %v5574_v60 }
 0x38f   : > { %v1901_v16 = vsub.f32 0.0, %v1885_v56  ;;  %v1886_v11 = vand.u32 2147483647, %v5581_v6  ;;  %4374 = vpow2.f32 %v1919_v24  ;;  %vm1854_vm4 = vcmp.ne.f32.partialorder %v5581_v6, %v5581_v6 }
 0x390   : > { %v1925_v52 = vmul.f32 1.442695, %v1903_v29 }
 0x391   : > { %v4009_v14 = vpop.f32.mrb[32].mxu0  ;;  %v1921_v17 = vmul.f32 1.442695, %v1901_v16  ;;  %v1902_v47 = vsub.f32 0.0, %v1886_v11 }
 0x392   : > { %v5590_v3 = vadd.f32 %v4009_v14, %v5555_v59  ;;  %v1802_v19 = vpop.f32.mrb[33].mxu0 }
 0x393   : > { %v5593_v49 = vadd.f32 %v5555_v59, %v1802_v19  ;;  %v4010_v21 = vpop.f32.mrb[34].mxu0  ;;  %v1904_v19 = vsub.f32 0.0, %v1888_v5  ;;  %4376 = vpow2.f32 %v1921_v17 }
 0x394   : > { %v1891_v56 = vand.u32 2147483647, %v5590_v3  ;;  %v5597_v25 = vadd.f32 %v4010_v21, %v5555_v59  ;;  %v1805_v44 = vpop.f32.mrb[35].mxu0 }
 0x395   : > { %v5599_v41 = vpop.eup %4368  ;;  %v1889_v14 = vand.u32 2147483647, %v5593_v49  ;;  %v5603_v1 = vadd.f32 %v5555_v59, %v1805_v44  ;;  %v1923_v44 = vmul.f32 1.442695, %v1902_v47  ;;  %v1927_v42 = vmul.f32 1.442695, %v1904_v19 }
 0x396   : > { %v1892_v36 = vand.u32 2147483647, %v5597_v25  ;;  %v1945_v16 = vadd.f32 1.0, %v5599_v41  ;;  %v1907_v24 = vsub.f32 0.0, %v1891_v56  ;;  %v1948_v56 = vmul.f32 -0.5, %v5599_v41 }
 0x397   : > { %v5607_v11 = vpop.eup %4370  ;;  %v1890_v31 = vand.u32 2147483647, %v5603_v1  ;;  %v1905_v7 = vsub.f32 0.0, %v1889_v14 }
 0x398   : > { %v1954_v22 = vadd.f32 1.0, %v5607_v11  ;;  %4378 = vlog2.f32 %v1945_v16  ;;  %v1908_v21 = vsub.f32 0.0, %v1892_v36  ;;  %v1957_v30 = vmul.f32 -0.5, %v5607_v11  ;;  %v5625_v36 = vpop.eup %4372 }
 0x399   : > { %v4013_v62 = vpop.f32.mrb[36].mxu0  ;;  %v1906_v9 = vsub.f32 0.0, %v1890_v31  ;;  %v1933_v14 = vmul.f32 1.442695, %v1907_v24  ;;  %v1949_v63 = vadd.f32 1.0, %v1948_v56  ;;  %v5634_v37 = vpop.eup %4374  ;;  %v1966_v56 = vmul.f32 -0.5, %v5625_v36 }
 0x39a   : > { %4380 = vlog2.f32 %v1954_v22  ;;  %v5616_v53 = vadd.f32 %v4013_v62, %v5555_v59  ;;  %v1818_v45 = vpop.f32.mrb[37].mxu0  ;;  %v1929_v62 = vmul.f32 1.442695, %v1905_v7 }
 0x39b   : > { %v5620_v17 = vadd.f32 %v5555_v59, %v1818_v45  ;;  %v4014_v47 = vpop.f32.mrb[38].mxu0  ;;  %4382 = vpow2.f32 %v1923_v44  ;;  %v1935_v45 = vmul.f32 1.442695, %v1908_v21  ;;  %v1958_v44 = vadd.f32 1.0, %v1957_v30 }
 0x39c   : > { %v1895_v22 = vand.u32 2147483647, %v5616_v53  ;;  %v1821_v19 = vpop.f32.mrb[39].mxu0  ;;  %4384 = vpow2.f32 %v1925_v52  ;;  %v5629_v31 = vadd.f32 %v4014_v47, %v5555_v59  ;;  %v1931_v24 = vmul.f32 1.442695, %v1906_v9 }
 0x39d   : > { %v1893_v16 = vand.u32 2147483647, %v5620_v17  ;;  %4386 = vpow2.f32 %v1927_v42  ;;  %v5632_v50 = vadd.f32 %v5555_v59, %v1821_v19  ;;  %v1951_v42 = vand.u32 2147483647, %v5599_v41  ;;  %v5645_v21 = vpop.eup %4376 }
 0x39e   : > { %v1911_v5 = vsub.f32 0.0, %v1895_v22  ;;  %4388 = vpow2.f32 %v1933_v14  ;;  %v1896_v7 = vand.u32 2147483647, %v5629_v31  ;;  %v1963_v59 = vadd.f32 1.0, %v5625_v36 }
 0x39f   : > { %v1909_v29 = vsub.f32 0.0, %v1893_v16  ;;  %4390 = vpow2.f32 %v1929_v62  ;;  %v1894_v9 = vand.u32 2147483647, %v5632_v50  ;;  %v1960_v47 = vand.u32 2147483647, %v5607_v11 }
 0x3a0   : > { %v1941_v30 = vmul.f32 1.442695, %v1911_v5  ;;  %4392 = vpow2.f32 %v1935_v45  ;;  %v1959_v19 = vmul.f32 %v5607_v11, %v1958_v44  ;;  %v1950_v16 = vmul.f32 %v5599_v41, %v1949_v63 }
 0x3a1   : > { %v1937_v14 = vmul.f32 1.442695, %v1909_v29  ;;  %4394 = vpow2.f32 %v1931_v24  ;;  %v1972_v5 = vadd.f32 1.0, %v5634_v37  ;;  %v1912_v52 = vsub.f32 0.0, %v1896_v7 }
 0x3a2   : > { %v4379_v22 = vpop.eup %4378  ;;  %vm1952_vm10 = vcmp.lt.f32.partialorder %v1951_v42, 0.0004427343  ;;  %4396 = vlog2.f32 %v1963_v59  ;;  %v1910_v57 = vsub.f32 0.0, %v1894_v9  ;;  %vm1961_vm11 = vcmp.lt.f32.partialorder %v1960_v47, 0.0004427343 }
 0x3a3   : > { %v1947_v4 = vmul.f32 0.6931472, %v4379_v22  ;;  %4398 = vpow2.f32 %v1941_v30  ;;  %v6331_v44 = vmax.f32 %v5561_v27, 0.0  ;;  %v1969_v7 = vand.u32 2147483647, %v5625_v36 }
 0x3a4   : > { %v4381_v62 = vpop.eup %4380  ;;  %4400 = vpow2.f32 %v1937_v14  ;;  %v6332_v30 = vmax.f32 %v5565_v39, 0.0  ;;  %v1943_v59 = vmul.f32 1.442695, %v1912_v52  ;;  %v1975_v47 = vmul.f32 -0.5, %v5634_v37 }
 0x3a5   : > { %v1956_v48 = vmul.f32 0.6931472, %v4381_v62  ;;  %v5653_v45 = vpop.eup %4382  ;;  %v1953_v29 = vsel %vm1952_vm10, %v1950_v16, %v1947_v4  ;;  %4402 = vlog2.f32 %v1972_v5  ;;  %v1981_v14 = vadd.f32 1.0, %v5645_v21 }
 0x3a6   : > { %v5656_v63 = vpop.eup %4384  ;;  %v2089_v24 = vadd.f32 %v1953_v29, %v6331_v44  ;;  %v1939_v4 = vmul.f32 1.442695, %v1910_v57  ;;  %v1967_v22 = vadd.f32 1.0, %v1966_v56  ;;  %v1984_v57 = vmul.f32 -0.5, %v5645_v21 }
 0x3a7   : > { %v1962_v41 = vsel %vm1961_vm11, %v1959_v19, %v1956_v48  ;;  %v5661_v42 = vpop.eup %4386  ;;  %v1990_v19 = vadd.f32 1.0, %v5653_v45  ;;  %4404 = vlog2.f32 %v1981_v14  ;;  %v1993_v29 = vmul.f32 -0.5, %v5653_v45 }
 0x3a8   : > { %v2090_v9 = vadd.f32 %v1962_v41, %v6332_v30  ;;  %v2105_v48 = vsel %vm1849_vm8, %v5561_v27, %v2089_v24  ;;  %v5672_v16 = vpop.eup %4388  ;;  %v1978_v44 = vand.u32 2147483647, %v5634_v37  ;;  %v1999_v24 = vadd.f32 1.0, %v5656_v63 }
 0x3a9   : > { %4017 = vmatprep.mubr.msk.f32.mxu1 %vm1353_vm7, %v2105_v48  ;;  %v2315_v5 = vmul.f32 %v2105_v48, %v5357_v35  ;;  %v5681_v62 = vpop.eup %4390  ;;  %4406 = vlog2.f32 %v1990_v19  ;;  %v2002_v14 = vmul.f32 -0.5, %v5656_v63  ;;  %v1968_v19 = vmul.f32 %v5625_v36, %v1967_v22 }
 0x3aa   : > { %v2106_v52 = vsel %vm1850_vm9, %v5565_v39, %v2090_v9  ;;  %v5689_v41 = vpop.eup %4392  ;;  %4408 = vpow2.f32 %v1943_v59  ;;  %v1976_v39 = vadd.f32 1.0, %v1975_v47  ;;  %v1987_v9 = vand.u32 2147483647, %v5645_v21 }
 0x3ab   : > { %4018 = vmatmul.mubr.msk.f32.vlgmr.msra.gmra.mrb[40].mxu1 %vm1353_vm7, %v2106_v52  ;;  %v2316_v56 = vmul.f32 %v2106_v52, %v5360_v10  ;;  %4043 = vmatprep.mubr.msk.f32.mxu0 %vm1353_vm7, %v2315_v5  ;;  %v5695_v30 = vpop.eup %4394  ;;  %4410 = vpow2.f32 %v1939_v4  ;;  %v2008_v59 = vadd.f32 1.0, %v5661_v42  ;;  %vm5702_vm13 = vcmp.lt.f32.partialorder %v1969_v7, 0.0004427343 }
 0x3ac   : > { %4179 = vmatpush3.bf16.msra.mxu1 %v5484_v40  ;;  %v4397_v48 = vpop.eup %4396  ;;  %v1985_v4 = vadd.f32 1.0, %v1984_v57  ;;  %4412 = vlog2.f32 %v1999_v24  ;;  %v1996_v27 = vand.u32 2147483647, %v5653_v45  ;;  %v1977_v36 = vmul.f32 %v5634_v37, %v1976_v39 }
 0x3ad   : > { %4044 = vmatmul.mubr.msk.f32.vlgmr.msra.gmra.mrb[40].mxu0 %vm1353_vm7, %v2316_v56  ;;  %v5709_v5 = vpop.eup %4398  ;;  %v1965_v52 = vmul.f32 0.6931472, %v4397_v48  ;;  %v1994_v56 = vadd.f32 1.0, %v1993_v29  ;;  %4414 = vlog2.f32 %v2008_v59  ;;  %vm5715_vm15 = vcmp.lt.f32.partialorder %v1978_v44, 0.0004427343 }
 0x3ae   : > { %4183 = vmatpush3.bf16.msra.mxu0 %v5484_v40  ;;  %v5712_v11 = vpop.eup %4400  ;;  %v2005_v40 = vand.u32 2147483647, %v5656_v63  ;;  %v2017_v22 = vadd.f32 1.0, %v5681_v62  ;;  %vm5725_vm2 = vcmp.lt.f32.partialorder %v1987_v9, 0.0004427343  ;;  %v2003_v37 = vadd.f32 1.0, %v2002_v14 }
 0x3af   : > { %v4403_v57 = vpop.eup %4402  ;;  %v1971_v24 = vsel %vm5702_vm13, %v1968_v19, %v1965_v52  ;;  %v2011_v39 = vmul.f32 -0.5, %v5661_v42  ;;  %v6339_v44 = vmax.f32 %v5558_v15, 0.0  ;;  %v2014_v47 = vand.u32 2147483647, %v5661_v42 }
 0x3b0   : > { %v1974_v48 = vmul.f32 0.6931472, %v4403_v57  ;;  %4416 = vlog2.f32 %v2017_v22  ;;  %v1986_v19 = vmul.f32 %v5645_v21, %v1985_v4  ;;  %v1995_v9 = vmul.f32 %v5653_v45, %v1994_v56 }
 0x3b1   : > { %v2091_v59 = vadd.f32 %v1971_v24, %v6339_v44  ;;  %vm5737_vm5 = vcmp.lt.f32.partialorder %v1996_v27, 0.0004427343  ;;  %v2026_v14 = vadd.f32 1.0, %v5695_v30  ;;  %v4405_v10 = vpop.eup %4404  ;;  %vm5748_vm6 = vcmp.lt.f32.partialorder %v2005_v40, 0.0004427343 }
 0x3b2   : > { %v1980_v24 = vsel %vm5715_vm15, %v1977_v36, %v1974_v48  ;;  %v2020_v21 = vmul.f32 -0.5, %v5681_v62  ;;  %v6344_v4 = vmax.f32 %v5568_v34, 0.0  ;;  %v1983_v44 = vmul.f32 0.6931472, %v4405_v10 }
 0x3b3   : > { %v2107_v57 = vsel %vm1851_vm12, %v5558_v15, %v2091_v59  ;;  %v4407_v45 = vpop.eup %4406  ;;  %vm1855_vm8 = vcmp.ne.f32.partialorder %v5577_v46, %v5577_v46  ;;  %v2012_v15 = vadd.f32 1.0, %v2011_v39  ;;  %v2004_v40 = vmul.f32 %v5656_v63, %v2003_v37 }
 0x3b4   : > { %4020 = vmatprep.mubr.msk.f32.mxu1 %vm1353_vm7, %v2107_v57  ;;  %v2317_v27 = vmul.f32 %v2107_v57, %v5273_v2  ;;  %v2092_v56 = vadd.f32 %v1980_v24, %v6344_v4  ;;  %v5759_v36 = vpop.eup %4408  ;;  %v1992_v7 = vmul.f32 0.6931472, %v4407_v45  ;;  %vm1856_vm9 = vcmp.ne.f32.partialorder %v5584_v58, %v5584_v58 }
 0x3b5   : > { %vm5764_vm10 = vcmp.lt.f32.partialorder %v2014_v47, 0.0004427343  ;;  %4418 = vlog2.f32 %v2026_v14  ;;  %v5768_v48 = vpop.eup %4410  ;;  %v1989_v63 = vsel %vm5725_vm2, %v1986_v19, %v1983_v44  ;;  %v2023_v37 = vand.u32 2147483647, %v5681_v62 }
 0x3b6   : > { %4046 = vmatprep.mubr.msk.f32.mxu0 %vm1353_vm7, %v2317_v27  ;;  %v2108_v10 = vsel %vm1852_vm14, %v5568_v34, %v2092_v56  ;;  %v2035_v39 = vadd.f32 1.0, %v5672_v16  ;;  %v4413_v47 = vpop.eup %4412  ;;  %v6347_v57 = vmax.f32 %v5574_v60, 0.0  ;;  %v1998_v45 = vsel %vm5737_vm5, %v1995_v9, %v1992_v7 }
 0x3b7   : > { %4021 = vmatmul.mubr.msk.f32.gmra.mrb[42].mxu1 %vm1353_vm7, %v2108_v10  ;;  %v2318_v14 = vmul.f32 %v2108_v10, %v5258_v26  ;;  %v2021_v27 = vadd.f32 1.0, %v2020_v21  ;;  %v4415_v34 = vpop.eup %4414  ;;  %v6348_v29 = vmax.f32 %v5581_v6, 0.0  ;;  %v2001_v4 = vmul.f32 0.6931472, %v4413_v47 }
 0x3b8   : > { %v2093_v24 = vadd.f32 %v1989_v63, %v6347_v57  ;;  %v2029_v56 = vmul.f32 -0.5, %v5695_v30  ;;  %4420 = vlog2.f32 %v2035_v39  ;;  %v2010_v10 = vmul.f32 0.6931472, %v4415_v34 }
 0x3b9   : > { %v2094_v19 = vadd.f32 %v1998_v45, %v6348_v29  ;;  %4047 = vmatmul.mubr.msk.f32.gmra.mrb[42].mxu0 %vm1353_vm7, %v2318_v14  ;;  %v2013_v52 = vmul.f32 %v5661_v42, %v2012_v15  ;;  %v2038_v9 = vmul.f32 -0.5, %v5672_v16  ;;  %v2007_v63 = vsel %vm5748_vm6, %v2004_v40, %v2001_v4 }
 0x3ba   : > { %v2109_v44 = vsel %vm1853_vm0, %v5574_v60, %v2093_v24  ;;  %vm5803_vm11 = vcmp.lt.f32.partialorder %v2023_v37, 0.0004427343  ;;  %v4417_v39 = vpop.eup %4416  ;;  %v6351_v15 = vmax.f32 %v5577_v46, 0.0  ;;  %v6352_v22 = vmax.f32 %v5584_v58, 0.0 }
 0x3bb   : > { %4023 = vmatprep.mubr.msk.f32.mxu1 %vm1353_vm7, %v2109_v44  ;;  %v2319_v21 = vmul.f32 %v2109_v44, %v5374_v23  ;;  %v2110_v7 = vsel %vm1854_vm4, %v5581_v6, %v2094_v19  ;;  %v2016_v14 = vsel %vm5764_vm10, %v2013_v52, %v2010_v10  ;;  %v2022_v6 = vmul.f32 %v5681_v62, %v2021_v27 }
 0x3bc   : > { %4024 = vmatmul.mubr.msk.f32.gmra.mrb[44].mxu1 %vm1353_vm7, %v2110_v7  ;;  %v2320_v42 = vmul.f32 %v2110_v7, %v5377_v54  ;;  %v2095_v47 = vadd.f32 %v2007_v63, %v6351_v15  ;;  %v2096_v40 = vadd.f32 %v2016_v14, %v6352_v22  ;;  %v2019_v37 = vmul.f32 0.6931472, %v4417_v39 }
 0x3bd   : > { %4049 = vmatprep.mubr.msk.f32.mxu0 %vm1353_vm7, %v2319_v21  ;;  %v2030_v57 = vadd.f32 1.0, %v2029_v56  ;;  %v2044_v24 = vadd.f32 1.0, %v5689_v41  ;;  %v2032_v59 = vand.u32 2147483647, %v5695_v30  ;;  %v2039_v34 = vadd.f32 1.0, %v2038_v9 }
 0x3be   : > { %v2111_v45 = vsel %vm1855_vm8, %v5577_v46, %v2095_v47  ;;  %4050 = vmatmul.mubr.msk.f32.gmra.mrb[44].mxu0 %vm1353_vm7, %v2320_v42  ;;  %v2053_v62 = vadd.f32 1.0, %v5712_v11  ;;  %v2112_v29 = vsel %vm1856_vm9, %v5584_v58, %v2096_v40  ;;  %v2025_v19 = vsel %vm5803_vm11, %v2022_v6, %v2019_v37 }
 0x3bf   : > { %4026 = vmatprep.mubr.msk.f32.mxu1 %vm1353_vm7, %v2111_v45  ;;  %v2321_v27 = vmul.f32 %v2111_v45, %v5425_v43  ;;  %4422 = vlog2.f32 %v2044_v24  ;;  %v4419_v46 = vpop.eup %4418  ;;  %v1842_v4 = vmax.f32 %v5603_v1, 0.0  ;;  %v2322_v56 = vmul.f32 %v2112_v29, %v5420_v13 }
 0x3c0   : > { %4027 = vmatmul.mubr.msk.f32.gmra.mrb[46].mxu1 %vm1353_vm7, %v2112_v29  ;;  %vm1857_vm12 = vcmp.ne.f32.partialorder %v5593_v49, %v5593_v49  ;;  %v6353_v44 = vmax.f32 %v5593_v49, 0.0  ;;  %v2028_v58 = vmul.f32 0.6931472, %v4419_v46  ;;  %v2031_v52 = vmul.f32 %v5695_v30, %v2030_v57 }
 0x3c1   : > { %4052 = vmatprep.mubr.msk.f32.mxu0 %vm1353_vm7, %v2321_v27  ;;  %v2041_v9 = vand.u32 2147483647, %v5672_v16  ;;  %4424 = vlog2.f32 %v2053_v62  ;;  %vm2033_vm13 = vcmp.lt.f32.partialorder %v2032_v59, 0.0004427343  ;;  %v2047_v7 = vmul.f32 -0.5, %v5689_v41 }
 0x3c2   : > { %v2097_v10 = vadd.f32 %v2025_v19, %v6353_v44  ;;  %4053 = vmatmul.mubr.msk.f32.gmra.mrb[46].mxu0 %vm1353_vm7, %v2322_v56  ;;  %v2062_v63 = vadd.f32 1.0, %v5768_v48  ;;  %v4421_v60 = vpop.eup %4420  ;;  %v2034_v42 = vsel %vm2033_vm13, %v2031_v52, %v2028_v58  ;;  %v2040_v30 = vmul.f32 %v5672_v16, %v2039_v34 }
 0x3c3   : > { %v2098_v15 = vadd.f32 %v2034_v42, %v1842_v4  ;;  %v2037_v47 = vmul.f32 0.6931472, %v4421_v60  ;;  %v2056_v14 = vmul.f32 -0.5, %v5712_v11  ;;  %vm1858_vm14 = vcmp.ne.f32.partialorder %v5603_v1, %v5603_v1 }
 0x3c4   : > { %v2113_v21 = vsel %vm1857_vm12, %v5593_v49, %v2097_v10  ;;  %4426 = vlog2.f32 %v2062_v63  ;;  %v1843_v49 = vmax.f32 %v5590_v3, 0.0  ;;  %vm2042_vm15 = vcmp.lt.f32.partialorder %v2041_v9, 0.0004427343 }
 0x3c5   : > { %4029 = vmatprep.mubr.msk.f32.mxu1 %vm1353_vm7, %v2113_v21  ;;  %v2323_v39 = vmul.f32 %v2113_v21, %v5423_v20  ;;  %v2071_v6 = vadd.f32 1.0, %v5709_v5  ;;  %v2114_v22 = vsel %vm1858_vm14, %v5603_v1, %v2098_v15  ;;  %v2043_v40 = vsel %vm2042_vm15, %v2040_v30, %v2037_v47 }
 0x3c6   : > { %v2048_v37 = vadd.f32 1.0, %v2047_v7  ;;  %v2065_v16 = vmul.f32 -0.5, %v5768_v48  ;;  %4030 = vmatmul.mubr.msk.f32.gmra.mrb[48].mxu1 %vm1353_vm7, %v2114_v22  ;;  %v2324_v57 = vmul.f32 %v2114_v22, %v5417_v61  ;;  %v2099_v24 = vadd.f32 %v2043_v40, %v1843_v49 }
 0x3c7   : > { %4055 = vmatprep.mubr.msk.f32.mxu0 %vm1353_vm7, %v2323_v39  ;;  %v2050_v45 = vand.u32 2147483647, %v5689_v41  ;;  %4428 = vlog2.f32 %v2071_v6  ;;  %vm1859_vm0 = vcmp.ne.f32.partialorder %v5590_v3, %v5590_v3  ;;  %v2057_v59 = vadd.f32 1.0, %v2056_v14 }
 0x3c8   : > { %v2115_v62 = vsel %vm1859_vm0, %v5590_v3, %v2099_v24  ;;  %4056 = vmatmul.mubr.msk.f32.gmra.mrb[48].mxu0 %vm1353_vm7, %v2324_v57  ;;  %v2059_v1 = vand.u32 2147483647, %v5712_v11  ;;  %v2074_v27 = vmul.f32 -0.5, %v5709_v5  ;;  %v2080_v29 = vadd.f32 1.0, %v5759_v36 }
 0x3c9   : > { %v4423_v34 = vpop.eup %4422  ;;  %4032 = vmatprep.mubr.msk.f32.mxu1 %vm1353_vm7, %v2115_v62  ;;  %v2325_v19 = vmul.f32 %v2115_v62, %v5433_v0  ;;  %v2049_v4 = vmul.f32 %v5689_v41, %v2048_v37  ;;  %v2066_v56 = vadd.f32 1.0, %v2065_v16  ;;  %v1844_v10 = vmax.f32 %v5597_v25, 0.0 }
 0x3ca   : > { %v2046_v46 = vmul.f32 0.6931472, %v4423_v34  ;;  %vm2051_vm2 = vcmp.lt.f32.partialorder %v2050_v45, 0.0004427343  ;;  %4430 = vlog2.f32 %v2080_v29  ;;  %v2058_v52 = vmul.f32 %v5712_v11, %v2057_v59 }
 0x3cb   : > { %v4425_v44 = vpop.eup %4424  ;;  %4058 = vmatprep.mubr.msk.f32.mxu0 %vm1353_vm7, %v2325_v19  ;;  %v2068_v9 = vand.u32 2147483647, %v5768_v48  ;;  %v1845_v21 = vmax.f32 %v5620_v17, 0.0  ;;  %vm2060_vm4 = vcmp.lt.f32.partialorder %v2059_v1, 0.0004427343  ;;  %v2075_v63 = vadd.f32 1.0, %v2074_v27 }
 0x3cc   : > { %v2052_v3 = vsel %vm2051_vm2, %v2049_v4, %v2046_v46  ;;  %v2055_v58 = vmul.f32 0.6931472, %v4425_v44  ;;  %vm1860_vm5 = vcmp.ne.f32.partialorder %v5597_v25, %v5597_v25  ;;  %v2067_v39 = vmul.f32 %v5768_v48, %v2066_v56  ;;  %v6354_v56 = vld [vmem:[#allocation32_spill] sm:$0xff]  ;;  %v6356_v44 = vld [vmem:[#allocation30_spill] sm:$0xff] }
 0x3cd   : > { %v2100_v7 = vadd.f32 %v2052_v3, %v1844_v10  ;;  %v2083_v42 = vmul.f32 -0.5, %v5759_v36  ;;  %v2077_v47 = vand.u32 2147483647, %v5709_v5  ;;  %v1846_v14 = vmax.f32 %v5632_v50, 0.0  ;;  %v6358_v10 = vld [vmem:[#allocation31_spill] sm:$0xff]  ;;  %v6362_v3 = vld [vmem:[#allocation40_spill] sm:$0xff] }
 0x3ce   : > { %v4427_v41 = vpop.eup %4426  ;;  %v2061_v60 = vsel %vm2060_vm4, %v2058_v52, %v2055_v58  ;;  %vm1861_vm6 = vcmp.ne.f32.partialorder %v5620_v17, %v5620_v17  ;;  %vm2069_vm8 = vcmp.lt.f32.partialorder %v2068_v9, 0.0004427343  ;;  %v1847_v24 = vmax.f32 %v5616_v53, 0.0  ;;  %v6363_v58 = vld [vmem:[#allocation34_spill] sm:$0xff]  ;;  %v6364_v52 = vld [vmem:[#allocation37_spill] sm:$0xff]  ;;  %v6365_v9 = vld [vmem:[#allocation43_spill] sm:$0xff] }
 0x3cf   : > { %v2116_v30 = vsel %vm1860_vm5, %v5597_v25, %v2100_v7  ;;  %v2101_v15 = vadd.f32 %v2061_v60, %v1845_v21  ;;  %v2064_v11 = vmul.f32 0.6931472, %v4427_v41  ;;  %v2076_v25 = vmul.f32 %v5709_v5, %v2075_v63  ;;  %v6366_v21 = vld [vmem:[#allocation38_spill] sm:$0xff]  ;;  %v6367_v7 = vld [vmem:[#allocation44_spill] sm:$0xff]  ;;  %v6368_v63 = vld [vmem:[#allocation47_spill] sm:$0xff] }
 0x3d0   : > { %4033 = vmatmul.mubr.msk.f32.gmra.mrb[50].mxu1 %vm1353_vm7, %v2116_v30  ;;  %v2326_v49 = vmul.f32 %v2116_v30, %v5436_v38  ;;  %v2084_v57 = vadd.f32 1.0, %v2083_v42  ;;  %vm1862_vm9 = vcmp.ne.f32.partialorder %v5632_v50, %v5632_v50  ;;  %vm2078_vm10 = vcmp.lt.f32.partialorder %v2077_v47, 0.0004427343  ;;  %v6369_v41 = vld [vmem:[#allocation41_spill] sm:$0xff]  ;;  %v6370_v60 = vld [vmem:[#allocation48_spill] sm:$0xff]  ;;  %v6373_v30 = vld [vmem:[#allocation51_spill] sm:$0xff] }
 0x3d1   : > { %v4429_v6 = vpop.eup %4428  ;;  %v2117_v48 = vsel %vm1861_vm6, %v5620_v17, %v2101_v15  ;;  %v2070_v22 = vsel %vm2069_vm8, %v2067_v39, %v2064_v11  ;;  %v2086_v17 = vand.u32 2147483647, %v5759_v36  ;;  %vm1863_vm11 = vcmp.ne.f32.partialorder %v5616_v53, %v5616_v53  ;;  %v6371_v39 = vld [vmem:[#allocation42_spill] sm:$0xff]  ;;  %v6372_v42 = vld [vmem:[#allocation45_spill] sm:$0xff]  ;;  %v6375_v11 = vld [vmem:[#allocation52_spill] sm:$0xff] }
 0x3d2   : > { %4035 = vmatprep.mubr.msk.f32.mxu1 %vm1353_vm7, %v2117_v48  ;;  %v2327_v40 = vmul.f32 %v2117_v48, %v5444_v55  ;;  %4059 = vmatmul.mubr.msk.f32.gmra.mrb[50].mxu0 %vm1353_vm7, %v2326_v49  ;;  %v2102_v37 = vadd.f32 %v2070_v22, %v1846_v14  ;;  %v2073_v16 = vmul.f32 0.6931472, %v4429_v6  ;;  %v2085_v27 = vmul.f32 %v5759_v36, %v2084_v57  ;;  %v6374_v15 = vld [vmem:[#allocation46_spill] sm:$0xff]  ;;  %v6376_v47 = vld [vmem:[#allocation55_spill] sm:$0xff]  ;;  %v6377_v14 = vld [vmem:[#allocation49_spill] sm:$0xff] }
 0x3d3   : > { %v1848_v29 = vmax.f32 %v5629_v31, 0.0  ;;  %vm2087_vm12 = vcmp.lt.f32.partialorder %v2086_v17, 0.0004427343  ;;  %vm1864_vm13 = vcmp.ne.f32.partialorder %v5629_v31, %v5629_v31  ;;  %vm2526_vm14 = vcmask 130048   ;;  %v6378_v49 = vld [vmem:[#allocation56_spill] sm:$0xff]  ;;  %v6379_v6 = vld [vmem:[#allocation50_spill] sm:$0xff] }
 0x3d4   : > { %v2118_v45 = vsel %vm1862_vm9, %v5632_v50, %v2102_v37  ;;  %4061 = vmatprep.mubr.msk.f32.mxu0 %vm1353_vm7, %v2327_v40  ;;  %v2079_v5 = vsel %vm2078_vm10, %v2076_v25, %v2073_v16  ;;  %v4431_v59 = vpop.eup %4430  ;;  %v6380_v48 = vld [vmem:[#allocation53_spill] sm:$0xff]  ;;  %v6381_v22 = vld [vmem:[#allocation54_spill] sm:$0xff] }
 0x3d5   : > { %4036 = vmatmul.mubr.msk.f32.gmra.mrb[52].mxu1 %vm1353_vm7, %v2118_v45  ;;  %v2328_v34 = vmul.f32 %v2118_v45, %v5441_v8  ;;  %v2103_v62 = vadd.f32 %v2079_v5, %v1847_v24  ;;  %v2082_v1 = vmul.f32 0.6931472, %v4431_v59  ;;  %v5982_v25 = vld [vmem:[%s6253_s11] ss:$0 sm:$0xff] }
 0x3d7   : > { %v2119_v19 = vsel %vm1863_vm11, %v5616_v53, %v2103_v62  ;;  %4062 = vmatmul.mubr.msk.f32.gmra.mrb[52].mxu0 %vm1353_vm7, %v2328_v34  ;;  %v2088_v46 = vsel %vm2087_vm12, %v2085_v27, %v2082_v1 }
 0x3d8   : > { %4038 = vmatprep.mubr.msk.f32.mxu1 %vm1353_vm7, %v2119_v19  ;;  %v2329_v50 = vmul.f32 %v2119_v19, %v5453_v32  ;;  %v2104_v4 = vadd.f32 %v2088_v46, %v1848_v29 }
 0x3da   : > { %4064 = vmatprep.mubr.msk.f32.mxu0 %vm1353_vm7, %v2329_v50  ;;  %v2120_v36 = vsel %vm1864_vm13, %v5629_v31, %v2104_v4  ;;  %v6355_v31 = vld [vmem:[#allocation29_spill] sm:$0xff] }
 0x3db   : > { %4039 = vmatmul.mubr.msk.f32.gmra.mrb[54].mxu1 %vm1353_vm7, %v2120_v36  ;;  %v2330_v53 = vmul.f32 %v2120_v36, %v5456_v18 }
 0x3dc   : > { %4071 = vmatprep.mubr.msk.f32.mxu1 %vm2526_vm14, %v5492_v33  ;;  %v6357_v33 = vld [vmem:[#allocation35_spill] sm:$0xff] }
 0x3dd   : > { %4065 = vmatmul.mubr.msk.f32.gmra.mrb[54].mxu0 %vm1353_vm7, %v2330_v53 }
 0x3de   : > { %4099 = vmatprep.mubr.msk.f32.mxu0 %vm2526_vm14, %v5494_v12  ;;  %v6359_v12 = vld [vmem:[#allocation36_spill] sm:$0xff] }
 0x3df   : > { %4072 = vmatmul.mubr.msk.f32.vlgmr.msra.gmra.mrb[56].mxu1 %vm2526_vm14, %v5500_v28  ;;  %v6360_v28 = vld [vmem:[#allocation39_spill] sm:$0xff] }
 0x3e0   : > { %4074 = vmatprep.mubr.msk.f32.mxu1 %vm2526_vm14, %v5488_v51  ;;  %v6361_v51 = vld [vmem:[#allocation33_spill] sm:$0xff] }
 0x3e1   : > { %4100 = vmatmul.mubr.msk.f32.vlgmr.msra.gmra.mrb[56].mxu0 %vm2526_vm14, %v6354_v56 }
 0x3e2   : > { %4102 = vmatprep.mubr.msk.f32.mxu0 %vm2526_vm14, %v6355_v31 }
 0x3e3   : > { %4075 = vmatmul.mubr.msk.f32.gmra.mrb[58].mxu1 %vm2526_vm14, %v6356_v44 }
 0x3e4   : > { %4077 = vmatprep.mubr.msk.f32.mxu1 %vm2526_vm14, %v6357_v33 }
 0x3e5   : > { %4103 = vmatmul.mubr.msk.f32.gmra.mrb[58].mxu0 %vm2526_vm14, %v6358_v10 }
 0x3e6   : > { %4105 = vmatprep.mubr.msk.f32.mxu0 %vm2526_vm14, %v6359_v12 }
 0x3e7   : > { %4078 = vmatmul.mubr.msk.f32.gmra.mrb[60].mxu1 %vm2526_vm14, %v6360_v28 }
 0x3e8   : > { %4080 = vmatprep.mubr.msk.f32.mxu1 %vm2526_vm14, %v6361_v51 }
 0x3e9   : > { %4106 = vmatmul.mubr.msk.f32.gmra.mrb[60].mxu0 %vm2526_vm14, %v6362_v3 }
 0x3ea   : > { %4108 = vmatprep.mubr.msk.f32.mxu0 %vm2526_vm14, %v6363_v58 }
 0x3eb   : > { %4081 = vmatmul.mubr.msk.f32.gmra.mrb[62].mxu1 %vm2526_vm14, %v6364_v52 }
 0x3ec   : > { %4083 = vmatprep.mubr.msk.f32.mxu1 %vm2526_vm14, %v6365_v9 }
 0x3ed   : > { %4109 = vmatmul.mubr.msk.f32.gmra.mrb[62].mxu0 %vm2526_vm14, %v6366_v21 }
 0x3ee   : > { %4111 = vmatprep.mubr.msk.f32.mxu0 %vm2526_vm14, %v6367_v7 }
 0x3ef   : > { %4084 = vmatmul.mubr.msk.f32.gmra.mrb[64].mxu1 %vm2526_vm14, %v6368_v63 }
 0x3f0   : > { %4086 = vmatprep.mubr.msk.f32.mxu1 %vm2526_vm14, %v6369_v41 }
 0x3f1   : > { %4112 = vmatmul.mubr.msk.f32.gmra.mrb[64].mxu0 %vm2526_vm14, %v6370_v60 }
 0x3f2   : > { %4114 = vmatprep.mubr.msk.f32.mxu0 %vm2526_vm14, %v6371_v39 }
 0x3f3   : > { %4087 = vmatmul.mubr.msk.f32.gmra.mrb[66].mxu1 %vm2526_vm14, %v6372_v42 }
 0x3f4   : > { %4089 = vmatprep.mubr.msk.f32.mxu1 %vm2526_vm14, %v6373_v30 }
 0x3f5   : > { %4115 = vmatmul.mubr.msk.f32.gmra.mrb[66].mxu0 %vm2526_vm14, %v6374_v15 }
 0x3f6   : > { %4117 = vmatprep.mubr.msk.f32.mxu0 %vm2526_vm14, %v6375_v11 }
 0x3f7   : > { %4090 = vmatmul.mubr.msk.f32.gmra.mrb[68].mxu1 %vm2526_vm14, %v6376_v47 }
 0x3f8   : > { %4092 = vmatprep.mubr.msk.f32.mxu1 %vm2526_vm14, %v6377_v14 }
 0x3f9   : > { %4118 = vmatmul.mubr.msk.f32.gmra.mrb[68].mxu0 %vm2526_vm14, %v6378_v49 }
 0x3fa   : > { %4120 = vmatprep.mubr.msk.f32.mxu0 %vm2526_vm14, %v6379_v6 }
 0x3fb   : > { %4093 = vmatmul.mubr.msk.f32.gmra.mrb[70].mxu1 %vm2526_vm14, %v6380_v48 }
 0x3fd   : > { %4121 = vmatmul.mubr.msk.f32.gmra.mrb[70].mxu0 %vm2526_vm14, %v6381_v22 }
 0x47e   : > { %v4019_v40 = vpop.f32.mrb[40].mxu1 }
 0x47f   : > { %v2728_v37 = vmul.f32 %v4019_v40, %v5982_v25  ;;  %v2236_v16 = vpop.f32.mrb[41].mxu1 }
 0x480   : > { %v2727_v57 = vmul.f32 %v5982_v25, %v2236_v16  ;;  %v5986_v24 = vpop.f32.mrb[40].mxu0 }
 0x481   : > { %v2745_v17 = vmul.f32 1.442695, %v2728_v37  ;;  %v5988_v45 = vpop.f32.mrb[41].mxu0 }
 0x482   : > { %v2743_v5 = vmul.f32 1.442695, %v2727_v57 }
 0x483   : > { %4432 = vpow2.f32 %v2745_v17 }
 0x484   : > { %4434 = vpow2.f32 %v2743_v5 }
 0x48a   : > { %v4022_v59 = vpop.f32.mrb[42].mxu1 }
 0x48b   : > { %v2730_v34 = vmul.f32 %v4022_v59, %v5982_v25  ;;  %v2246_v62 = vpop.f32.mrb[43].mxu1 }
 0x48c   : > { %v2729_v27 = vmul.f32 %v5982_v25, %v2246_v62  ;;  %v5992_v29 = vpop.f32.mrb[42].mxu0 }
 0x48d   : > { %v4433_v1 = vpop.eup %4432  ;;  %v2749_v50 = vmul.f32 1.442695, %v2730_v34  ;;  %v5994_v46 = vpop.f32.mrb[43].mxu0 }
 0x48e   : > { %v4435_v19 = vpop.eup %4434  ;;  %2776 = vst [vmem:[#allocation2 + $0x8] sm:$0xff] %v4433_v1  ;;  %v2747_v4 = vmul.f32 1.442695, %v2729_v27 }
 0x48f   : > { %2775 = vst [vmem:[#allocation2] sm:$0xff] %v4435_v19  ;;  %v4025_v36 = vpop.f32.mrb[44].mxu1  ;;  %4436 = vpow2.f32 %v2749_v50 }
 0x490   : > { %v2732_v53 = vmul.f32 %v4025_v36, %v5982_v25  ;;  %v2256_v56 = vpop.f32.mrb[45].mxu1  ;;  %4438 = vpow2.f32 %v2747_v4 }
 0x491   : > { %v2731_v31 = vmul.f32 %v5982_v25, %v2256_v56  ;;  %v5998_v44 = vpop.f32.mrb[44].mxu0 }
 0x492   : > { %v2753_v33 = vmul.f32 1.442695, %v2732_v53  ;;  %v6000_v10 = vpop.f32.mrb[45].mxu0 }
 0x493   : > { %v2751_v12 = vmul.f32 1.442695, %v2731_v31  ;;  %v4028_v28 = vpop.f32.mrb[46].mxu1 }
 0x494   : > { %4440 = vpow2.f32 %v2753_v33  ;;  %v2734_v51 = vmul.f32 %v4028_v28, %v5982_v25  ;;  %v2266_v3 = vpop.f32.mrb[47].mxu1 }
 0x495   : > { %4442 = vpow2.f32 %v2751_v12  ;;  %v2733_v58 = vmul.f32 %v5982_v25, %v2266_v3  ;;  %v6004_v52 = vpop.f32.mrb[46].mxu0 }
 0x496   : > { %v2757_v9 = vmul.f32 1.442695, %v2734_v51  ;;  %v6006_v21 = vpop.f32.mrb[47].mxu0 }
 0x497   : > { %v2755_v7 = vmul.f32 1.442695, %v2733_v58 }
 0x498   : > { %4444 = vpow2.f32 %v2757_v9 }
 0x499   : > { %4446 = vpow2.f32 %v2755_v7  ;;  %v4437_v63 = vpop.eup %4436  ;;  %v4031_v41 = vpop.f32.mrb[48].mxu1 }
 0x49a   : > { %v4439_v60 = vpop.eup %4438  ;;  %2778 = vst [vmem:[#allocation2 + $0x18] sm:$0xff] %v4437_v63  ;;  %v2736_v39 = vmul.f32 %v4031_v41, %v5982_v25  ;;  %v2276_v42 = vpop.f32.mrb[49].mxu1 }
 0x49b   : > { %2777 = vst [vmem:[#allocation2 + $0x10] sm:$0xff] %v4439_v60  ;;  %v2735_v30 = vmul.f32 %v5982_v25, %v2276_v42  ;;  %v6010_v15 = vpop.f32.mrb[48].mxu0 }
 0x49c   : > { %v2761_v11 = vmul.f32 1.442695, %v2736_v39  ;;  %v6012_v47 = vpop.f32.mrb[49].mxu0 }
 0x49d   : > { %v2759_v49 = vmul.f32 1.442695, %v2735_v30 }
 0x49e   : > { %v4441_v14 = vpop.eup %4440  ;;  %4448 = vpow2.f32 %v2761_v11 }
 0x49f   : > { %v4443_v6 = vpop.eup %4442  ;;  %2780 = vst [vmem:[#allocation2 + $0x28] sm:$0xff] %v4441_v14  ;;  %4450 = vpow2.f32 %v2759_v49 }
 0x4a0   : > { %2779 = vst [vmem:[#allocation2 + $0x20] sm:$0xff] %v4443_v6 }
 0x4a2   : > { %v4445_v48 = vpop.eup %4444 }
 0x4a3   : > { %v4447_v22 = vpop.eup %4446  ;;  %2782 = vst [vmem:[#allocation2 + $0x38] sm:$0xff] %v4445_v48  ;;  %v4034_v40 = vpop.f32.mrb[50].mxu1 }
 0x4a4   : > { %2781 = vst [vmem:[#allocation2 + $0x30] sm:$0xff] %v4447_v22  ;;  %v2738_v37 = vmul.f32 %v4034_v40, %v5982_v25  ;;  %v2286_v16 = vpop.f32.mrb[51].mxu1 }
 0x4a5   : > { %v2737_v57 = vmul.f32 %v5982_v25, %v2286_v16  ;;  %v6016_v17 = vpop.f32.mrb[50].mxu0 }
 0x4a6   : > { %v2765_v5 = vmul.f32 1.442695, %v2738_v37  ;;  %v6018_v59 = vpop.f32.mrb[51].mxu0 }
 0x4a7   : > { %v2763_v34 = vmul.f32 1.442695, %v2737_v57 }
 0x4a8   : > { %4452 = vpow2.f32 %v2765_v5  ;;  %v4037_v62 = vpop.f32.mrb[52].mxu1  ;;  %v4449_v1 = vpop.eup %4448 }
 0x4a9   : > { %4454 = vpow2.f32 %v2763_v34  ;;  %v2740_v27 = vmul.f32 %v4037_v62, %v5982_v25  ;;  %v2296_v19 = vpop.f32.mrb[53].mxu1  ;;  %v4451_v50 = vpop.eup %4450  ;;  %2784 = vst [vmem:[#allocation2 + $0x48] sm:$0xff] %v4449_v1 }
 0x4aa   : > { %v2739_v4 = vmul.f32 %v5982_v25, %v2296_v19  ;;  %v6022_v36 = vpop.f32.mrb[52].mxu0  ;;  %2783 = vst [vmem:[#allocation2 + $0x40] sm:$0xff] %v4451_v50 }
 0x4ab   : > { %v2769_v53 = vmul.f32 1.442695, %v2740_v27  ;;  %v6024_v56 = vpop.f32.mrb[53].mxu0 }
 0x4ac   : > { %v2767_v31 = vmul.f32 1.442695, %v2739_v4 }
 0x4ad   : > { %4456 = vpow2.f32 %v2769_v53 }
 0x4ae   : > { %4458 = vpow2.f32 %v2767_v31  ;;  %v4040_v33 = vpop.f32.mrb[54].mxu1 }
 0x4af   : > { %v2742_v12 = vmul.f32 %v4040_v33, %v5982_v25  ;;  %v2306_v28 = vpop.f32.mrb[55].mxu1 }
 0x4b0   : > { %v2741_v51 = vmul.f32 %v5982_v25, %v2306_v28  ;;  %v6028_v3 = vpop.f32.mrb[54].mxu0 }
 0x4b1   : > { %v2773_v9 = vmul.f32 1.442695, %v2742_v12  ;;  %v6030_v7 = vpop.f32.mrb[55].mxu0 }
 0x4b2   : > { %v4453_v58 = vpop.eup %4452  ;;  %v2771_v41 = vmul.f32 1.442695, %v2741_v51  ;;  %v4073_v60 = vpop.f32.mrb[56].mxu1 }
 0x4b3   : > { %v4455_v63 = vpop.eup %4454  ;;  %2786 = vst [vmem:[#allocation2 + $0x58] sm:$0xff] %v4453_v58  ;;  %4460 = vpow2.f32 %v2773_v9  ;;  %v2792_v39 = vmul.f32 %v4073_v60, %v5986_v24  ;;  %v2641_v42 = vpop.f32.mrb[57].mxu1 }
 0x4b4   : > { %2785 = vst [vmem:[#allocation2 + $0x50] sm:$0xff] %v4455_v63  ;;  %4462 = vpow2.f32 %v2771_v41  ;;  %v2791_v30 = vmul.f32 %v2641_v42, %v5988_v45  ;;  %v4101_v11 = vpop.f32.mrb[56].mxu0 }
 0x4b5   : > { %2808 = vst [vmem:[#allocation3 + $0x8] sm:$0xff] %v2792_v39  ;;  %3019 = vst [vmem:[#allocation4 + $0x8] sm:$0xff] %v4101_v11  ;;  %v2939_v25 = vpop.f32.mrb[57].mxu0 }
 0x4b6   : > { %2807 = vst [vmem:[#allocation3] sm:$0xff] %v2791_v30  ;;  %3018 = vst [vmem:[#allocation4] sm:$0xff] %v2939_v25  ;;  %v4076_v49 = vpop.f32.mrb[58].mxu1 }
 0x4b7   : > { %v4457_v14 = vpop.eup %4456  ;;  %v2794_v48 = vmul.f32 %v4076_v49, %v5992_v29  ;;  %v2651_v22 = vpop.f32.mrb[59].mxu1 }
 0x4b8   : > { %v4459_v6 = vpop.eup %4458  ;;  %2788 = vst [vmem:[#allocation2 + $0x68] sm:$0xff] %v4457_v14  ;;  %v2793_v24 = vmul.f32 %v2651_v22, %v5994_v46  ;;  %v4104_v40 = vpop.f32.mrb[58].mxu0 }
 0x4b9   : > { %2787 = vst [vmem:[#allocation2 + $0x60] sm:$0xff] %v4459_v6  ;;  %2810 = vst [vmem:[#allocation3 + $0x18] sm:$0xff] %v2794_v48  ;;  %v2949_v45 = vpop.f32.mrb[59].mxu0 }
 0x4ba   : > { %3021 = vst [vmem:[#allocation4 + $0x18] sm:$0xff] %v4104_v40  ;;  %2809 = vst [vmem:[#allocation3 + $0x10] sm:$0xff] %v2793_v24  ;;  %v4079_v37 = vpop.f32.mrb[60].mxu1 }
 0x4bb   : > { %3020 = vst [vmem:[#allocation4 + $0x10] sm:$0xff] %v2949_v45  ;;  %v2796_v16 = vmul.f32 %v4079_v37, %v5998_v44  ;;  %v2661_v57 = vpop.f32.mrb[61].mxu1 }
 0x4bc   : > { %v2795_v5 = vmul.f32 %v2661_v57, %v6000_v10  ;;  %v4107_v34 = vpop.f32.mrb[60].mxu0 }
 0x4bd   : > { %v4461_v62 = vpop.eup %4460  ;;  %2812 = vst [vmem:[#allocation3 + $0x28] sm:$0xff] %v2796_v16  ;;  %3023 = vst [vmem:[#allocation4 + $0x28] sm:$0xff] %v4107_v34  ;;  %v2959_v29 = vpop.f32.mrb[61].mxu0 }
 0x4be   : > { %v4463_v1 = vpop.eup %4462  ;;  %2790 = vst [vmem:[#allocation2 + $0x78] sm:$0xff] %v4461_v62  ;;  %2811 = vst [vmem:[#allocation3 + $0x20] sm:$0xff] %v2795_v5  ;;  %v4082_v46 = vpop.f32.mrb[62].mxu1 }
 0x4bf   : > { %3022 = vst [vmem:[#allocation4 + $0x20] sm:$0xff] %v2959_v29  ;;  %2789 = vst [vmem:[#allocation2 + $0x70] sm:$0xff] %v4463_v1  ;;  %v2798_v27 = vmul.f32 %v4082_v46, %v6004_v52  ;;  %v2671_v19 = vpop.f32.mrb[63].mxu1 }
 0x4c0   : > { %v2797_v50 = vmul.f32 %v2671_v19, %v6006_v21  ;;  %v4110_v44 = vpop.f32.mrb[62].mxu0 }
 0x4c1   : > { %2814 = vst [vmem:[#allocation3 + $0x38] sm:$0xff] %v2798_v27  ;;  %3025 = vst [vmem:[#allocation4 + $0x38] sm:$0xff] %v4110_v44  ;;  %v2969_v10 = vpop.f32.mrb[63].mxu0 }
 0x4c2   : > { %2813 = vst [vmem:[#allocation3 + $0x30] sm:$0xff] %v2797_v50  ;;  %3024 = vst [vmem:[#allocation4 + $0x30] sm:$0xff] %v2969_v10  ;;  %v4085_v4 = vpop.f32.mrb[64].mxu1 }
 0x4c3   : > { %v2800_v53 = vmul.f32 %v4085_v4, %v6010_v15  ;;  %v2681_v31 = vpop.f32.mrb[65].mxu1 }
 0x4c4   : > { %v2799_v33 = vmul.f32 %v2681_v31, %v6012_v47  ;;  %v4113_v12 = vpop.f32.mrb[64].mxu0 }
 0x4c5   : > { %2816 = vst [vmem:[#allocation3 + $0x48] sm:$0xff] %v2800_v53  ;;  %3027 = vst [vmem:[#allocation4 + $0x48] sm:$0xff] %v4113_v12  ;;  %v2979_v28 = vpop.f32.mrb[65].mxu0 }
 0x4c6   : > { %2815 = vst [vmem:[#allocation3 + $0x40] sm:$0xff] %v2799_v33  ;;  %3026 = vst [vmem:[#allocation4 + $0x40] sm:$0xff] %v2979_v28  ;;  %v4088_v52 = vpop.f32.mrb[66].mxu1 }
 0x4c7   : > { %v2802_v21 = vmul.f32 %v4088_v52, %v6016_v17  ;;  %v2691_v51 = vpop.f32.mrb[67].mxu1 }
 0x4c8   : > { %v2801_v58 = vmul.f32 %v2691_v51, %v6018_v59  ;;  %v4116_v9 = vpop.f32.mrb[66].mxu0 }
 0x4c9   : > { %2818 = vst [vmem:[#allocation3 + $0x58] sm:$0xff] %v2802_v21  ;;  %3029 = vst [vmem:[#allocation4 + $0x58] sm:$0xff] %v4116_v9  ;;  %v2989_v63 = vpop.f32.mrb[67].mxu0 }
 0x4ca   : > { %2817 = vst [vmem:[#allocation3 + $0x50] sm:$0xff] %v2801_v58  ;;  %3028 = vst [vmem:[#allocation4 + $0x50] sm:$0xff] %v2989_v63  ;;  %v4091_v15 = vpop.f32.mrb[68].mxu1 }
 0x4cb   : > { %v2804_v47 = vmul.f32 %v4091_v15, %v6022_v36  ;;  %v2701_v41 = vpop.f32.mrb[69].mxu1 }
 0x4cc   : > { %v2803_v60 = vmul.f32 %v2701_v41, %v6024_v56  ;;  %v4119_v39 = vpop.f32.mrb[68].mxu0 }
 0x4cd   : > { %2820 = vst [vmem:[#allocation3 + $0x68] sm:$0xff] %v2804_v47  ;;  %3031 = vst [vmem:[#allocation4 + $0x68] sm:$0xff] %v4119_v39  ;;  %v2999_v42 = vpop.f32.mrb[69].mxu0 }
 0x4ce   : > { %2819 = vst [vmem:[#allocation3 + $0x60] sm:$0xff] %v2803_v60  ;;  %3030 = vst [vmem:[#allocation4 + $0x60] sm:$0xff] %v2999_v42  ;;  %v4094_v17 = vpop.f32.mrb[70].mxu1 }
 0x4cf   : > { %v2806_v59 = vmul.f32 %v4094_v17, %v6028_v3  ;;  %v2711_v30 = vpop.f32.mrb[71].mxu1 }
 0x4d0   : > { %v2805_v11 = vmul.f32 %v2711_v30, %v6030_v7  ;;  %v4122_v25 = vpop.f32.mrb[70].mxu0 }
 0x4d1   : > { %2822 = vst [vmem:[#allocation3 + $0x78] sm:$0xff] %v2806_v59  ;;  %3033 = vst [vmem:[#allocation4 + $0x78] sm:$0xff] %v4122_v25  ;;  %v3009_v14 = vpop.f32.mrb[71].mxu0 }
 0x4d2   : > { %2821 = vst [vmem:[#allocation3 + $0x70] sm:$0xff] %v2805_v11  ;;  %3032 = vst [vmem:[#allocation4 + $0x70] sm:$0xff] %v3009_v14 }
 0x4d3 LB: >> { %v3096_v36 = vld [vmem:[%s6258_s16] sm:$0xff]  ;;  %v3097_v56 = vld [vmem:[%s6258_s16 + $0x8] sm:$0xff]  ;;  %v3098_v3 = vld [vmem:[%s6258_s16 + $0x10] sm:$0xff]  ;;  %v4577_v7 = vmov 0.0|0.0   ;;  %vm4578_vm15 = vmmov 0   ;;  %v4579_v48 = vmov 0.0   ;;  %s4574_s18 = sphi %s6048_s18, %s3039_s18  }
 0x4d4   : >> { %4184 = vmatprep.subr.bf16.mxu0 %v4577_v7  ;;  %v4185_v49 = vpack.c.bf16 %v3097_v56, %v3096_v36  ;;  %v3099_v6 = vld [vmem:[%s6258_s16 + $0x18] sm:$0xff]  ;;  %4155 = vmatprep.mubr.msk.f32.mxu0 %vm4578_vm15, %v4579_v48  ;;  %s6066_s27 = sshll.u32 %s4574_s18, 3  ;;  %v3100_v24 = vld [vmem:[%s6258_s16 + $0x20] sm:$0xff]  ;;  %v3101_v40 = vld [vmem:[%s6258_s16 + $0x28] sm:$0xff]  ;;  %s3039_s18 = sadd.s32 1, %s4574_s18  }
 0x4d5   : >> { %v4188_v22 = vpack.c.bf16 %v3099_v6, %v3098_v3  ;;  %s3041_s20 = scalar_lea.vmem [#allocation2], %s6066_s27  ;;  %s3043_s21 = scalar_lea.vmem [#allocation3], %s6066_s27  ;;  %v3047_v16 = vld [vmem:[#allocation7] sm:$0x1]  ;;  %v4191_v57 = vpack.c.bf16 %v3101_v40, %v3100_v24  ;;  %v3102_v34 = vld [vmem:[%s6258_s16 + $0x30] sm:$0xff]  ;;  %v3103_v62 = vld [vmem:[%s6258_s16 + $0x38] sm:$0xff] }
 0x4d6   : >> { %4186 = vmatpush3.bf16.msra.mxu0 %v4185_v49  ;;  %v3042_v45 = vld [vmem:[%s3041_s20] sm:$0xff]  ;;  %v4194_v1 = vpack.c.bf16 %v3103_v62, %v3102_v34  ;;  %v3105_v19 = vld [vmem:[%s6258_s16 + $0x48] sm:$0xff]  ;;  %v3106_v4 = vld [vmem:[%s6258_s16 + $0x50] sm:$0xff]  ;;  %s3045_s22 = scalar_lea.vmem [#allocation4], %s6066_s27  ;;  %s3182_s23 = scalar_lea.vmem [#allocation5], %s6066_s27 }
 0x4d7   : >> { %4187 = vmatprep.subr.bf16.mxu0 %v4577_v7  ;;  %v3048_v5 = vmul.f32 %v3047_v16, %v3042_v45  ;;  %v3104_v27 = vld [vmem:[%s6258_s16 + $0x40] sm:$0xff]  ;;  %v3107_v53 = vld [vmem:[%s6258_s16 + $0x58] sm:$0xff]  ;;  %v3109_v52 = vld [vmem:[%s6258_s16 + $0x68] sm:$0xff]  ;;  %p3036_p8 = scmp.ge.s32.totalorder %s3039_s18, 16  }
 0x4d8   : >> { %v4197_v44 = vpack.c.bf16 %v3105_v19, %v3104_v27  ;;  %v4200_v33 = vpack.c.bf16 %v3107_v53, %v3106_v4  ;;  %v3108_v28 = vld [vmem:[%s6258_s16 + $0x60] sm:$0xff]  ;;  %v3110_v9 = vld [vmem:[%s6258_s16 + $0x70] sm:$0xff]  ;;  %v3111_v63 = vld [vmem:[%s6258_s16 + $0x78] sm:$0xff] }
 0x4d9   : >> { %v3044_v37 = vld [vmem:[%s3043_s21] sm:$0xff]  ;;  %v4203_v51 = vpack.c.bf16 %v3109_v52, %v3108_v28  ;;  %v4206_v47 = vpack.c.bf16 %v3111_v63, %v3110_v9  ;;  %v6383_v16 = vld [vmem:[#allocation15_spill] sm:$0xff] (%p3036_p8) }
 0x4da   : >> { %4189 = vmatpush3.bf16.msra.mxu0 %v4188_v22  ;;  %v3049_v29 = vadd.f32 %v3048_v5, %v3044_v37  ;;  %v3375_v24 = vld [vmem:[%s6255_s13] sm:$0xf] (%p3036_p8)  ;;  %v6385_v62 = vld [vmem:[#allocation23_spill] sm:$0xff] (%p3036_p8) }
 0x4db   : >> { %4190 = vmatprep.subr.bf16.mxu0 %v4577_v7  ;;  %v6382_v40 = vld [vmem:[#allocation13_spill] sm:$0xff] (%p3036_p8)  ;;  %4219 = vmatprep.subr.msk.bf16.mxu1 (%p3036_p8), %vm1523_vm3, %v3375_v24  ;;  %v6387_v27 = vld [vmem:[#allocation14_spill] sm:$0xff] (%p3036_p8) }
 0x4dc   : >> { %3050 = vst [vmem:[#allocation6] sm:$0x1] %v3049_v29  ;;  %v3052_v46 = vrot.slane %v3049_v29, 7  ;;  %v6384_v5 = vld [vmem:[#allocation21_spill] sm:$0xff] (%p3036_p8)  ;;  %v3767_v29 = vmul.f32 (%p3036_p8), -1.442695, %v6385_v62 }
 0x4dd   : > { %v3766_v34 = vmul.f32 (%p3036_p8), -1.442695, %v6384_v5  ;;  %v3761_v19 = vmul.f32 (%p3036_p8), -1.442695, %v6387_v27  ;;  %v6390_v53 = vld [vmem:[#allocation17_spill] sm:$0xff] (%p3036_p8) }
 0x4de   : >> { %4192 = vmatpush3.bf16.msra.mxu0 %v4191_v57  ;;  %v3054_v50 = vmul.f32 %v3052_v46, %v3042_v45  ;;  %v3759_v57 = vmul.f32 (%p3036_p8), -1.442695, %v6383_v16  ;;  %v6392_v28 = vld [vmem:[#allocation25_spill] sm:$0xff] (%p3036_p8) }
 0x4df   : >> { %4193 = vmatprep.subr.bf16.mxu0 %v4577_v7  ;;  %v3770_v52 = vmul.f32 (%p3036_p8), -1.442695, %v6392_v28 }
 0x4e0   : >> { %v3055_v10 = vadd.f32 %v3054_v50, %v3044_v37  ;;  %v6388_v50 = vld [vmem:[#allocation20_spill] sm:$0xff] (%p3036_p8) }
 0x4e2   : >> { %4195 = vmatpush3.bf16.msra.mxu0 %v4194_v1  ;;  %3056 = vst [vmem:[#allocation6] sm:$0x2] %v3055_v10  ;;  %v3058_v31 = vrot.slane %v3055_v10, 7  ;;  %v6386_v1 = vld [vmem:[#allocation12_spill] sm:$0xff] (%p3036_p8)  ;;  %v6389_v10 = vld [vmem:[#allocation22_spill] sm:$0xff] (%p3036_p8) }
 0x4e3   : >> { %4196 = vmatprep.subr.bf16.mxu0 %v4577_v7  ;;  %v3760_v46 = vmul.f32 (%p3036_p8), -1.442695, %v6386_v1  ;;  %v3769_v4 = vmul.f32 (%p3036_p8), -1.442695, %v6389_v10 }
 0x4e4   : >> { %v3060_v12 = vmul.f32 %v3058_v31, %v3042_v45  ;;  %v3762_v31 = vmul.f32 (%p3036_p8), -1.442695, %v6390_v53 }
 0x4e6   : >> { %4198 = vmatpush3.bf16.msra.mxu0 %v4197_v44  ;;  %v3061_v21 = vadd.f32 %v3060_v12, %v3044_v37  ;;  %v3768_v44 = vmul.f32 (%p3036_p8), -1.442695, %v6388_v50 }
 0x4e7   : >> { %4199 = vmatprep.subr.bf16.mxu0 %v4577_v7 }
 0x4e8   : >> { %3062 = vst [vmem:[#allocation6] sm:$0x4] %v3061_v21  ;;  %v3064_v58 = vrot.slane %v3061_v21, 7 }
 0x4ea   : >> { %4201 = vmatpush3.bf16.msra.mxu0 %v4200_v33  ;;  %v3066_v15 = vmul.f32 %v3064_v58, %v3042_v45  ;;  %v6391_v33 = vld [vmem:[#allocation19_spill] sm:$0xff] (%p3036_p8) }
 0x4eb   : >> { %4202 = vmatprep.subr.bf16.mxu0 %v4577_v7  ;;  %v3763_v12 = vmul.f32 (%p3036_p8), -1.442695, %v6391_v33 }
 0x4ec   : >> { %v3067_v41 = vadd.f32 %v3066_v15, %v3044_v37 }
 0x4ee   : >> { %4204 = vmatpush3.bf16.msra.mxu0 %v4203_v51  ;;  %3068 = vst [vmem:[#allocation6] sm:$0x8] %v3067_v41  ;;  %v3070_v60 = vrot.slane %v3067_v41, 7  ;;  %v6393_v51 = vld [vmem:[#allocation27_spill] sm:$0xff] (%p3036_p8) }
 0x4ef   : >> { %4205 = vmatprep.subr.bf16.mxu0 %v4577_v7  ;;  %v3046_v7 = vld [vmem:[%s3045_s22] sm:$0xff]  ;;  %v3771_v58 = vmul.f32 (%p3036_p8), -1.442695, %v6393_v51 }
 0x4f0   : >> { %v3072_v39 = vmul.f32 %v3070_v60, %v3042_v45 }
 0x4f2   : >> { %4207 = vmatpush3.bf16.msra.mxu0 %v4206_v47  ;;  %v3073_v42 = vadd.f32 %v3072_v39, %v3044_v37  ;;  %v6394_v47 = vld [vmem:[#allocation16_spill] sm:$0xff] (%p3036_p8)  ;;  %v6134_v39 = vld [vmem:[%s6254_s12] ss:$0 sm:$0xff] (%p3036_p8) }
 0x4f3   : > { %4218 = vmatprep.subr.msk.bf16.mxu0 (%p3036_p8), %vm1523_vm3, %v3375_v24  ;;  %v3764_v41 = vmul.f32 (%p3036_p8), -1.442695, %v6394_v47 }
 0x4f4   : >> { %3074 = vst [vmem:[#allocation6] sm:$0x10] %v3073_v42  ;;  %v3076_v17 = vrot.slane %v3073_v42, 7 }
 0x4f6   : >> { %v3078_v59 = vmul.f32 %v3076_v17, %v3042_v45 }
 0x4f8   : >> { %v3079_v30 = vadd.f32 %v3078_v59, %v3044_v37 }
 0x4fa   : >> { %3080 = vst [vmem:[#allocation6] sm:$0x20] %v3079_v30  ;;  %v3082_v11 = vrot.slane %v3079_v30, 7 }
 0x4fc   : >> { %v3084_v25 = vmul.f32 %v3082_v11, %v3042_v45 }
 0x4fe   : >> { %v3085_v14 = vadd.f32 %v3084_v25, %v3044_v37  ;;  %v3207_v25 = vmul.f32 (%p3036_p8), %v6134_v39, %v5357_v35  ;;  %v3216_v35 = vmul.f32 (%p3036_p8), %v6134_v39, %v5417_v61 }
 0x500   : >> { %3086 = vst [vmem:[#allocation6] sm:$0x40] %v3085_v14  ;;  %v3088_v36 = vrot.slane %v3085_v14, 7 }
 0x502   : >> { %v3090_v56 = vmul.f32 %v3088_v36, %v3042_v45  ;;  %v3758_v45 = vmul.f32 (%p3036_p8), -1.442695, %v6382_v40 }
 0x504   : >> { %v3091_v3 = vadd.f32 %v3090_v56, %v3044_v37  ;;  %v3401_v37 = vsel (%p3036_p8), %vm1523_vm3, %v3375_v24, 0  ;;  %4464 = vpow2.f32 (%p3036_p8), %v3758_v45  ;;  %v3215_v45 = vmul.f32 (%p3036_p8), %v6134_v39, %v5423_v20 }
 0x505   : > { %4211 = vmatpush3.bf16.msra.mxu1 (%p3036_p8), %v3401_v37  ;;  %4466 = vpow2.f32 (%p3036_p8), %v3759_v57  ;;  %v3210_v20 = vmul.f32 (%p3036_p8), %v6134_v39, %v5258_v26 }
 0x506   : >> { %3092 = vst [vmem:[#allocation6] sm:$0x80] %v3091_v3  ;;  %3093 = vst [vmem:[#allocation7 - $0x7] sm:$0x80] %v3091_v3  ;;  %4468 = vpow2.f32 (%p3036_p8), %v3766_v34  ;;  %v6395_v3 = vld [vmem:[#allocation28_spill] sm:$0xff] (%p3036_p8) }
 0x507   : > { %4470 = vpow2.f32 (%p3036_p8), %v3767_v29 }
 0x508   : > { %4472 = vpow2.f32 (%p3036_p8), %v3760_v46  ;;  %v3209_v46 = vmul.f32 (%p3036_p8), %v6134_v39, %v5273_v2 }
 0x509   : > { %4474 = vpow2.f32 (%p3036_p8), %v3761_v19 }
 0x50a   : > { %4476 = vpow2.f32 (%p3036_p8), %v3768_v44 }
 0x50b   : > { %4478 = vpow2.f32 (%p3036_p8), %v3769_v4 }
 0x50c   : > { %4480 = vpow2.f32 (%p3036_p8), %v3762_v31 }
 0x50d   : >> { %v3094_v49 = vld [vmem:[#allocation6] sm:$0xff]  ;;  %4482 = vpow2.f32 (%p3036_p8), %v3763_v12 }
 0x50e   : >> { %v3095_v6 = vmul.f32 %v3094_v49, %v3046_v7  ;;  %v4465_v21 = vpop.eup (%p3036_p8), %4464  ;;  %4484 = vpow2.f32 (%p3036_p8), %v3770_v52  ;;  %v3208_v7 = vmul.f32 (%p3036_p8), %v6134_v39, %v6395_v3 }
 0x50f   : > { %v4467_v9 = vpop.eup (%p3036_p8), %4466  ;;  %v3287_v63 = vadd.f32 (%p3036_p8), 1.0, %v4465_v21  ;;  %4486 = vpow2.f32 (%p3036_p8), %v3771_v58  ;;  %v3217_v58 = vmul.f32 (%p3036_p8), %v6134_v39, %v5433_v0 }
 0x510   : >> { %4156 = vmatmul.mubr.f32.vlgmr.msra.gmra.mrb[0].mxu0 %v3095_v6  ;;  %v3288_v15 = vadd.f32 (%p3036_p8), 1.0, %v4467_v9  ;;  %v4469_v60 = vpop.eup (%p3036_p8), %4468 }
 0x511   : > { %4159 = vmatpush3.bf16.msra.mxu0 (%p3036_p8), %v3401_v37  ;;  %4488 = vrcp.f32 (%p3036_p8), %v3287_v63  ;;  %v4471_v42 = vpop.eup (%p3036_p8), %4470  ;;  %v3295_v17 = vadd.f32 (%p3036_p8), 1.0, %v4469_v60  ;;  %v6396_v63 = vld [vmem:[#allocation18_spill] sm:$0xff] (%p3036_p8) }
 0x512   : > { %4490 = vrcp.f32 (%p3036_p8), %v3288_v15  ;;  %v4473_v59 = vpop.eup (%p3036_p8), %4472  ;;  %v3296_v30 = vadd.f32 (%p3036_p8), 1.0, %v4471_v42  ;;  %v3765_v2 = vmul.f32 (%p3036_p8), -1.442695, %v6396_v63 }
 0x513   : > { %4492 = vpow2.f32 (%p3036_p8), %v3764_v41  ;;  %v4475_v11 = vpop.eup (%p3036_p8), %4474  ;;  %v3289_v14 = vadd.f32 (%p3036_p8), 1.0, %v4473_v59 }
 0x514   : > { %4494 = vrcp.f32 (%p3036_p8), %v3295_v17  ;;  %v4477_v36 = vpop.eup (%p3036_p8), %4476  ;;  %v3290_v49 = vadd.f32 (%p3036_p8), 1.0, %v4475_v11  ;;  %v6397_v17 = vld [vmem:[#allocation24_spill] sm:$0xff] (%p3036_p8) }
 0x515   : > { %4496 = vrcp.f32 (%p3036_p8), %v3296_v30  ;;  %v4479_v6 = vpop.eup (%p3036_p8), %4478  ;;  %v3772_v59 = vmul.f32 (%p3036_p8), -1.442695, %v6397_v17 }
 0x516   : > { %4498 = vrcp.f32 (%p3036_p8), %v3289_v14  ;;  %v4481_v24 = vpop.eup (%p3036_p8), %4480  ;;  %v3298_v37 = vadd.f32 (%p3036_p8), 1.0, %v4479_v6  ;;  %v3218_v6 = vmul.f32 (%p3036_p8), %v6134_v39, %v5436_v38  ;;  %v3219_v38 = vmul.f32 (%p3036_p8), %v6134_v39, %v5444_v55 }
 0x517   : > { %4500 = vrcp.f32 (%p3036_p8), %v3290_v49  ;;  %v4483_v57 = vpop.eup (%p3036_p8), %4482  ;;  %v3291_v19 = vadd.f32 (%p3036_p8), 1.0, %v4481_v24 }
 0x518   : > { %v4485_v44 = vpop.eup (%p3036_p8), %4484  ;;  %v3292_v52 = vadd.f32 (%p3036_p8), 1.0, %v4483_v57 }
 0x519   : > { %v4487_v61 = vpop.eup (%p3036_p8), %4486  ;;  %v3299_v9 = vadd.f32 (%p3036_p8), 1.0, %v4485_v44 }
 0x51a   : > { %v3300_v42 = vadd.f32 (%p3036_p8), 1.0, %v4487_v61 }
 0x51b   : > { %v4489_v15 = vpop.eup (%p3036_p8), %4488 }
 0x51c   : > { %v4491_v30 = vpop.eup (%p3036_p8), %4490  ;;  %v3335_v26 = vmul.f32 (%p3036_p8), %v4489_v15, %v6382_v40 }
 0x51d   : > { %v4493_v14 = vpop.eup (%p3036_p8), %4492  ;;  %v3336_v0 = vmul.f32 (%p3036_p8), %v4491_v30, %v6383_v16 }
 0x5de   : > { %3038 = sbr.rel (!%p3036_p8) target bundleno = 1235 (0x4d3), region = 133 }
 0x5e3   : >> { %v3178_v48 = vpop.f32.mrb[0].mxu0 }
 0x5e4   : >> { %3183 = vst.msk [vmem:[%s3182_s23] sm:$0xff] %vm1353_vm7, %v3178_v48  ;;  %v4157_v22 = vpop.f32.mrb[1].mxu0 }
 0x5e5   : > { %v3297_v22 = vadd.f32 1.0, %v4477_v36 }
 0x5e7   : > { %4502 = vrcp.f32 %v3297_v22 }
 0x5e8   : > { %4504 = vrcp.f32 %v3298_v37 }
 0x5e9   : > { %4506 = vrcp.f32 %v3291_v19 }
 0x5ea   : > { %4508 = vrcp.f32 %v3292_v52 }
 0x5eb   : > { %v3184_v56 = vld [vmem:[#allocation5] sm:$0xff]  ;;  %v3185_v48 = vld [vmem:[#allocation5 + $0x8] sm:$0xff]  ;;  %v3186_v12 = vld [vmem:[#allocation5 + $0x10] sm:$0xff]  ;;  %4510 = vrcp.f32 %v3299_v9 }
 0x5ec   : > { %v3223_v34 = vadd.f32 %v3207_v25, %v3184_v56  ;;  %v3192_v29 = vld [vmem:[#allocation5 + $0x40] sm:$0xff]  ;;  %v3224_v4 = vadd.f32 %v3208_v7, %v3185_v48  ;;  %v3193_v31 = vld [vmem:[#allocation5 + $0x48] sm:$0xff]  ;;  %v3187_v21 = vld [vmem:[#allocation5 + $0x18] sm:$0xff]  ;;  %v3225_v25 = vadd.f32 %v3209_v46, %v3186_v12  ;;  %4512 = vrcp.f32 %v3300_v42  ;;  %v4495_v7 = vpop.eup %4494 }
 0x5ed   : > { %v3231_v41 = vadd.f32 %v3215_v45, %v3192_v29  ;;  %v3194_v60 = vld [vmem:[#allocation5 + $0x50] sm:$0xff]  ;;  %v3232_v11 = vadd.f32 %v3216_v35, %v3193_v31  ;;  %v3226_v36 = vadd.f32 %v3210_v20, %v3187_v21  ;;  %v6398_v56 = vld [vmem:[#allocation26_spill] sm:$0xff]  ;;  %4514 = vpow2.f32 %v3765_v2  ;;  %v4497_v22 = vpop.eup %4496  ;;  %v3195_v45 = vld [vmem:[#allocation5 + $0x58] sm:$0xff] }
 0x5ee   : > { %v3773_v3 = vmul.f32 -1.442695, %v6398_v56  ;;  %v3351_v49 = vmul.f32 %v3335_v26, %v3223_v34  ;;  %v3233_v48 = vadd.f32 %v3217_v58, %v3194_v60  ;;  %v3352_v24 = vmul.f32 %v3336_v0, %v3224_v4  ;;  %v4499_v16 = vpop.eup %4498  ;;  %v3188_v57 = vld [vmem:[#allocation5 + $0x20] sm:$0xff]  ;;  %v3189_v4 = vld [vmem:[#allocation5 + $0x28] sm:$0xff] }
 0x5ef   : > { %v3343_v40 = vmul.f32 %v4495_v7, %v6384_v5  ;;  %v3211_v35 = vmul.f32 %v6134_v39, %v5374_v23  ;;  %4516 = vpow2.f32 %v3772_v59  ;;  %v3344_v37 = vmul.f32 %v4497_v22, %v6385_v62  ;;  %v4501_v46 = vpop.eup %4500  ;;  %v3196_v20 = vld [vmem:[#allocation5 + $0x60] sm:$0xff]  ;;  %v3197_v58 = vld [vmem:[#allocation5 + $0x68] sm:$0xff] }
 0x5f0   : > { %v3212_v34 = vmul.f32 %v6134_v39, %v5377_v54  ;;  %v3293_v29 = vadd.f32 1.0, %v4493_v14  ;;  %v3367_v19 = vpack.c.bf16 %v3352_v24, %v3351_v49  ;;  %v3337_v5 = vmul.f32 %v4499_v16, %v6386_v1 }
 0x5f1   : > { %v3359_v44 = vmul.f32 %v3343_v40, %v3231_v41  ;;  %4518 = vpow2.f32 %v3773_v3  ;;  %v4503_v23 = vpop.eup %4502  ;;  %v3360_v31 = vmul.f32 %v3344_v37, %v3232_v11  ;;  %v3338_v12 = vmul.f32 %v4501_v46, %v6387_v27  ;;  %v3191_v37 = vld [vmem:[#allocation5 + $0x38] sm:$0xff] }
 0x5f2   : > { %v3234_v62 = vadd.f32 %v3218_v6, %v3195_v45  ;;  %v3220_v54 = vmul.f32 %v6134_v39, %v5441_v8  ;;  %v4505_v52 = vpop.eup %4504  ;;  %4160 = vmatprep.mubr.msk.bf16.mxu0 %vm1353_vm7, %v3367_v19  ;;  %v3353_v55 = vmul.f32 %v3337_v5, %v3225_v25  ;;  %v3345_v61 = vmul.f32 %v4503_v23, %v6388_v50 }
 0x5f3   : > { %v3227_v21 = vadd.f32 %v3211_v35, %v3188_v57  ;;  %v4507_v1 = vpop.eup %4506  ;;  %v3371_v9 = vpack.c.bf16 %v3360_v31, %v3359_v44  ;;  %v3354_v2 = vmul.f32 %v3338_v12, %v3226_v36  ;;  %v3346_v15 = vmul.f32 %v4505_v52, %v6389_v10  ;;  %v3190_v35 = vld [vmem:[#allocation5 + $0x30] sm:$0xff]  ;;  %v3199_v44 = vld [vmem:[#allocation5 + $0x78] sm:$0xff] }
 0x5f4   : > { %v3228_v41 = vadd.f32 %v3212_v34, %v3189_v4  ;;  %v4509_v27 = vpop.eup %4508  ;;  %v3361_v60 = vmul.f32 %v3345_v61, %v3233_v48  ;;  %v3339_v42 = vmul.f32 %v4507_v1, %v6390_v53  ;;  %v3235_v59 = vadd.f32 %v3219_v38, %v3196_v20 }
 0x5f5   : > { %4520 = vrcp.f32 %v3293_v29  ;;  %v4511_v8 = vpop.eup %4510  ;;  %4168 = vmatprep.mubr.msk.bf16.mxu1 %vm1353_vm7, %v3371_v9  ;;  %v3368_v30 = vpack.c.bf16 %v3354_v2, %v3353_v55  ;;  %v3362_v26 = vmul.f32 %v3346_v15, %v3234_v62  ;;  %v3340_v50 = vmul.f32 %v4509_v27, %v6391_v33  ;;  %v3198_v29 = vld [vmem:[#allocation5 + $0x70] sm:$0xff] }
 0x5f6   : > { %v3236_v11 = vadd.f32 %v3220_v54, %v3197_v58  ;;  %v4513_v25 = vpop.eup %4512  ;;  %v3355_v14 = vmul.f32 %v3339_v42, %v3227_v21  ;;  %v3347_v0 = vmul.f32 %v4511_v8, %v6392_v28  ;;  %v3214_v16 = vmul.f32 %v6134_v39, %v5420_v13 }
 0x5f7   : > { %v4515_v10 = vpop.eup %4514  ;;  %4161 = vmatmul.mubr.msk.bf16.vlgmr.msra.gmra.mrb[0].mxu0 %vm1353_vm7, %v3368_v30  ;;  %v3372_v36 = vpack.c.bf16 %v3362_v26, %v3361_v60  ;;  %v3356_v3 = vmul.f32 %v3340_v50, %v3228_v41  ;;  %v3348_v53 = vmul.f32 %v4513_v25, %v6393_v51  ;;  %v3213_v51 = vmul.f32 %v6134_v39, %v5425_v43 }
 0x5f8   : > { %v3363_v49 = vmul.f32 %v3347_v0, %v3235_v59  ;;  %v3294_v6 = vadd.f32 1.0, %v4515_v10  ;;  %v3221_v57 = vmul.f32 %v6134_v39, %v5453_v32  ;;  %v3222_v46 = vmul.f32 %v6134_v39, %v5456_v18 }
 0x5f9   : > { %v4517_v7 = vpop.eup %4516  ;;  %4169 = vmatmul.mubr.msk.bf16.vlgmr.msra.gmra.mrb[0].mxu1 %vm1353_vm7, %v3372_v36  ;;  %v3369_v48 = vpack.c.bf16 %v3356_v3, %v3355_v14  ;;  %v3364_v22 = vmul.f32 %v3348_v53, %v3236_v11  ;;  %v3229_v34 = vadd.f32 %v3213_v51, %v3190_v35  ;;  %v3230_v19 = vadd.f32 %v3214_v16, %v3191_v37 }
 0x5fa   : > { %v3301_v33 = vadd.f32 1.0, %v4517_v7  ;;  %4522 = vrcp.f32 %v3294_v6  ;;  %v3237_v5 = vadd.f32 %v3221_v57, %v3198_v29  ;;  %v3238_v31 = vadd.f32 %v3222_v46, %v3199_v44 }
 0x5fb   : > { %v4519_v24 = vpop.eup %4518  ;;  %4164 = vmatprep.mubr.msk.bf16.mxu0 %vm1353_vm7, %v3369_v48  ;;  %v3373_v28 = vpack.c.bf16 %v3364_v22, %v3363_v49 }
 0x5fc   : > { %v3302_v40 = vadd.f32 1.0, %v4519_v24  ;;  %4524 = vrcp.f32 %v3301_v33 }
 0x5fd   : > { %4172 = vmatprep.mubr.msk.bf16.mxu1 %vm1353_vm7, %v3373_v28 }
 0x5fe   : > { %4526 = vrcp.f32 %v3302_v40 }
 0x5ff   : > { %v4521_v45 = vpop.eup %4520 }
 0x600   : > { %v3341_v38 = vmul.f32 %v4521_v45, %v6394_v47 }
 0x602   : > { %v3357_v13 = vmul.f32 %v3341_v38, %v3229_v34 }
 0x604   : > { %v4523_v43 = vpop.eup %4522 }
 0x605   : > { %v3342_v23 = vmul.f32 %v4523_v43, %v6396_v63 }
 0x606   : > { %v4525_v4 = vpop.eup %4524 }
 0x607   : > { %v3349_v32 = vmul.f32 %v4525_v4, %v6397_v17  ;;  %v3358_v47 = vmul.f32 %v3342_v23, %v3230_v19 }
 0x608   : > { %v4527_v12 = vpop.eup %4526 }
 0x609   : > { %v3350_v62 = vmul.f32 %v4527_v12, %v6398_v56  ;;  %v3365_v18 = vmul.f32 %v3349_v32, %v3237_v5  ;;  %v3370_v39 = vpack.c.bf16 %v3358_v47, %v3357_v13 }
 0x60b   : > { %v3366_v20 = vmul.f32 %v3350_v62, %v3238_v31  ;;  %4165 = vmatmul.mubr.msk.bf16.gmra.mrb[4].mxu0 %vm1353_vm7, %v3370_v39 }
 0x60d   : > { %v3374_v63 = vpack.c.bf16 %v3366_v20, %v3365_v18 }
 0x60f   : > { %4173 = vmatmul.mubr.msk.bf16.gmra.mrb[4].mxu1 %vm1353_vm7, %v3374_v63 }
 0x6ca   : > { %v4162_v54 = vpop.f32.mrb[0].mxu0 }
 0x6cb   : > { %3502 = vst.msk [vmem:[%s4708_s26 + $0x10] sm:$0xff] %vm612_vm1, %v4162_v54  ;;  %v3437_v17 = vpop.f32.mrb[1].mxu0 }
 0x6cc   : > { %v4170_v52 = vpop.f32.mrb[0].mxu1  ;;  %3500 = vst.msk [vmem:[%s4708_s26] sm:$0xff] %vm612_vm1, %v3437_v17  ;;  %v4163_v56 = vpop.f32.mrb[2].mxu0 }
 0x6cd   : > { %3510 = vst.msk [vmem:[%s4708_s26 + $0x50] sm:$0xff] %vm612_vm1, %v4170_v52  ;;  %v3469_v55 = vpop.f32.mrb[1].mxu1  ;;  %3503 = vst.msk [vmem:[%s4708_s26 + $0x18] sm:$0xff] %vm612_vm1, %v4163_v56  ;;  %v3440_v61 = vpop.f32.mrb[3].mxu0 }
 0x6ce   : > { %3508 = vst.msk [vmem:[%s4708_s26 + $0x40] sm:$0xff] %vm612_vm1, %v3469_v55  ;;  %v4171_v21 = vpop.f32.mrb[2].mxu1  ;;  %3501 = vst.msk [vmem:[%s4708_s26 + $0x8] sm:$0xff] %vm612_vm1, %v3440_v61 }
 0x6cf   : > { %3511 = vst.msk [vmem:[%s4708_s26 + $0x58] sm:$0xff] %vm612_vm1, %v4171_v21  ;;  %v3472_v58 = vpop.f32.mrb[3].mxu1 }
 0x6d0   : > { %3509 = vst.msk [vmem:[%s4708_s26 + $0x48] sm:$0xff] %vm612_vm1, %v3472_v58 }
 0x6de   : > { %v4166_v1 = vpop.f32.mrb[4].mxu0 }
 0x6df   : > { %3506 = vst.msk [vmem:[%s4708_s26 + $0x30] sm:$0xff] %vm612_vm1, %v4166_v1  ;;  %v3453_v9 = vpop.f32.mrb[5].mxu0 }
 0x6e0   : > { %3504 = vst.msk [vmem:[%s4708_s26 + $0x20] sm:$0xff] %vm612_vm1, %v3453_v9  ;;  %v4167_v2 = vpop.f32.mrb[6].mxu0 }
 0x6e1   : > { %3507 = vst.msk [vmem:[%s4708_s26 + $0x38] sm:$0xff] %vm612_vm1, %v4167_v2  ;;  %v3456_v41 = vpop.f32.mrb[7].mxu0 }
 0x6e2   : > { %v4174_v15 = vpop.f32.mrb[4].mxu1  ;;  %3505 = vst.msk [vmem:[%s4708_s26 + $0x28] sm:$0xff] %vm612_vm1, %v3456_v41 }
 0x6e3   : > { %3514 = vst.msk [vmem:[%s4708_s26 + $0x70] sm:$0xff] %vm612_vm1, %v4174_v15  ;;  %v3485_v27 = vpop.f32.mrb[5].mxu1 }
 0x6e4   : > { %3512 = vst.msk [vmem:[%s4708_s26 + $0x60] sm:$0xff] %vm612_vm1, %v3485_v27  ;;  %v4175_v60 = vpop.f32.mrb[6].mxu1 }
 0x6e5   : > { %3515 = vst.msk [vmem:[%s4708_s26 + $0x78] sm:$0xff] %vm612_vm1, %v4175_v60  ;;  %v3488_v42 = vpop.f32.mrb[7].mxu1 }
 0x6e6   : > { %3513 = vst.msk [vmem:[%s4708_s26 + $0x68] sm:$0xff] %vm612_vm1, %v3488_v42 }
 0x6e7 PF: > { %s27_s28 = sadd.s32 1, %s4570_s28   ;;  %s6399_s24 = sld [smem:[#allocation9_spill]] }
 0x6e8   : > { %p24_p9 = scmp.ge.s32.totalorder %s27_s28, 6   ;;  %s6400_s25 = sld [smem:[#allocation10_spill]] }
 0x6e9   : > { %s6401_s26 = sld [smem:[#allocation11_spill]]  ;;  %s6402_s27 = smov %s6408_s0 }
 0x6ea   :  { %26 = sbr.rel (!%p24_p9) target bundleno = 4 (0x4), region = 144 }

</bundles_post_ra>
